<compile_context>
chip_gen: v7x
topology: tpu7x:2x2x1
jax: 0.10.0
libtpu: 0.0.40
codegen_flags: <defaults>
</compile_context>

<pallas_src>
import jax
import jax.numpy as jnp
from jax import lax
from jax.experimental import pallas as pl
from jax.experimental.pallas import tpu as pltpu

# ---------------- synthetic config (small shapes) ----------------
VOCAB = 100
BATCH = 2
SEQ = 8                    # bert_max_seq_length (small synthetic)
HIDDEN = 32                # bert_hidden_size
HEADS = 2
HEAD_DIM = HIDDEN // HEADS
INTERMEDIATE = 64
NUM_LAYERS = 3
NUM_HIDDEN_FEATURES = 2    # config.num_hidden_features
LABEL_DIM = 3              # config.label_dim
LN_EPS = 1e-12
M_ROWS = BATCH * SEQ


# ---------------- in-kernel helpers (pure f32 math) ----------------
def _layernorm(x, g, b):
    mean = jnp.mean(x, axis=-1, keepdims=True)
    xc = x - mean
    var = jnp.mean(xc * xc, axis=-1, keepdims=True)
    return xc * lax.rsqrt(var + LN_EPS) * g + b


def _gelu(x):
    # TODO(synk): BERT uses erf-based GELU; tanh approximation used here.
    c = jnp.float32(0.7978845608028654)  # sqrt(2/pi)
    return 0.5 * x * (1.0 + jnp.tanh(c * (x + 0.044715 * x * x * x)))


# ---------------- fused Pallas kernel (whole forward, one launch) ----------------
def _fused_bert_kernel(h0_ref, mask_ref,
                       emb_g_ref, emb_b_ref,
                       wqkv_ref, bqkv_ref, wo_ref, bo_ref,
                       ln1g_ref, ln1b_ref, ln2g_ref, ln2b_ref,
                       wffn1_ref, bffn1_ref, wffn2_ref, bffn2_ref,
                       clsw_ref, clsb_ref,
                       out_ref):
    f32 = jnp.float32
    bf16 = jnp.bfloat16
    scale = jnp.float32(1.0 / (HEAD_DIM ** 0.5))

    # --- embedding layernorm (no zero-residual input) ---
    h = _layernorm(h0_ref[...].astype(f32), emb_g_ref[...], emb_b_ref[...])

    # additive attention-mask bias: 0.0 where attend, -1e4 where masked  (B, S)
    bias = (1.0 - mask_ref[...].astype(f32)) * jnp.float32(-10000.0)

    cls_feats = []
    # NUM_LAYERS is tiny -> statically unroll the layer loop inside ONE kernel.
    for li in range(NUM_LAYERS):
        # fused QKV projection: one MXU pass, (M, H) @ (H, 3H), f32 accumulate
        qkv = jnp.dot(h.astype(bf16), wqkv_ref[li],
                      preferred_element_type=f32) + bqkv_ref[li]

        # attention core: head/batch split stays on-chip (static 2-D slices)
        ctx_blocks = [[None] * HEADS for _ in range(BATCH)]
        for hi in range(HEADS):
            c0 = hi * HEAD_DIM
            q_h = qkv[:, c0:c0 + HEAD_DIM]
            k_h = qkv[:, HIDDEN + c0:HIDDEN + c0 + HEAD_DIM]
            v_h = qkv[:, 2 * HIDDEN + c0:2 * HIDDEN + c0 + HEAD_DIM]
            for b in range(BATCH):
                r0 = b * SEQ
                q_b = q_h[r0:r0 + SEQ, :].astype(bf16)
                k_b = k_h[r0:r0 + SEQ, :].astype(bf16)
                v_b = v_h[r0:r0 + SEQ, :].astype(bf16)
                s = jnp.einsum("qd,kd->qk", q_b, k_b,
                               preferred_element_type=f32) * scale
                s = s + bias[b:b + 1, :]
                mx = jnp.max(s, axis=-1, keepdims=True)
                p = jnp.exp(s - mx)
                denom = jnp.sum(p, axis=-1, keepdims=True)
                ctx = jnp.dot(p.astype(bf16), v_b, preferred_element_type=f32)
                # fold 1/denom into the (S, D) context (EUP approx reciprocal)
                ctx_blocks[b][hi] = ctx * pl.reciprocal(denom, approx=True)
        ctx_all = jnp.concatenate(
            [jnp.concatenate(ctx_blocks[b], axis=-1) for b in range(BATCH)],
            axis=0)                                              # (M, H)

        attn_out = jnp.dot(ctx_all.astype(bf16), wo_ref[li],
                           preferred_element_type=f32) + bo_ref[li]
        h = _layernorm(attn_out + h, ln1g_ref[li], ln1b_ref[li])

        ffn = jnp.dot(h.astype(bf16), wffn1_ref[li],
                      preferred_element_type=f32) + bffn1_ref[li]
        ffn = _gelu(ffn)
        ffn = jnp.dot(ffn.astype(bf16), wffn2_ref[li],
                      preferred_element_type=f32) + bffn2_ref[li]
        h = _layernorm(ffn + h, ln2g_ref[li], ln2b_ref[li])

        if li >= NUM_LAYERS - NUM_HIDDEN_FEATURES:
            # first-token (CLS) row of each batch element, kept on-chip
            cls_feats.append(jnp.concatenate(
                [h[b * SEQ:b * SEQ + 1, :] for b in range(BATCH)], axis=0))

    # --- classifier head as epilogue (no extra launch) ---
    feat = jnp.concatenate(cls_feats, axis=-1)                   # (B, NHF*H)
    logits = jnp.dot(feat.astype(bf16), clsw_ref[...],
                     preferred_element_type=f32) + clsb_ref[...]
    out_ref[...] = logits.astype(out_ref.dtype)


_VMEM_SPEC = pl.BlockSpec(memory_space=pltpu.MemorySpace.VMEM)


def _cost_estimate(args, out_bytes):
    flops_layer = (2 * M_ROWS * HIDDEN * 3 * HIDDEN               # fused QKV
                   + BATCH * HEADS * 4 * SEQ * SEQ * HEAD_DIM     # attn core
                   + 2 * M_ROWS * HIDDEN * HIDDEN                 # out proj
                   + 4 * M_ROWS * HIDDEN * INTERMEDIATE)          # FFN
    flops = (NUM_LAYERS * flops_layer
             + 2 * BATCH * NUM_HIDDEN_FEATURES * HIDDEN * LABEL_DIM)
    trans = NUM_LAYERS * (BATCH * HEADS * SEQ * SEQ               # exp
                          + M_ROWS * INTERMEDIATE                 # tanh
                          + 2 * M_ROWS                            # rsqrt
                          + BATCH * HEADS * SEQ)                  # reciprocal
    byts = out_bytes + sum(int(a.size) * a.dtype.itemsize for a in args)
    return pl.CostEstimate(flops=flops, transcendentals=trans,
                           bytes_accessed=byts)


# ---------------- forward pass (AbuseDetectNet.forward) ----------------
@jax.jit
def abuse_detect_net_forward(params, x_ids, attention_mask):
    b, s = x_ids.shape
    # embedding gather + adds are data-dependent glue; kept in XLA wrapper
    h0 = (params["word_emb"][x_ids]
          + params["pos_emb"][None, :, :]
          + params["type_emb"][0][None, None, :]).reshape(b * s, HIDDEN)
    mask_f = attention_mask.astype(jnp.float32)

    args = (h0, mask_f,
            params["emb_ln_g"], params["emb_ln_b"],
            params["w_qkv"], params["b_qkv"], params["w_o"], params["b_o"],
            params["ln1_g"], params["ln1_b"], params["ln2_g"], params["ln2_b"],
            params["w_ffn1"], params["b_ffn1"],
            params["w_ffn2"], params["b_ffn2"],
            params["cls_w"], params["cls_b"])

    return pl.pallas_call(
        _fused_bert_kernel,
        out_shape=jax.ShapeDtypeStruct((b, LABEL_DIM), jnp.float32),
        in_specs=[_VMEM_SPEC] * len(args),
        out_specs=_VMEM_SPEC,
        cost_estimate=_cost_estimate(args, b * LABEL_DIM * 4),
    )(*args)


# ---------------- parameter init (deterministic, synthetic) ----------------
def init_params(key):
    def dense(k, fan_in, fan_out):
        kw, kb = jax.random.split(k)
        w = jax.random.normal(kw, (fan_in, fan_out), jnp.float32) * 0.02
        b = jax.random.normal(kb, (fan_out,), jnp.float32) * 0.02
        return w, b

    keys = jax.random.split(key, 4 + NUM_LAYERS)
    p = {}
    p["word_emb"] = jax.random.normal(keys[0], (VOCAB, HIDDEN), jnp.float32) * 0.02
    p["pos_emb"] = jax.random.normal(keys[1], (SEQ, HIDDEN), jnp.float32) * 0.02
    p["type_emb"] = jax.random.normal(keys[2], (2, HIDDEN), jnp.float32) * 0.02
    p["emb_ln_g"] = jnp.ones((1, HIDDEN), jnp.float32)
    p["emb_ln_b"] = jnp.zeros((1, HIDDEN), jnp.float32)

    w_qkv, b_qkv, w_o, b_o = [], [], [], []
    w_f1, b_f1, w_f2, b_f2 = [], [], [], []
    ln1g, ln1b, ln2g, ln2b = [], [], [], []
    for li in range(NUM_LAYERS):
        lk = jax.random.split(keys[4 + li], 6)
        wq, bq = dense(lk[0], HIDDEN, HIDDEN)
        wk, bk = dense(lk[1], HIDDEN, HIDDEN)
        wv, bv = dense(lk[2], HIDDEN, HIDDEN)
        wo, bo = dense(lk[3], HIDDEN, HIDDEN)
        w1, b1 = dense(lk[4], HIDDEN, INTERMEDIATE)
        w2, b2 = dense(lk[5], INTERMEDIATE, HIDDEN)
        w_qkv.append(jnp.concatenate([wq, wk, wv], axis=1))       # (H, 3H)
        b_qkv.append(jnp.concatenate([bq, bk, bv])[None, :])      # (1, 3H)
        w_o.append(wo); b_o.append(bo[None, :])
        w_f1.append(w1); b_f1.append(b1[None, :])
        w_f2.append(w2); b_f2.append(b2[None, :])
        ln1g.append(jnp.ones((1, HIDDEN), jnp.float32))
        ln1b.append(jnp.zeros((1, HIDDEN), jnp.float32))
        ln2g.append(jnp.ones((1, HIDDEN), jnp.float32))
        ln2b.append(jnp.zeros((1, HIDDEN), jnp.float32))

    # MXU inputs stored in bf16 (f32 accumulation in-kernel); biases / LN in f32
    p["w_qkv"] = jnp.stack(w_qkv).astype(jnp.bfloat16)
    p["b_qkv"] = jnp.stack(b_qkv)
    p["w_o"] = jnp.stack(w_o).astype(jnp.bfloat16)
    p["b_o"] = jnp.stack(b_o)
    p["w_ffn1"] = jnp.stack(w_f1).astype(jnp.bfloat16)
    p["b_ffn1"] = jnp.stack(b_f1)
    p["w_ffn2"] = jnp.stack(w_f2).astype(jnp.bfloat16)
    p["b_ffn2"] = jnp.stack(b_f2)
    p["ln1_g"] = jnp.stack(ln1g); p["ln1_b"] = jnp.stack(ln1b)
    p["ln2_g"] = jnp.stack(ln2g); p["ln2_b"] = jnp.stack(ln2b)

    cw, cb = dense(keys[3], HIDDEN * NUM_HIDDEN_FEATURES, LABEL_DIM)
    p["cls_w"] = cw.astype(jnp.bfloat16)
    p["cls_b"] = cb[None, :]
    return p


if __name__ == "__main__":
    key = jax.random.PRNGKey(0)
    pkey, xkey = jax.random.split(key)
    params = init_params(pkey)

    x_ids = jax.random.randint(xkey, (BATCH, SEQ), 0, VOCAB, dtype=jnp.int32)
    attention_mask = jnp.ones((BATCH, SEQ), dtype=jnp.int32)
    # mask out the last two tokens of the second example (exercise masking)
    attention_mask = attention_mask.at[1, -2:].set(0)

    logits = abuse_detect_net_forward(params, x_ids, attention_mask)
    jax.block_until_ready(logits)
    assert logits.shape == (BATCH, LABEL_DIM)
    assert bool(jnp.all(jnp.isfinite(logits)))
    print("KERNEL_OK")
</pallas_src>

<mosaic_0001>
module attributes {stable_mosaic.version = 11 : i64} {
  func.func @_fused_bert_kernel(%arg0: memref<16x32xf32, #tpu.memory_space<vmem>>, %arg1: memref<2x8xf32, #tpu.memory_space<vmem>>, %arg2: memref<1x32xf32, #tpu.memory_space<vmem>>, %arg3: memref<1x32xf32, #tpu.memory_space<vmem>>, %arg4: memref<3x32x96xbf16, #tpu.memory_space<vmem>>, %arg5: memref<3x1x96xf32, #tpu.memory_space<vmem>>, %arg6: memref<3x32x32xbf16, #tpu.memory_space<vmem>>, %arg7: memref<3x1x32xf32, #tpu.memory_space<vmem>>, %arg8: memref<3x1x32xf32, #tpu.memory_space<vmem>>, %arg9: memref<3x1x32xf32, #tpu.memory_space<vmem>>, %arg10: memref<3x1x32xf32, #tpu.memory_space<vmem>>, %arg11: memref<3x1x32xf32, #tpu.memory_space<vmem>>, %arg12: memref<3x32x64xbf16, #tpu.memory_space<vmem>>, %arg13: memref<3x1x64xf32, #tpu.memory_space<vmem>>, %arg14: memref<3x64x32xbf16, #tpu.memory_space<vmem>>, %arg15: memref<3x1x32xf32, #tpu.memory_space<vmem>>, %arg16: memref<64x3xbf16, #tpu.memory_space<vmem>>, %arg17: memref<1x3xf32, #tpu.memory_space<vmem>>, %arg18: memref<2x3xf32, #tpu.memory_space<vmem>>) attributes {dimension_semantics = [], scalar_prefetch = 0 : i64, scratch_operands = 0 : i64, tpu.core_type = #tpu.core_type<tc>} {
    %c0 = arith.constant 0 : index
    %c0_0 = arith.constant 0 : index
    %0 = vector.load %arg0[%c0, %c0_0] : memref<16x32xf32, #tpu.memory_space<vmem>>, vector<16x32xf32>
    %c0_1 = arith.constant 0 : index
    %c0_2 = arith.constant 0 : index
    %1 = vector.load %arg2[%c0_1, %c0_2] : memref<1x32xf32, #tpu.memory_space<vmem>>, vector<1x32xf32>
    %c0_3 = arith.constant 0 : index
    %c0_4 = arith.constant 0 : index
    %2 = vector.load %arg3[%c0_3, %c0_4] : memref<1x32xf32, #tpu.memory_space<vmem>>, vector<1x32xf32>
    %cst = arith.constant dense<0.000000e+00> : vector<16xf32>
    %3 = vector.multi_reduction <add>, %0, %cst [1] : vector<16x32xf32> to vector<16xf32>
    %4 = vector.shape_cast %3 : vector<16xf32> to vector<16x1xf32>
    %cst_5 = arith.constant 3.200000e+01 : f32
    %5 = vector.broadcast %cst_5 : f32 to vector<16x1xf32>
    %6 = arith.divf %4, %5 : vector<16x1xf32>
    %7 = vector.broadcast %6 : vector<16x1xf32> to vector<16x32xf32>
    %8 = arith.subf %0, %7 : vector<16x32xf32>
    %9 = arith.mulf %8, %8 : vector<16x32xf32>
    %cst_6 = arith.constant dense<0.000000e+00> : vector<16xf32>
    %10 = vector.multi_reduction <add>, %9, %cst_6 [1] : vector<16x32xf32> to vector<16xf32>
    %11 = vector.shape_cast %10 : vector<16xf32> to vector<16x1xf32>
    %cst_7 = arith.constant 3.200000e+01 : f32
    %12 = vector.broadcast %cst_7 : f32 to vector<16x1xf32>
    %13 = arith.divf %11, %12 : vector<16x1xf32>
    %cst_8 = arith.constant 9.99999996E-13 : f32
    %14 = vector.broadcast %cst_8 : f32 to vector<16x1xf32>
    %15 = arith.addf %13, %14 : vector<16x1xf32>
    %16 = math.rsqrt %15 : vector<16x1xf32>
    %17 = vector.broadcast %16 : vector<16x1xf32> to vector<16x32xf32>
    %18 = arith.mulf %8, %17 : vector<16x32xf32>
    %19 = vector.broadcast %1 : vector<1x32xf32> to vector<16x32xf32>
    %20 = arith.mulf %18, %19 : vector<16x32xf32>
    %21 = vector.broadcast %2 : vector<1x32xf32> to vector<16x32xf32>
    %22 = arith.addf %20, %21 : vector<16x32xf32>
    %c0_9 = arith.constant 0 : index
    %c0_10 = arith.constant 0 : index
    %23 = vector.load %arg1[%c0_9, %c0_10] : memref<2x8xf32, #tpu.memory_space<vmem>>, vector<2x8xf32>
    %cst_11 = arith.constant 1.000000e+00 : f32
    %24 = vector.broadcast %cst_11 : f32 to vector<2x8xf32>
    %25 = arith.subf %24, %23 : vector<2x8xf32>
    %cst_12 = arith.constant -1.000000e+04 : f32
    %26 = vector.broadcast %cst_12 : f32 to vector<2x8xf32>
    %27 = arith.mulf %25, %26 : vector<2x8xf32>
    %28 = arith.truncf %22 : vector<16x32xf32> to vector<16x32xbf16>
    %c0_13 = arith.constant 0 : index
    %c0_14 = arith.constant 0 : index
    %c0_15 = arith.constant 0 : index
    %29 = vector.load %arg4[%c0_13, %c0_14, %c0_15] : memref<3x32x96xbf16, #tpu.memory_space<vmem>>, vector<1x32x96xbf16>
    %30 = vector.shape_cast %29 : vector<1x32x96xbf16> to vector<32x96xbf16>
    %cst_16 = arith.constant dense<0.000000e+00> : vector<16x96xf32>
    %31 = tpu.matmul %28, %30, %cst_16 {dimension_numbers = #tpu.dot_dimension_numbers<[1], [0], [0], [1], [0, 0, 1, 1], [], []>} : vector<16x32xbf16>, vector<32x96xbf16>, vector<16x96xf32> -> vector<16x96xf32>
    %c0_17 = arith.constant 0 : index
    %c0_18 = arith.constant 0 : index
    %c0_19 = arith.constant 0 : index
    %32 = vector.load %arg5[%c0_17, %c0_18, %c0_19] : memref<3x1x96xf32, #tpu.memory_space<vmem>>, vector<1x1x96xf32>
    %33 = vector.shape_cast %32 : vector<1x1x96xf32> to vector<1x96xf32>
    %34 = vector.broadcast %33 : vector<1x96xf32> to vector<16x96xf32>
    %35 = arith.addf %31, %34 : vector<16x96xf32>
    %36 = vector.extract_strided_slice %35 {offsets = [0, 0], sizes = [16, 16], strides = [1, 1]} : vector<16x96xf32> to vector<16x16xf32>
    %37 = vector.extract_strided_slice %35 {offsets = [0, 32], sizes = [16, 16], strides = [1, 1]} : vector<16x96xf32> to vector<16x16xf32>
    %38 = vector.extract_strided_slice %35 {offsets = [0, 64], sizes = [16, 16], strides = [1, 1]} : vector<16x96xf32> to vector<16x16xf32>
    %39 = vector.extract_strided_slice %36 {offsets = [0, 0], sizes = [8, 16], strides = [1, 1]} : vector<16x16xf32> to vector<8x16xf32>
    %40 = arith.truncf %39 : vector<8x16xf32> to vector<8x16xbf16>
    %41 = vector.extract_strided_slice %37 {offsets = [0, 0], sizes = [8, 16], strides = [1, 1]} : vector<16x16xf32> to vector<8x16xf32>
    %42 = arith.truncf %41 : vector<8x16xf32> to vector<8x16xbf16>
    %43 = vector.extract_strided_slice %38 {offsets = [0, 0], sizes = [8, 16], strides = [1, 1]} : vector<16x16xf32> to vector<8x16xf32>
    %44 = arith.truncf %43 : vector<8x16xf32> to vector<8x16xbf16>
    "tpu.trace_start"() <{level = 10 : i32, message = "qd,kd->qk"}> : () -> ()
    %cst_20 = arith.constant dense<0.000000e+00> : vector<8x8xf32>
    %45 = tpu.matmul %40, %42, %cst_20 {dimension_numbers = #tpu.dot_dimension_numbers<[1], [1], [0], [0], [0, 0, 1, 0], [], []>} : vector<8x16xbf16>, vector<8x16xbf16>, vector<8x8xf32> -> vector<8x8xf32>
    "tpu.trace_stop"() : () -> ()
    %cst_21 = arith.constant 2.500000e-01 : f32
    %46 = vector.broadcast %cst_21 : f32 to vector<8x8xf32>
    %47 = arith.mulf %45, %46 : vector<8x8xf32>
    %48 = vector.extract_strided_slice %27 {offsets = [0, 0], sizes = [1, 8], strides = [1, 1]} : vector<2x8xf32> to vector<1x8xf32>
    %49 = vector.broadcast %48 : vector<1x8xf32> to vector<8x8xf32>
    %50 = arith.addf %47, %49 : vector<8x8xf32>
    %cst_22 = arith.constant dense<0xFF800000> : vector<8xf32>
    %51 = vector.multi_reduction <maximumf>, %50, %cst_22 [1] : vector<8x8xf32> to vector<8xf32>
    %52 = vector.shape_cast %51 : vector<8xf32> to vector<8x1xf32>
    %53 = vector.broadcast %52 : vector<8x1xf32> to vector<8x8xf32>
    %54 = arith.subf %50, %53 : vector<8x8xf32>
    %55 = math.exp %54 : vector<8x8xf32>
    %cst_23 = arith.constant dense<0.000000e+00> : vector<8xf32>
    %56 = vector.multi_reduction <add>, %55, %cst_23 [1] : vector<8x8xf32> to vector<8xf32>
    %57 = vector.shape_cast %56 : vector<8xf32> to vector<8x1xf32>
    %58 = arith.truncf %55 : vector<8x8xf32> to vector<8x8xbf16>
    %cst_24 = arith.constant dense<0.000000e+00> : vector<8x16xf32>
    %59 = tpu.matmul %58, %44, %cst_24 {dimension_numbers = #tpu.dot_dimension_numbers<[1], [0], [0], [1], [0, 0, 1, 1], [], []>} : vector<8x8xbf16>, vector<8x16xbf16>, vector<8x16xf32> -> vector<8x16xf32>
    %60 = tpu.reciprocal %57 {approx = true} : vector<8x1xf32> -> vector<8x1xf32>
    %61 = vector.broadcast %60 : vector<8x1xf32> to vector<8x16xf32>
    %62 = arith.mulf %59, %61 : vector<8x16xf32>
    %63 = vector.extract_strided_slice %36 {offsets = [8, 0], sizes = [8, 16], strides = [1, 1]} : vector<16x16xf32> to vector<8x16xf32>
    %64 = arith.truncf %63 : vector<8x16xf32> to vector<8x16xbf16>
    %65 = vector.extract_strided_slice %37 {offsets = [8, 0], sizes = [8, 16], strides = [1, 1]} : vector<16x16xf32> to vector<8x16xf32>
    %66 = arith.truncf %65 : vector<8x16xf32> to vector<8x16xbf16>
    %67 = vector.extract_strided_slice %38 {offsets = [8, 0], sizes = [8, 16], strides = [1, 1]} : vector<16x16xf32> to vector<8x16xf32>
    %68 = arith.truncf %67 : vector<8x16xf32> to vector<8x16xbf16>
    "tpu.trace_start"() <{level = 10 : i32, message = "qd,kd->qk"}> : () -> ()
    %cst_25 = arith.constant dense<0.000000e+00> : vector<8x8xf32>
    %69 = tpu.matmul %64, %66, %cst_25 {dimension_numbers = #tpu.dot_dimension_numbers<[1], [1], [0], [0], [0, 0, 1, 0], [], []>} : vector<8x16xbf16>, vector<8x16xbf16>, vector<8x8xf32> -> vector<8x8xf32>
    "tpu.trace_stop"() : () -> ()
    %cst_26 = arith.constant 2.500000e-01 : f32
    %70 = vector.broadcast %cst_26 : f32 to vector<8x8xf32>
    %71 = arith.mulf %69, %70 : vector<8x8xf32>
    %72 = vector.extract_strided_slice %27 {offsets = [1, 0], sizes = [1, 8], strides = [1, 1]} : vector<2x8xf32> to vector<1x8xf32>
    %73 = vector.broadcast %72 : vector<1x8xf32> to vector<8x8xf32>
    %74 = arith.addf %71, %73 : vector<8x8xf32>
    %cst_27 = arith.constant dense<0xFF800000> : vector<8xf32>
    %75 = vector.multi_reduction <maximumf>, %74, %cst_27 [1] : vector<8x8xf32> to vector<8xf32>
    %76 = vector.shape_cast %75 : vector<8xf32> to vector<8x1xf32>
    %77 = vector.broadcast %76 : vector<8x1xf32> to vector<8x8xf32>
    %78 = arith.subf %74, %77 : vector<8x8xf32>
    %79 = math.exp %78 : vector<8x8xf32>
    %cst_28 = arith.constant dense<0.000000e+00> : vector<8xf32>
    %80 = vector.multi_reduction <add>, %79, %cst_28 [1] : vector<8x8xf32> to vector<8xf32>
    %81 = vector.shape_cast %80 : vector<8xf32> to vector<8x1xf32>
    %82 = arith.truncf %79 : vector<8x8xf32> to vector<8x8xbf16>
    %cst_29 = arith.constant dense<0.000000e+00> : vector<8x16xf32>
    %83 = tpu.matmul %82, %68, %cst_29 {dimension_numbers = #tpu.dot_dimension_numbers<[1], [0], [0], [1], [0, 0, 1, 1], [], []>} : vector<8x8xbf16>, vector<8x16xbf16>, vector<8x16xf32> -> vector<8x16xf32>
    %84 = tpu.reciprocal %81 {approx = true} : vector<8x1xf32> -> vector<8x1xf32>
    %85 = vector.broadcast %84 : vector<8x1xf32> to vector<8x16xf32>
    %86 = arith.mulf %83, %85 : vector<8x16xf32>
    %87 = vector.extract_strided_slice %35 {offsets = [0, 16], sizes = [16, 16], strides = [1, 1]} : vector<16x96xf32> to vector<16x16xf32>
    %88 = vector.extract_strided_slice %35 {offsets = [0, 48], sizes = [16, 16], strides = [1, 1]} : vector<16x96xf32> to vector<16x16xf32>
    %89 = vector.extract_strided_slice %35 {offsets = [0, 80], sizes = [16, 16], strides = [1, 1]} : vector<16x96xf32> to vector<16x16xf32>
    %90 = vector.extract_strided_slice %87 {offsets = [0, 0], sizes = [8, 16], strides = [1, 1]} : vector<16x16xf32> to vector<8x16xf32>
    %91 = arith.truncf %90 : vector<8x16xf32> to vector<8x16xbf16>
    %92 = vector.extract_strided_slice %88 {offsets = [0, 0], sizes = [8, 16], strides = [1, 1]} : vector<16x16xf32> to vector<8x16xf32>
    %93 = arith.truncf %92 : vector<8x16xf32> to vector<8x16xbf16>
    %94 = vector.extract_strided_slice %89 {offsets = [0, 0], sizes = [8, 16], strides = [1, 1]} : vector<16x16xf32> to vector<8x16xf32>
    %95 = arith.truncf %94 : vector<8x16xf32> to vector<8x16xbf16>
    "tpu.trace_start"() <{level = 10 : i32, message = "qd,kd->qk"}> : () -> ()
    %cst_30 = arith.constant dense<0.000000e+00> : vector<8x8xf32>
    %96 = tpu.matmul %91, %93, %cst_30 {dimension_numbers = #tpu.dot_dimension_numbers<[1], [1], [0], [0], [0, 0, 1, 0], [], []>} : vector<8x16xbf16>, vector<8x16xbf16>, vector<8x8xf32> -> vector<8x8xf32>
    "tpu.trace_stop"() : () -> ()
    %cst_31 = arith.constant 2.500000e-01 : f32
    %97 = vector.broadcast %cst_31 : f32 to vector<8x8xf32>
    %98 = arith.mulf %96, %97 : vector<8x8xf32>
    %99 = vector.extract_strided_slice %27 {offsets = [0, 0], sizes = [1, 8], strides = [1, 1]} : vector<2x8xf32> to vector<1x8xf32>
    %100 = vector.broadcast %99 : vector<1x8xf32> to vector<8x8xf32>
    %101 = arith.addf %98, %100 : vector<8x8xf32>
    %cst_32 = arith.constant dense<0xFF800000> : vector<8xf32>
    %102 = vector.multi_reduction <maximumf>, %101, %cst_32 [1] : vector<8x8xf32> to vector<8xf32>
    %103 = vector.shape_cast %102 : vector<8xf32> to vector<8x1xf32>
    %104 = vector.broadcast %103 : vector<8x1xf32> to vector<8x8xf32>
    %105 = arith.subf %101, %104 : vector<8x8xf32>
    %106 = math.exp %105 : vector<8x8xf32>
    %cst_33 = arith.constant dense<0.000000e+00> : vector<8xf32>
    %107 = vector.multi_reduction <add>, %106, %cst_33 [1] : vector<8x8xf32> to vector<8xf32>
    %108 = vector.shape_cast %107 : vector<8xf32> to vector<8x1xf32>
    %109 = arith.truncf %106 : vector<8x8xf32> to vector<8x8xbf16>
    %cst_34 = arith.constant dense<0.000000e+00> : vector<8x16xf32>
    %110 = tpu.matmul %109, %95, %cst_34 {dimension_numbers = #tpu.dot_dimension_numbers<[1], [0], [0], [1], [0, 0, 1, 1], [], []>} : vector<8x8xbf16>, vector<8x16xbf16>, vector<8x16xf32> -> vector<8x16xf32>
    %111 = tpu.reciprocal %108 {approx = true} : vector<8x1xf32> -> vector<8x1xf32>
    %112 = vector.broadcast %111 : vector<8x1xf32> to vector<8x16xf32>
    %113 = arith.mulf %110, %112 : vector<8x16xf32>
    %114 = vector.extract_strided_slice %87 {offsets = [8, 0], sizes = [8, 16], strides = [1, 1]} : vector<16x16xf32> to vector<8x16xf32>
    %115 = arith.truncf %114 : vector<8x16xf32> to vector<8x16xbf16>
    %116 = vector.extract_strided_slice %88 {offsets = [8, 0], sizes = [8, 16], strides = [1, 1]} : vector<16x16xf32> to vector<8x16xf32>
    %117 = arith.truncf %116 : vector<8x16xf32> to vector<8x16xbf16>
    %118 = vector.extract_strided_slice %89 {offsets = [8, 0], sizes = [8, 16], strides = [1, 1]} : vector<16x16xf32> to vector<8x16xf32>
    %119 = arith.truncf %118 : vector<8x16xf32> to vector<8x16xbf16>
    "tpu.trace_start"() <{level = 10 : i32, message = "qd,kd->qk"}> : () -> ()
    %cst_35 = arith.constant dense<0.000000e+00> : vector<8x8xf32>
    %120 = tpu.matmul %115, %117, %cst_35 {dimension_numbers = #tpu.dot_dimension_numbers<[1], [1], [0], [0], [0, 0, 1, 0], [], []>} : vector<8x16xbf16>, vector<8x16xbf16>, vector<8x8xf32> -> vector<8x8xf32>
    "tpu.trace_stop"() : () -> ()
    %cst_36 = arith.constant 2.500000e-01 : f32
    %121 = vector.broadcast %cst_36 : f32 to vector<8x8xf32>
    %122 = arith.mulf %120, %121 : vector<8x8xf32>
    %123 = vector.extract_strided_slice %27 {offsets = [1, 0], sizes = [1, 8], strides = [1, 1]} : vector<2x8xf32> to vector<1x8xf32>
    %124 = vector.broadcast %123 : vector<1x8xf32> to vector<8x8xf32>
    %125 = arith.addf %122, %124 : vector<8x8xf32>
    %cst_37 = arith.constant dense<0xFF800000> : vector<8xf32>
    %126 = vector.multi_reduction <maximumf>, %125, %cst_37 [1] : vector<8x8xf32> to vector<8xf32>
    %127 = vector.shape_cast %126 : vector<8xf32> to vector<8x1xf32>
    %128 = vector.broadcast %127 : vector<8x1xf32> to vector<8x8xf32>
    %129 = arith.subf %125, %128 : vector<8x8xf32>
    %130 = math.exp %129 : vector<8x8xf32>
    %cst_38 = arith.constant dense<0.000000e+00> : vector<8xf32>
    %131 = vector.multi_reduction <add>, %130, %cst_38 [1] : vector<8x8xf32> to vector<8xf32>
    %132 = vector.shape_cast %131 : vector<8xf32> to vector<8x1xf32>
    %133 = arith.truncf %130 : vector<8x8xf32> to vector<8x8xbf16>
    %cst_39 = arith.constant dense<0.000000e+00> : vector<8x16xf32>
    %134 = tpu.matmul %133, %119, %cst_39 {dimension_numbers = #tpu.dot_dimension_numbers<[1], [0], [0], [1], [0, 0, 1, 1], [], []>} : vector<8x8xbf16>, vector<8x16xbf16>, vector<8x16xf32> -> vector<8x16xf32>
    %135 = tpu.reciprocal %132 {approx = true} : vector<8x1xf32> -> vector<8x1xf32>
    %136 = vector.broadcast %135 : vector<8x1xf32> to vector<8x16xf32>
    %137 = arith.mulf %134, %136 : vector<8x16xf32>
    %138 = tpu.concatenate %62, %113 in 1 : vector<8x16xf32>, vector<8x16xf32> -> vector<8x32xf32>
    %139 = tpu.concatenate %86, %137 in 1 : vector<8x16xf32>, vector<8x16xf32> -> vector<8x32xf32>
    %140 = tpu.concatenate %138, %139 in 0 : vector<8x32xf32>, vector<8x32xf32> -> vector<16x32xf32>
    %141 = arith.truncf %140 : vector<16x32xf32> to vector<16x32xbf16>
    %c0_40 = arith.constant 0 : index
    %c0_41 = arith.constant 0 : index
    %c0_42 = arith.constant 0 : index
    %142 = vector.load %arg6[%c0_40, %c0_41, %c0_42] : memref<3x32x32xbf16, #tpu.memory_space<vmem>>, vector<1x32x32xbf16>
    %143 = vector.shape_cast %142 : vector<1x32x32xbf16> to vector<32x32xbf16>
    %cst_43 = arith.constant dense<0.000000e+00> : vector<16x32xf32>
    %144 = tpu.matmul %141, %143, %cst_43 {dimension_numbers = #tpu.dot_dimension_numbers<[1], [0], [0], [1], [0, 0, 1, 1], [], []>} : vector<16x32xbf16>, vector<32x32xbf16>, vector<16x32xf32> -> vector<16x32xf32>
    %c0_44 = arith.constant 0 : index
    %c0_45 = arith.constant 0 : index
    %c0_46 = arith.constant 0 : index
    %145 = vector.load %arg7[%c0_44, %c0_45, %c0_46] : memref<3x1x32xf32, #tpu.memory_space<vmem>>, vector<1x1x32xf32>
    %146 = vector.shape_cast %145 : vector<1x1x32xf32> to vector<1x32xf32>
    %147 = vector.broadcast %146 : vector<1x32xf32> to vector<16x32xf32>
    %148 = arith.addf %144, %147 : vector<16x32xf32>
    %149 = arith.addf %148, %22 : vector<16x32xf32>
    %c0_47 = arith.constant 0 : index
    %c0_48 = arith.constant 0 : index
    %c0_49 = arith.constant 0 : index
    %150 = vector.load %arg8[%c0_47, %c0_48, %c0_49] : memref<3x1x32xf32, #tpu.memory_space<vmem>>, vector<1x1x32xf32>
    %151 = vector.shape_cast %150 : vector<1x1x32xf32> to vector<1x32xf32>
    %c0_50 = arith.constant 0 : index
    %c0_51 = arith.constant 0 : index
    %c0_52 = arith.constant 0 : index
    %152 = vector.load %arg9[%c0_50, %c0_51, %c0_52] : memref<3x1x32xf32, #tpu.memory_space<vmem>>, vector<1x1x32xf32>
    %153 = vector.shape_cast %152 : vector<1x1x32xf32> to vector<1x32xf32>
    %cst_53 = arith.constant dense<0.000000e+00> : vector<16xf32>
    %154 = vector.multi_reduction <add>, %149, %cst_53 [1] : vector<16x32xf32> to vector<16xf32>
    %155 = vector.shape_cast %154 : vector<16xf32> to vector<16x1xf32>
    %cst_54 = arith.constant 3.200000e+01 : f32
    %156 = vector.broadcast %cst_54 : f32 to vector<16x1xf32>
    %157 = arith.divf %155, %156 : vector<16x1xf32>
    %158 = vector.broadcast %157 : vector<16x1xf32> to vector<16x32xf32>
    %159 = arith.subf %149, %158 : vector<16x32xf32>
    %160 = arith.mulf %159, %159 : vector<16x32xf32>
    %cst_55 = arith.constant dense<0.000000e+00> : vector<16xf32>
    %161 = vector.multi_reduction <add>, %160, %cst_55 [1] : vector<16x32xf32> to vector<16xf32>
    %162 = vector.shape_cast %161 : vector<16xf32> to vector<16x1xf32>
    %cst_56 = arith.constant 3.200000e+01 : f32
    %163 = vector.broadcast %cst_56 : f32 to vector<16x1xf32>
    %164 = arith.divf %162, %163 : vector<16x1xf32>
    %cst_57 = arith.constant 9.99999996E-13 : f32
    %165 = vector.broadcast %cst_57 : f32 to vector<16x1xf32>
    %166 = arith.addf %164, %165 : vector<16x1xf32>
    %167 = math.rsqrt %166 : vector<16x1xf32>
    %168 = vector.broadcast %167 : vector<16x1xf32> to vector<16x32xf32>
    %169 = arith.mulf %159, %168 : vector<16x32xf32>
    %170 = vector.broadcast %151 : vector<1x32xf32> to vector<16x32xf32>
    %171 = arith.mulf %169, %170 : vector<16x32xf32>
    %172 = vector.broadcast %153 : vector<1x32xf32> to vector<16x32xf32>
    %173 = arith.addf %171, %172 : vector<16x32xf32>
    %174 = arith.truncf %173 : vector<16x32xf32> to vector<16x32xbf16>
    %c0_58 = arith.constant 0 : index
    %c0_59 = arith.constant 0 : index
    %c0_60 = arith.constant 0 : index
    %175 = vector.load %arg12[%c0_58, %c0_59, %c0_60] : memref<3x32x64xbf16, #tpu.memory_space<vmem>>, vector<1x32x64xbf16>
    %176 = vector.shape_cast %175 : vector<1x32x64xbf16> to vector<32x64xbf16>
    %cst_61 = arith.constant dense<0.000000e+00> : vector<16x64xf32>
    %177 = tpu.matmul %174, %176, %cst_61 {dimension_numbers = #tpu.dot_dimension_numbers<[1], [0], [0], [1], [0, 0, 1, 1], [], []>} : vector<16x32xbf16>, vector<32x64xbf16>, vector<16x64xf32> -> vector<16x64xf32>
    %c0_62 = arith.constant 0 : index
    %c0_63 = arith.constant 0 : index
    %c0_64 = arith.constant 0 : index
    %178 = vector.load %arg13[%c0_62, %c0_63, %c0_64] : memref<3x1x64xf32, #tpu.memory_space<vmem>>, vector<1x1x64xf32>
    %179 = vector.shape_cast %178 : vector<1x1x64xf32> to vector<1x64xf32>
    %180 = vector.broadcast %179 : vector<1x64xf32> to vector<16x64xf32>
    %181 = arith.addf %177, %180 : vector<16x64xf32>
    %cst_65 = arith.constant 5.000000e-01 : f32
    %182 = vector.broadcast %cst_65 : f32 to vector<16x64xf32>
    %183 = arith.mulf %182, %181 : vector<16x64xf32>
    %cst_66 = arith.constant 4.471500e-02 : f32
    %184 = vector.broadcast %cst_66 : f32 to vector<16x64xf32>
    %185 = arith.mulf %184, %181 : vector<16x64xf32>
    %186 = arith.mulf %185, %181 : vector<16x64xf32>
    %187 = arith.mulf %186, %181 : vector<16x64xf32>
    %188 = arith.addf %181, %187 : vector<16x64xf32>
    %cst_67 = arith.constant 0.797884583 : f32
    %189 = vector.broadcast %cst_67 : f32 to vector<16x64xf32>
    %190 = arith.mulf %189, %188 : vector<16x64xf32>
    %191 = math.tanh %190 : vector<16x64xf32>
    %cst_68 = arith.constant 1.000000e+00 : f32
    %192 = vector.broadcast %cst_68 : f32 to vector<16x64xf32>
    %193 = arith.addf %192, %191 : vector<16x64xf32>
    %194 = arith.mulf %183, %193 : vector<16x64xf32>
    %195 = arith.truncf %194 : vector<16x64xf32> to vector<16x64xbf16>
    %c0_69 = arith.constant 0 : index
    %c0_70 = arith.constant 0 : index
    %c0_71 = arith.constant 0 : index
    %196 = vector.load %arg14[%c0_69, %c0_70, %c0_71] : memref<3x64x32xbf16, #tpu.memory_space<vmem>>, vector<1x64x32xbf16>
    %197 = vector.shape_cast %196 : vector<1x64x32xbf16> to vector<64x32xbf16>
    %cst_72 = arith.constant dense<0.000000e+00> : vector<16x32xf32>
    %198 = tpu.matmul %195, %197, %cst_72 {dimension_numbers = #tpu.dot_dimension_numbers<[1], [0], [0], [1], [0, 0, 1, 1], [], []>} : vector<16x64xbf16>, vector<64x32xbf16>, vector<16x32xf32> -> vector<16x32xf32>
    %c0_73 = arith.constant 0 : index
    %c0_74 = arith.constant 0 : index
    %c0_75 = arith.constant 0 : index
    %199 = vector.load %arg15[%c0_73, %c0_74, %c0_75] : memref<3x1x32xf32, #tpu.memory_space<vmem>>, vector<1x1x32xf32>
    %200 = vector.shape_cast %199 : vector<1x1x32xf32> to vector<1x32xf32>
    %201 = vector.broadcast %200 : vector<1x32xf32> to vector<16x32xf32>
    %202 = arith.addf %198, %201 : vector<16x32xf32>
    %203 = arith.addf %202, %173 : vector<16x32xf32>
    %c0_76 = arith.constant 0 : index
    %c0_77 = arith.constant 0 : index
    %c0_78 = arith.constant 0 : index
    %204 = vector.load %arg10[%c0_76, %c0_77, %c0_78] : memref<3x1x32xf32, #tpu.memory_space<vmem>>, vector<1x1x32xf32>
    %205 = vector.shape_cast %204 : vector<1x1x32xf32> to vector<1x32xf32>
    %c0_79 = arith.constant 0 : index
    %c0_80 = arith.constant 0 : index
    %c0_81 = arith.constant 0 : index
    %206 = vector.load %arg11[%c0_79, %c0_80, %c0_81] : memref<3x1x32xf32, #tpu.memory_space<vmem>>, vector<1x1x32xf32>
    %207 = vector.shape_cast %206 : vector<1x1x32xf32> to vector<1x32xf32>
    %cst_82 = arith.constant dense<0.000000e+00> : vector<16xf32>
    %208 = vector.multi_reduction <add>, %203, %cst_82 [1] : vector<16x32xf32> to vector<16xf32>
    %209 = vector.shape_cast %208 : vector<16xf32> to vector<16x1xf32>
    %cst_83 = arith.constant 3.200000e+01 : f32
    %210 = vector.broadcast %cst_83 : f32 to vector<16x1xf32>
    %211 = arith.divf %209, %210 : vector<16x1xf32>
    %212 = vector.broadcast %211 : vector<16x1xf32> to vector<16x32xf32>
    %213 = arith.subf %203, %212 : vector<16x32xf32>
    %214 = arith.mulf %213, %213 : vector<16x32xf32>
    %cst_84 = arith.constant dense<0.000000e+00> : vector<16xf32>
    %215 = vector.multi_reduction <add>, %214, %cst_84 [1] : vector<16x32xf32> to vector<16xf32>
    %216 = vector.shape_cast %215 : vector<16xf32> to vector<16x1xf32>
    %cst_85 = arith.constant 3.200000e+01 : f32
    %217 = vector.broadcast %cst_85 : f32 to vector<16x1xf32>
    %218 = arith.divf %216, %217 : vector<16x1xf32>
    %cst_86 = arith.constant 9.99999996E-13 : f32
    %219 = vector.broadcast %cst_86 : f32 to vector<16x1xf32>
    %220 = arith.addf %218, %219 : vector<16x1xf32>
    %221 = math.rsqrt %220 : vector<16x1xf32>
    %222 = vector.broadcast %221 : vector<16x1xf32> to vector<16x32xf32>
    %223 = arith.mulf %213, %222 : vector<16x32xf32>
    %224 = vector.broadcast %205 : vector<1x32xf32> to vector<16x32xf32>
    %225 = arith.mulf %223, %224 : vector<16x32xf32>
    %226 = vector.broadcast %207 : vector<1x32xf32> to vector<16x32xf32>
    %227 = arith.addf %225, %226 : vector<16x32xf32>
    %228 = arith.truncf %227 : vector<16x32xf32> to vector<16x32xbf16>
    %c1 = arith.constant 1 : index
    %c0_87 = arith.constant 0 : index
    %c0_88 = arith.constant 0 : index
    %229 = vector.load %arg4[%c1, %c0_87, %c0_88] : memref<3x32x96xbf16, #tpu.memory_space<vmem>>, vector<1x32x96xbf16>
    %230 = vector.shape_cast %229 : vector<1x32x96xbf16> to vector<32x96xbf16>
    %cst_89 = arith.constant dense<0.000000e+00> : vector<16x96xf32>
    %231 = tpu.matmul %228, %230, %cst_89 {dimension_numbers = #tpu.dot_dimension_numbers<[1], [0], [0], [1], [0, 0, 1, 1], [], []>} : vector<16x32xbf16>, vector<32x96xbf16>, vector<16x96xf32> -> vector<16x96xf32>
    %c1_90 = arith.constant 1 : index
    %c0_91 = arith.constant 0 : index
    %c0_92 = arith.constant 0 : index
    %232 = vector.load %arg5[%c1_90, %c0_91, %c0_92] : memref<3x1x96xf32, #tpu.memory_space<vmem>>, vector<1x1x96xf32>
    %233 = vector.shape_cast %232 : vector<1x1x96xf32> to vector<1x96xf32>
    %234 = vector.broadcast %233 : vector<1x96xf32> to vector<16x96xf32>
    %235 = arith.addf %231, %234 : vector<16x96xf32>
    %236 = vector.extract_strided_slice %235 {offsets = [0, 0], sizes = [16, 16], strides = [1, 1]} : vector<16x96xf32> to vector<16x16xf32>
    %237 = vector.extract_strided_slice %235 {offsets = [0, 32], sizes = [16, 16], strides = [1, 1]} : vector<16x96xf32> to vector<16x16xf32>
    %238 = vector.extract_strided_slice %235 {offsets = [0, 64], sizes = [16, 16], strides = [1, 1]} : vector<16x96xf32> to vector<16x16xf32>
    %239 = vector.extract_strided_slice %236 {offsets = [0, 0], sizes = [8, 16], strides = [1, 1]} : vector<16x16xf32> to vector<8x16xf32>
    %240 = arith.truncf %239 : vector<8x16xf32> to vector<8x16xbf16>
    %241 = vector.extract_strided_slice %237 {offsets = [0, 0], sizes = [8, 16], strides = [1, 1]} : vector<16x16xf32> to vector<8x16xf32>
    %242 = arith.truncf %241 : vector<8x16xf32> to vector<8x16xbf16>
    %243 = vector.extract_strided_slice %238 {offsets = [0, 0], sizes = [8, 16], strides = [1, 1]} : vector<16x16xf32> to vector<8x16xf32>
    %244 = arith.truncf %243 : vector<8x16xf32> to vector<8x16xbf16>
    "tpu.trace_start"() <{level = 10 : i32, message = "qd,kd->qk"}> : () -> ()
    %cst_93 = arith.constant dense<0.000000e+00> : vector<8x8xf32>
    %245 = tpu.matmul %240, %242, %cst_93 {dimension_numbers = #tpu.dot_dimension_numbers<[1], [1], [0], [0], [0, 0, 1, 0], [], []>} : vector<8x16xbf16>, vector<8x16xbf16>, vector<8x8xf32> -> vector<8x8xf32>
    "tpu.trace_stop"() : () -> ()
    %cst_94 = arith.constant 2.500000e-01 : f32
    %246 = vector.broadcast %cst_94 : f32 to vector<8x8xf32>
    %247 = arith.mulf %245, %246 : vector<8x8xf32>
    %248 = vector.extract_strided_slice %27 {offsets = [0, 0], sizes = [1, 8], strides = [1, 1]} : vector<2x8xf32> to vector<1x8xf32>
    %249 = vector.broadcast %248 : vector<1x8xf32> to vector<8x8xf32>
    %250 = arith.addf %247, %249 : vector<8x8xf32>
    %cst_95 = arith.constant dense<0xFF800000> : vector<8xf32>
    %251 = vector.multi_reduction <maximumf>, %250, %cst_95 [1] : vector<8x8xf32> to vector<8xf32>
    %252 = vector.shape_cast %251 : vector<8xf32> to vector<8x1xf32>
    %253 = vector.broadcast %252 : vector<8x1xf32> to vector<8x8xf32>
    %254 = arith.subf %250, %253 : vector<8x8xf32>
    %255 = math.exp %254 : vector<8x8xf32>
    %cst_96 = arith.constant dense<0.000000e+00> : vector<8xf32>
    %256 = vector.multi_reduction <add>, %255, %cst_96 [1] : vector<8x8xf32> to vector<8xf32>
    %257 = vector.shape_cast %256 : vector<8xf32> to vector<8x1xf32>
    %258 = arith.truncf %255 : vector<8x8xf32> to vector<8x8xbf16>
    %cst_97 = arith.constant dense<0.000000e+00> : vector<8x16xf32>
    %259 = tpu.matmul %258, %244, %cst_97 {dimension_numbers = #tpu.dot_dimension_numbers<[1], [0], [0], [1], [0, 0, 1, 1], [], []>} : vector<8x8xbf16>, vector<8x16xbf16>, vector<8x16xf32> -> vector<8x16xf32>
    %260 = tpu.reciprocal %257 {approx = true} : vector<8x1xf32> -> vector<8x1xf32>
    %261 = vector.broadcast %260 : vector<8x1xf32> to vector<8x16xf32>
    %262 = arith.mulf %259, %261 : vector<8x16xf32>
    %263 = vector.extract_strided_slice %236 {offsets = [8, 0], sizes = [8, 16], strides = [1, 1]} : vector<16x16xf32> to vector<8x16xf32>
    %264 = arith.truncf %263 : vector<8x16xf32> to vector<8x16xbf16>
    %265 = vector.extract_strided_slice %237 {offsets = [8, 0], sizes = [8, 16], strides = [1, 1]} : vector<16x16xf32> to vector<8x16xf32>
    %266 = arith.truncf %265 : vector<8x16xf32> to vector<8x16xbf16>
    %267 = vector.extract_strided_slice %238 {offsets = [8, 0], sizes = [8, 16], strides = [1, 1]} : vector<16x16xf32> to vector<8x16xf32>
    %268 = arith.truncf %267 : vector<8x16xf32> to vector<8x16xbf16>
    "tpu.trace_start"() <{level = 10 : i32, message = "qd,kd->qk"}> : () -> ()
    %cst_98 = arith.constant dense<0.000000e+00> : vector<8x8xf32>
    %269 = tpu.matmul %264, %266, %cst_98 {dimension_numbers = #tpu.dot_dimension_numbers<[1], [1], [0], [0], [0, 0, 1, 0], [], []>} : vector<8x16xbf16>, vector<8x16xbf16>, vector<8x8xf32> -> vector<8x8xf32>
    "tpu.trace_stop"() : () -> ()
    %cst_99 = arith.constant 2.500000e-01 : f32
    %270 = vector.broadcast %cst_99 : f32 to vector<8x8xf32>
    %271 = arith.mulf %269, %270 : vector<8x8xf32>
    %272 = vector.extract_strided_slice %27 {offsets = [1, 0], sizes = [1, 8], strides = [1, 1]} : vector<2x8xf32> to vector<1x8xf32>
    %273 = vector.broadcast %272 : vector<1x8xf32> to vector<8x8xf32>
    %274 = arith.addf %271, %273 : vector<8x8xf32>
    %cst_100 = arith.constant dense<0xFF800000> : vector<8xf32>
    %275 = vector.multi_reduction <maximumf>, %274, %cst_100 [1] : vector<8x8xf32> to vector<8xf32>
    %276 = vector.shape_cast %275 : vector<8xf32> to vector<8x1xf32>
    %277 = vector.broadcast %276 : vector<8x1xf32> to vector<8x8xf32>
    %278 = arith.subf %274, %277 : vector<8x8xf32>
    %279 = math.exp %278 : vector<8x8xf32>
    %cst_101 = arith.constant dense<0.000000e+00> : vector<8xf32>
    %280 = vector.multi_reduction <add>, %279, %cst_101 [1] : vector<8x8xf32> to vector<8xf32>
    %281 = vector.shape_cast %280 : vector<8xf32> to vector<8x1xf32>
    %282 = arith.truncf %279 : vector<8x8xf32> to vector<8x8xbf16>
    %cst_102 = arith.constant dense<0.000000e+00> : vector<8x16xf32>
    %283 = tpu.matmul %282, %268, %cst_102 {dimension_numbers = #tpu.dot_dimension_numbers<[1], [0], [0], [1], [0, 0, 1, 1], [], []>} : vector<8x8xbf16>, vector<8x16xbf16>, vector<8x16xf32> -> vector<8x16xf32>
    %284 = tpu.reciprocal %281 {approx = true} : vector<8x1xf32> -> vector<8x1xf32>
    %285 = vector.broadcast %284 : vector<8x1xf32> to vector<8x16xf32>
    %286 = arith.mulf %283, %285 : vector<8x16xf32>
    %287 = vector.extract_strided_slice %235 {offsets = [0, 16], sizes = [16, 16], strides = [1, 1]} : vector<16x96xf32> to vector<16x16xf32>
    %288 = vector.extract_strided_slice %235 {offsets = [0, 48], sizes = [16, 16], strides = [1, 1]} : vector<16x96xf32> to vector<16x16xf32>
    %289 = vector.extract_strided_slice %235 {offsets = [0, 80], sizes = [16, 16], strides = [1, 1]} : vector<16x96xf32> to vector<16x16xf32>
    %290 = vector.extract_strided_slice %287 {offsets = [0, 0], sizes = [8, 16], strides = [1, 1]} : vector<16x16xf32> to vector<8x16xf32>
    %291 = arith.truncf %290 : vector<8x16xf32> to vector<8x16xbf16>
    %292 = vector.extract_strided_slice %288 {offsets = [0, 0], sizes = [8, 16], strides = [1, 1]} : vector<16x16xf32> to vector<8x16xf32>
    %293 = arith.truncf %292 : vector<8x16xf32> to vector<8x16xbf16>
    %294 = vector.extract_strided_slice %289 {offsets = [0, 0], sizes = [8, 16], strides = [1, 1]} : vector<16x16xf32> to vector<8x16xf32>
    %295 = arith.truncf %294 : vector<8x16xf32> to vector<8x16xbf16>
    "tpu.trace_start"() <{level = 10 : i32, message = "qd,kd->qk"}> : () -> ()
    %cst_103 = arith.constant dense<0.000000e+00> : vector<8x8xf32>
    %296 = tpu.matmul %291, %293, %cst_103 {dimension_numbers = #tpu.dot_dimension_numbers<[1], [1], [0], [0], [0, 0, 1, 0], [], []>} : vector<8x16xbf16>, vector<8x16xbf16>, vector<8x8xf32> -> vector<8x8xf32>
    "tpu.trace_stop"() : () -> ()
    %cst_104 = arith.constant 2.500000e-01 : f32
    %297 = vector.broadcast %cst_104 : f32 to vector<8x8xf32>
    %298 = arith.mulf %296, %297 : vector<8x8xf32>
    %299 = vector.extract_strided_slice %27 {offsets = [0, 0], sizes = [1, 8], strides = [1, 1]} : vector<2x8xf32> to vector<1x8xf32>
    %300 = vector.broadcast %299 : vector<1x8xf32> to vector<8x8xf32>
    %301 = arith.addf %298, %300 : vector<8x8xf32>
    %cst_105 = arith.constant dense<0xFF800000> : vector<8xf32>
    %302 = vector.multi_reduction <maximumf>, %301, %cst_105 [1] : vector<8x8xf32> to vector<8xf32>
    %303 = vector.shape_cast %302 : vector<8xf32> to vector<8x1xf32>
    %304 = vector.broadcast %303 : vector<8x1xf32> to vector<8x8xf32>
    %305 = arith.subf %301, %304 : vector<8x8xf32>
    %306 = math.exp %305 : vector<8x8xf32>
    %cst_106 = arith.constant dense<0.000000e+00> : vector<8xf32>
    %307 = vector.multi_reduction <add>, %306, %cst_106 [1] : vector<8x8xf32> to vector<8xf32>
    %308 = vector.shape_cast %307 : vector<8xf32> to vector<8x1xf32>
    %309 = arith.truncf %306 : vector<8x8xf32> to vector<8x8xbf16>
    %cst_107 = arith.constant dense<0.000000e+00> : vector<8x16xf32>
    %310 = tpu.matmul %309, %295, %cst_107 {dimension_numbers = #tpu.dot_dimension_numbers<[1], [0], [0], [1], [0, 0, 1, 1], [], []>} : vector<8x8xbf16>, vector<8x16xbf16>, vector<8x16xf32> -> vector<8x16xf32>
    %311 = tpu.reciprocal %308 {approx = true} : vector<8x1xf32> -> vector<8x1xf32>
    %312 = vector.broadcast %311 : vector<8x1xf32> to vector<8x16xf32>
    %313 = arith.mulf %310, %312 : vector<8x16xf32>
    %314 = vector.extract_strided_slice %287 {offsets = [8, 0], sizes = [8, 16], strides = [1, 1]} : vector<16x16xf32> to vector<8x16xf32>
    %315 = arith.truncf %314 : vector<8x16xf32> to vector<8x16xbf16>
    %316 = vector.extract_strided_slice %288 {offsets = [8, 0], sizes = [8, 16], strides = [1, 1]} : vector<16x16xf32> to vector<8x16xf32>
    %317 = arith.truncf %316 : vector<8x16xf32> to vector<8x16xbf16>
    %318 = vector.extract_strided_slice %289 {offsets = [8, 0], sizes = [8, 16], strides = [1, 1]} : vector<16x16xf32> to vector<8x16xf32>
    %319 = arith.truncf %318 : vector<8x16xf32> to vector<8x16xbf16>
    "tpu.trace_start"() <{level = 10 : i32, message = "qd,kd->qk"}> : () -> ()
    %cst_108 = arith.constant dense<0.000000e+00> : vector<8x8xf32>
    %320 = tpu.matmul %315, %317, %cst_108 {dimension_numbers = #tpu.dot_dimension_numbers<[1], [1], [0], [0], [0, 0, 1, 0], [], []>} : vector<8x16xbf16>, vector<8x16xbf16>, vector<8x8xf32> -> vector<8x8xf32>
    "tpu.trace_stop"() : () -> ()
    %cst_109 = arith.constant 2.500000e-01 : f32
    %321 = vector.broadcast %cst_109 : f32 to vector<8x8xf32>
    %322 = arith.mulf %320, %321 : vector<8x8xf32>
    %323 = vector.extract_strided_slice %27 {offsets = [1, 0], sizes = [1, 8], strides = [1, 1]} : vector<2x8xf32> to vector<1x8xf32>
    %324 = vector.broadcast %323 : vector<1x8xf32> to vector<8x8xf32>
    %325 = arith.addf %322, %324 : vector<8x8xf32>
    %cst_110 = arith.constant dense<0xFF800000> : vector<8xf32>
    %326 = vector.multi_reduction <maximumf>, %325, %cst_110 [1] : vector<8x8xf32> to vector<8xf32>
    %327 = vector.shape_cast %326 : vector<8xf32> to vector<8x1xf32>
    %328 = vector.broadcast %327 : vector<8x1xf32> to vector<8x8xf32>
    %329 = arith.subf %325, %328 : vector<8x8xf32>
    %330 = math.exp %329 : vector<8x8xf32>
    %cst_111 = arith.constant dense<0.000000e+00> : vector<8xf32>
    %331 = vector.multi_reduction <add>, %330, %cst_111 [1] : vector<8x8xf32> to vector<8xf32>
    %332 = vector.shape_cast %331 : vector<8xf32> to vector<8x1xf32>
    %333 = arith.truncf %330 : vector<8x8xf32> to vector<8x8xbf16>
    %cst_112 = arith.constant dense<0.000000e+00> : vector<8x16xf32>
    %334 = tpu.matmul %333, %319, %cst_112 {dimension_numbers = #tpu.dot_dimension_numbers<[1], [0], [0], [1], [0, 0, 1, 1], [], []>} : vector<8x8xbf16>, vector<8x16xbf16>, vector<8x16xf32> -> vector<8x16xf32>
    %335 = tpu.reciprocal %332 {approx = true} : vector<8x1xf32> -> vector<8x1xf32>
    %336 = vector.broadcast %335 : vector<8x1xf32> to vector<8x16xf32>
    %337 = arith.mulf %334, %336 : vector<8x16xf32>
    %338 = tpu.concatenate %262, %313 in 1 : vector<8x16xf32>, vector<8x16xf32> -> vector<8x32xf32>
    %339 = tpu.concatenate %286, %337 in 1 : vector<8x16xf32>, vector<8x16xf32> -> vector<8x32xf32>
    %340 = tpu.concatenate %338, %339 in 0 : vector<8x32xf32>, vector<8x32xf32> -> vector<16x32xf32>
    %341 = arith.truncf %340 : vector<16x32xf32> to vector<16x32xbf16>
    %c1_113 = arith.constant 1 : index
    %c0_114 = arith.constant 0 : index
    %c0_115 = arith.constant 0 : index
    %342 = vector.load %arg6[%c1_113, %c0_114, %c0_115] : memref<3x32x32xbf16, #tpu.memory_space<vmem>>, vector<1x32x32xbf16>
    %343 = vector.shape_cast %342 : vector<1x32x32xbf16> to vector<32x32xbf16>
    %cst_116 = arith.constant dense<0.000000e+00> : vector<16x32xf32>
    %344 = tpu.matmul %341, %343, %cst_116 {dimension_numbers = #tpu.dot_dimension_numbers<[1], [0], [0], [1], [0, 0, 1, 1], [], []>} : vector<16x32xbf16>, vector<32x32xbf16>, vector<16x32xf32> -> vector<16x32xf32>
    %c1_117 = arith.constant 1 : index
    %c0_118 = arith.constant 0 : index
    %c0_119 = arith.constant 0 : index
    %345 = vector.load %arg7[%c1_117, %c0_118, %c0_119] : memref<3x1x32xf32, #tpu.memory_space<vmem>>, vector<1x1x32xf32>
    %346 = vector.shape_cast %345 : vector<1x1x32xf32> to vector<1x32xf32>
    %347 = vector.broadcast %346 : vector<1x32xf32> to vector<16x32xf32>
    %348 = arith.addf %344, %347 : vector<16x32xf32>
    %349 = arith.addf %348, %227 : vector<16x32xf32>
    %c1_120 = arith.constant 1 : index
    %c0_121 = arith.constant 0 : index
    %c0_122 = arith.constant 0 : index
    %350 = vector.load %arg8[%c1_120, %c0_121, %c0_122] : memref<3x1x32xf32, #tpu.memory_space<vmem>>, vector<1x1x32xf32>
    %351 = vector.shape_cast %350 : vector<1x1x32xf32> to vector<1x32xf32>
    %c1_123 = arith.constant 1 : index
    %c0_124 = arith.constant 0 : index
    %c0_125 = arith.constant 0 : index
    %352 = vector.load %arg9[%c1_123, %c0_124, %c0_125] : memref<3x1x32xf32, #tpu.memory_space<vmem>>, vector<1x1x32xf32>
    %353 = vector.shape_cast %352 : vector<1x1x32xf32> to vector<1x32xf32>
    %cst_126 = arith.constant dense<0.000000e+00> : vector<16xf32>
    %354 = vector.multi_reduction <add>, %349, %cst_126 [1] : vector<16x32xf32> to vector<16xf32>
    %355 = vector.shape_cast %354 : vector<16xf32> to vector<16x1xf32>
    %cst_127 = arith.constant 3.200000e+01 : f32
    %356 = vector.broadcast %cst_127 : f32 to vector<16x1xf32>
    %357 = arith.divf %355, %356 : vector<16x1xf32>
    %358 = vector.broadcast %357 : vector<16x1xf32> to vector<16x32xf32>
    %359 = arith.subf %349, %358 : vector<16x32xf32>
    %360 = arith.mulf %359, %359 : vector<16x32xf32>
    %cst_128 = arith.constant dense<0.000000e+00> : vector<16xf32>
    %361 = vector.multi_reduction <add>, %360, %cst_128 [1] : vector<16x32xf32> to vector<16xf32>
    %362 = vector.shape_cast %361 : vector<16xf32> to vector<16x1xf32>
    %cst_129 = arith.constant 3.200000e+01 : f32
    %363 = vector.broadcast %cst_129 : f32 to vector<16x1xf32>
    %364 = arith.divf %362, %363 : vector<16x1xf32>
    %cst_130 = arith.constant 9.99999996E-13 : f32
    %365 = vector.broadcast %cst_130 : f32 to vector<16x1xf32>
    %366 = arith.addf %364, %365 : vector<16x1xf32>
    %367 = math.rsqrt %366 : vector<16x1xf32>
    %368 = vector.broadcast %367 : vector<16x1xf32> to vector<16x32xf32>
    %369 = arith.mulf %359, %368 : vector<16x32xf32>
    %370 = vector.broadcast %351 : vector<1x32xf32> to vector<16x32xf32>
    %371 = arith.mulf %369, %370 : vector<16x32xf32>
    %372 = vector.broadcast %353 : vector<1x32xf32> to vector<16x32xf32>
    %373 = arith.addf %371, %372 : vector<16x32xf32>
    %374 = arith.truncf %373 : vector<16x32xf32> to vector<16x32xbf16>
    %c1_131 = arith.constant 1 : index
    %c0_132 = arith.constant 0 : index
    %c0_133 = arith.constant 0 : index
    %375 = vector.load %arg12[%c1_131, %c0_132, %c0_133] : memref<3x32x64xbf16, #tpu.memory_space<vmem>>, vector<1x32x64xbf16>
    %376 = vector.shape_cast %375 : vector<1x32x64xbf16> to vector<32x64xbf16>
    %cst_134 = arith.constant dense<0.000000e+00> : vector<16x64xf32>
    %377 = tpu.matmul %374, %376, %cst_134 {dimension_numbers = #tpu.dot_dimension_numbers<[1], [0], [0], [1], [0, 0, 1, 1], [], []>} : vector<16x32xbf16>, vector<32x64xbf16>, vector<16x64xf32> -> vector<16x64xf32>
    %c1_135 = arith.constant 1 : index
    %c0_136 = arith.constant 0 : index
    %c0_137 = arith.constant 0 : index
    %378 = vector.load %arg13[%c1_135, %c0_136, %c0_137] : memref<3x1x64xf32, #tpu.memory_space<vmem>>, vector<1x1x64xf32>
    %379 = vector.shape_cast %378 : vector<1x1x64xf32> to vector<1x64xf32>
    %380 = vector.broadcast %379 : vector<1x64xf32> to vector<16x64xf32>
    %381 = arith.addf %377, %380 : vector<16x64xf32>
    %cst_138 = arith.constant 5.000000e-01 : f32
    %382 = vector.broadcast %cst_138 : f32 to vector<16x64xf32>
    %383 = arith.mulf %382, %381 : vector<16x64xf32>
    %cst_139 = arith.constant 4.471500e-02 : f32
    %384 = vector.broadcast %cst_139 : f32 to vector<16x64xf32>
    %385 = arith.mulf %384, %381 : vector<16x64xf32>
    %386 = arith.mulf %385, %381 : vector<16x64xf32>
    %387 = arith.mulf %386, %381 : vector<16x64xf32>
    %388 = arith.addf %381, %387 : vector<16x64xf32>
    %cst_140 = arith.constant 0.797884583 : f32
    %389 = vector.broadcast %cst_140 : f32 to vector<16x64xf32>
    %390 = arith.mulf %389, %388 : vector<16x64xf32>
    %391 = math.tanh %390 : vector<16x64xf32>
    %cst_141 = arith.constant 1.000000e+00 : f32
    %392 = vector.broadcast %cst_141 : f32 to vector<16x64xf32>
    %393 = arith.addf %392, %391 : vector<16x64xf32>
    %394 = arith.mulf %383, %393 : vector<16x64xf32>
    %395 = arith.truncf %394 : vector<16x64xf32> to vector<16x64xbf16>
    %c1_142 = arith.constant 1 : index
    %c0_143 = arith.constant 0 : index
    %c0_144 = arith.constant 0 : index
    %396 = vector.load %arg14[%c1_142, %c0_143, %c0_144] : memref<3x64x32xbf16, #tpu.memory_space<vmem>>, vector<1x64x32xbf16>
    %397 = vector.shape_cast %396 : vector<1x64x32xbf16> to vector<64x32xbf16>
    %cst_145 = arith.constant dense<0.000000e+00> : vector<16x32xf32>
    %398 = tpu.matmul %395, %397, %cst_145 {dimension_numbers = #tpu.dot_dimension_numbers<[1], [0], [0], [1], [0, 0, 1, 1], [], []>} : vector<16x64xbf16>, vector<64x32xbf16>, vector<16x32xf32> -> vector<16x32xf32>
    %c1_146 = arith.constant 1 : index
    %c0_147 = arith.constant 0 : index
    %c0_148 = arith.constant 0 : index
    %399 = vector.load %arg15[%c1_146, %c0_147, %c0_148] : memref<3x1x32xf32, #tpu.memory_space<vmem>>, vector<1x1x32xf32>
    %400 = vector.shape_cast %399 : vector<1x1x32xf32> to vector<1x32xf32>
    %401 = vector.broadcast %400 : vector<1x32xf32> to vector<16x32xf32>
    %402 = arith.addf %398, %401 : vector<16x32xf32>
    %403 = arith.addf %402, %373 : vector<16x32xf32>
    %c1_149 = arith.constant 1 : index
    %c0_150 = arith.constant 0 : index
    %c0_151 = arith.constant 0 : index
    %404 = vector.load %arg10[%c1_149, %c0_150, %c0_151] : memref<3x1x32xf32, #tpu.memory_space<vmem>>, vector<1x1x32xf32>
    %405 = vector.shape_cast %404 : vector<1x1x32xf32> to vector<1x32xf32>
    %c1_152 = arith.constant 1 : index
    %c0_153 = arith.constant 0 : index
    %c0_154 = arith.constant 0 : index
    %406 = vector.load %arg11[%c1_152, %c0_153, %c0_154] : memref<3x1x32xf32, #tpu.memory_space<vmem>>, vector<1x1x32xf32>
    %407 = vector.shape_cast %406 : vector<1x1x32xf32> to vector<1x32xf32>
    %cst_155 = arith.constant dense<0.000000e+00> : vector<16xf32>
    %408 = vector.multi_reduction <add>, %403, %cst_155 [1] : vector<16x32xf32> to vector<16xf32>
    %409 = vector.shape_cast %408 : vector<16xf32> to vector<16x1xf32>
    %cst_156 = arith.constant 3.200000e+01 : f32
    %410 = vector.broadcast %cst_156 : f32 to vector<16x1xf32>
    %411 = arith.divf %409, %410 : vector<16x1xf32>
    %412 = vector.broadcast %411 : vector<16x1xf32> to vector<16x32xf32>
    %413 = arith.subf %403, %412 : vector<16x32xf32>
    %414 = arith.mulf %413, %413 : vector<16x32xf32>
    %cst_157 = arith.constant dense<0.000000e+00> : vector<16xf32>
    %415 = vector.multi_reduction <add>, %414, %cst_157 [1] : vector<16x32xf32> to vector<16xf32>
    %416 = vector.shape_cast %415 : vector<16xf32> to vector<16x1xf32>
    %cst_158 = arith.constant 3.200000e+01 : f32
    %417 = vector.broadcast %cst_158 : f32 to vector<16x1xf32>
    %418 = arith.divf %416, %417 : vector<16x1xf32>
    %cst_159 = arith.constant 9.99999996E-13 : f32
    %419 = vector.broadcast %cst_159 : f32 to vector<16x1xf32>
    %420 = arith.addf %418, %419 : vector<16x1xf32>
    %421 = math.rsqrt %420 : vector<16x1xf32>
    %422 = vector.broadcast %421 : vector<16x1xf32> to vector<16x32xf32>
    %423 = arith.mulf %413, %422 : vector<16x32xf32>
    %424 = vector.broadcast %405 : vector<1x32xf32> to vector<16x32xf32>
    %425 = arith.mulf %423, %424 : vector<16x32xf32>
    %426 = vector.broadcast %407 : vector<1x32xf32> to vector<16x32xf32>
    %427 = arith.addf %425, %426 : vector<16x32xf32>
    %428 = vector.extract_strided_slice %427 {offsets = [0, 0], sizes = [1, 32], strides = [1, 1]} : vector<16x32xf32> to vector<1x32xf32>
    %429 = vector.extract_strided_slice %427 {offsets = [8, 0], sizes = [1, 32], strides = [1, 1]} : vector<16x32xf32> to vector<1x32xf32>
    %430 = tpu.concatenate %428, %429 in 0 : vector<1x32xf32>, vector<1x32xf32> -> vector<2x32xf32>
    %431 = arith.truncf %427 : vector<16x32xf32> to vector<16x32xbf16>
    %c2 = arith.constant 2 : index
    %c0_160 = arith.constant 0 : index
    %c0_161 = arith.constant 0 : index
    %432 = vector.load %arg4[%c2, %c0_160, %c0_161] : memref<3x32x96xbf16, #tpu.memory_space<vmem>>, vector<1x32x96xbf16>
    %433 = vector.shape_cast %432 : vector<1x32x96xbf16> to vector<32x96xbf16>
    %cst_162 = arith.constant dense<0.000000e+00> : vector<16x96xf32>
    %434 = tpu.matmul %431, %433, %cst_162 {dimension_numbers = #tpu.dot_dimension_numbers<[1], [0], [0], [1], [0, 0, 1, 1], [], []>} : vector<16x32xbf16>, vector<32x96xbf16>, vector<16x96xf32> -> vector<16x96xf32>
    %c2_163 = arith.constant 2 : index
    %c0_164 = arith.constant 0 : index
    %c0_165 = arith.constant 0 : index
    %435 = vector.load %arg5[%c2_163, %c0_164, %c0_165] : memref<3x1x96xf32, #tpu.memory_space<vmem>>, vector<1x1x96xf32>
    %436 = vector.shape_cast %435 : vector<1x1x96xf32> to vector<1x96xf32>
    %437 = vector.broadcast %436 : vector<1x96xf32> to vector<16x96xf32>
    %438 = arith.addf %434, %437 : vector<16x96xf32>
    %439 = vector.extract_strided_slice %438 {offsets = [0, 0], sizes = [16, 16], strides = [1, 1]} : vector<16x96xf32> to vector<16x16xf32>
    %440 = vector.extract_strided_slice %438 {offsets = [0, 32], sizes = [16, 16], strides = [1, 1]} : vector<16x96xf32> to vector<16x16xf32>
    %441 = vector.extract_strided_slice %438 {offsets = [0, 64], sizes = [16, 16], strides = [1, 1]} : vector<16x96xf32> to vector<16x16xf32>
    %442 = vector.extract_strided_slice %439 {offsets = [0, 0], sizes = [8, 16], strides = [1, 1]} : vector<16x16xf32> to vector<8x16xf32>
    %443 = arith.truncf %442 : vector<8x16xf32> to vector<8x16xbf16>
    %444 = vector.extract_strided_slice %440 {offsets = [0, 0], sizes = [8, 16], strides = [1, 1]} : vector<16x16xf32> to vector<8x16xf32>
    %445 = arith.truncf %444 : vector<8x16xf32> to vector<8x16xbf16>
    %446 = vector.extract_strided_slice %441 {offsets = [0, 0], sizes = [8, 16], strides = [1, 1]} : vector<16x16xf32> to vector<8x16xf32>
    %447 = arith.truncf %446 : vector<8x16xf32> to vector<8x16xbf16>
    "tpu.trace_start"() <{level = 10 : i32, message = "qd,kd->qk"}> : () -> ()
    %cst_166 = arith.constant dense<0.000000e+00> : vector<8x8xf32>
    %448 = tpu.matmul %443, %445, %cst_166 {dimension_numbers = #tpu.dot_dimension_numbers<[1], [1], [0], [0], [0, 0, 1, 0], [], []>} : vector<8x16xbf16>, vector<8x16xbf16>, vector<8x8xf32> -> vector<8x8xf32>
    "tpu.trace_stop"() : () -> ()
    %cst_167 = arith.constant 2.500000e-01 : f32
    %449 = vector.broadcast %cst_167 : f32 to vector<8x8xf32>
    %450 = arith.mulf %448, %449 : vector<8x8xf32>
    %451 = vector.extract_strided_slice %27 {offsets = [0, 0], sizes = [1, 8], strides = [1, 1]} : vector<2x8xf32> to vector<1x8xf32>
    %452 = vector.broadcast %451 : vector<1x8xf32> to vector<8x8xf32>
    %453 = arith.addf %450, %452 : vector<8x8xf32>
    %cst_168 = arith.constant dense<0xFF800000> : vector<8xf32>
    %454 = vector.multi_reduction <maximumf>, %453, %cst_168 [1] : vector<8x8xf32> to vector<8xf32>
    %455 = vector.shape_cast %454 : vector<8xf32> to vector<8x1xf32>
    %456 = vector.broadcast %455 : vector<8x1xf32> to vector<8x8xf32>
    %457 = arith.subf %453, %456 : vector<8x8xf32>
    %458 = math.exp %457 : vector<8x8xf32>
    %cst_169 = arith.constant dense<0.000000e+00> : vector<8xf32>
    %459 = vector.multi_reduction <add>, %458, %cst_169 [1] : vector<8x8xf32> to vector<8xf32>
    %460 = vector.shape_cast %459 : vector<8xf32> to vector<8x1xf32>
    %461 = arith.truncf %458 : vector<8x8xf32> to vector<8x8xbf16>
    %cst_170 = arith.constant dense<0.000000e+00> : vector<8x16xf32>
    %462 = tpu.matmul %461, %447, %cst_170 {dimension_numbers = #tpu.dot_dimension_numbers<[1], [0], [0], [1], [0, 0, 1, 1], [], []>} : vector<8x8xbf16>, vector<8x16xbf16>, vector<8x16xf32> -> vector<8x16xf32>
    %463 = tpu.reciprocal %460 {approx = true} : vector<8x1xf32> -> vector<8x1xf32>
    %464 = vector.broadcast %463 : vector<8x1xf32> to vector<8x16xf32>
    %465 = arith.mulf %462, %464 : vector<8x16xf32>
    %466 = vector.extract_strided_slice %439 {offsets = [8, 0], sizes = [8, 16], strides = [1, 1]} : vector<16x16xf32> to vector<8x16xf32>
    %467 = arith.truncf %466 : vector<8x16xf32> to vector<8x16xbf16>
    %468 = vector.extract_strided_slice %440 {offsets = [8, 0], sizes = [8, 16], strides = [1, 1]} : vector<16x16xf32> to vector<8x16xf32>
    %469 = arith.truncf %468 : vector<8x16xf32> to vector<8x16xbf16>
    %470 = vector.extract_strided_slice %441 {offsets = [8, 0], sizes = [8, 16], strides = [1, 1]} : vector<16x16xf32> to vector<8x16xf32>
    %471 = arith.truncf %470 : vector<8x16xf32> to vector<8x16xbf16>
    "tpu.trace_start"() <{level = 10 : i32, message = "qd,kd->qk"}> : () -> ()
    %cst_171 = arith.constant dense<0.000000e+00> : vector<8x8xf32>
    %472 = tpu.matmul %467, %469, %cst_171 {dimension_numbers = #tpu.dot_dimension_numbers<[1], [1], [0], [0], [0, 0, 1, 0], [], []>} : vector<8x16xbf16>, vector<8x16xbf16>, vector<8x8xf32> -> vector<8x8xf32>
    "tpu.trace_stop"() : () -> ()
    %cst_172 = arith.constant 2.500000e-01 : f32
    %473 = vector.broadcast %cst_172 : f32 to vector<8x8xf32>
    %474 = arith.mulf %472, %473 : vector<8x8xf32>
    %475 = vector.extract_strided_slice %27 {offsets = [1, 0], sizes = [1, 8], strides = [1, 1]} : vector<2x8xf32> to vector<1x8xf32>
    %476 = vector.broadcast %475 : vector<1x8xf32> to vector<8x8xf32>
    %477 = arith.addf %474, %476 : vector<8x8xf32>
    %cst_173 = arith.constant dense<0xFF800000> : vector<8xf32>
    %478 = vector.multi_reduction <maximumf>, %477, %cst_173 [1] : vector<8x8xf32> to vector<8xf32>
    %479 = vector.shape_cast %478 : vector<8xf32> to vector<8x1xf32>
    %480 = vector.broadcast %479 : vector<8x1xf32> to vector<8x8xf32>
    %481 = arith.subf %477, %480 : vector<8x8xf32>
    %482 = math.exp %481 : vector<8x8xf32>
    %cst_174 = arith.constant dense<0.000000e+00> : vector<8xf32>
    %483 = vector.multi_reduction <add>, %482, %cst_174 [1] : vector<8x8xf32> to vector<8xf32>
    %484 = vector.shape_cast %483 : vector<8xf32> to vector<8x1xf32>
    %485 = arith.truncf %482 : vector<8x8xf32> to vector<8x8xbf16>
    %cst_175 = arith.constant dense<0.000000e+00> : vector<8x16xf32>
    %486 = tpu.matmul %485, %471, %cst_175 {dimension_numbers = #tpu.dot_dimension_numbers<[1], [0], [0], [1], [0, 0, 1, 1], [], []>} : vector<8x8xbf16>, vector<8x16xbf16>, vector<8x16xf32> -> vector<8x16xf32>
    %487 = tpu.reciprocal %484 {approx = true} : vector<8x1xf32> -> vector<8x1xf32>
    %488 = vector.broadcast %487 : vector<8x1xf32> to vector<8x16xf32>
    %489 = arith.mulf %486, %488 : vector<8x16xf32>
    %490 = vector.extract_strided_slice %438 {offsets = [0, 16], sizes = [16, 16], strides = [1, 1]} : vector<16x96xf32> to vector<16x16xf32>
    %491 = vector.extract_strided_slice %438 {offsets = [0, 48], sizes = [16, 16], strides = [1, 1]} : vector<16x96xf32> to vector<16x16xf32>
    %492 = vector.extract_strided_slice %438 {offsets = [0, 80], sizes = [16, 16], strides = [1, 1]} : vector<16x96xf32> to vector<16x16xf32>
    %493 = vector.extract_strided_slice %490 {offsets = [0, 0], sizes = [8, 16], strides = [1, 1]} : vector<16x16xf32> to vector<8x16xf32>
    %494 = arith.truncf %493 : vector<8x16xf32> to vector<8x16xbf16>
    %495 = vector.extract_strided_slice %491 {offsets = [0, 0], sizes = [8, 16], strides = [1, 1]} : vector<16x16xf32> to vector<8x16xf32>
    %496 = arith.truncf %495 : vector<8x16xf32> to vector<8x16xbf16>
    %497 = vector.extract_strided_slice %492 {offsets = [0, 0], sizes = [8, 16], strides = [1, 1]} : vector<16x16xf32> to vector<8x16xf32>
    %498 = arith.truncf %497 : vector<8x16xf32> to vector<8x16xbf16>
    "tpu.trace_start"() <{level = 10 : i32, message = "qd,kd->qk"}> : () -> ()
    %cst_176 = arith.constant dense<0.000000e+00> : vector<8x8xf32>
    %499 = tpu.matmul %494, %496, %cst_176 {dimension_numbers = #tpu.dot_dimension_numbers<[1], [1], [0], [0], [0, 0, 1, 0], [], []>} : vector<8x16xbf16>, vector<8x16xbf16>, vector<8x8xf32> -> vector<8x8xf32>
    "tpu.trace_stop"() : () -> ()
    %cst_177 = arith.constant 2.500000e-01 : f32
    %500 = vector.broadcast %cst_177 : f32 to vector<8x8xf32>
    %501 = arith.mulf %499, %500 : vector<8x8xf32>
    %502 = vector.extract_strided_slice %27 {offsets = [0, 0], sizes = [1, 8], strides = [1, 1]} : vector<2x8xf32> to vector<1x8xf32>
    %503 = vector.broadcast %502 : vector<1x8xf32> to vector<8x8xf32>
    %504 = arith.addf %501, %503 : vector<8x8xf32>
    %cst_178 = arith.constant dense<0xFF800000> : vector<8xf32>
    %505 = vector.multi_reduction <maximumf>, %504, %cst_178 [1] : vector<8x8xf32> to vector<8xf32>
    %506 = vector.shape_cast %505 : vector<8xf32> to vector<8x1xf32>
    %507 = vector.broadcast %506 : vector<8x1xf32> to vector<8x8xf32>
    %508 = arith.subf %504, %507 : vector<8x8xf32>
    %509 = math.exp %508 : vector<8x8xf32>
    %cst_179 = arith.constant dense<0.000000e+00> : vector<8xf32>
    %510 = vector.multi_reduction <add>, %509, %cst_179 [1] : vector<8x8xf32> to vector<8xf32>
    %511 = vector.shape_cast %510 : vector<8xf32> to vector<8x1xf32>
    %512 = arith.truncf %509 : vector<8x8xf32> to vector<8x8xbf16>
    %cst_180 = arith.constant dense<0.000000e+00> : vector<8x16xf32>
    %513 = tpu.matmul %512, %498, %cst_180 {dimension_numbers = #tpu.dot_dimension_numbers<[1], [0], [0], [1], [0, 0, 1, 1], [], []>} : vector<8x8xbf16>, vector<8x16xbf16>, vector<8x16xf32> -> vector<8x16xf32>
    %514 = tpu.reciprocal %511 {approx = true} : vector<8x1xf32> -> vector<8x1xf32>
    %515 = vector.broadcast %514 : vector<8x1xf32> to vector<8x16xf32>
    %516 = arith.mulf %513, %515 : vector<8x16xf32>
    %517 = vector.extract_strided_slice %490 {offsets = [8, 0], sizes = [8, 16], strides = [1, 1]} : vector<16x16xf32> to vector<8x16xf32>
    %518 = arith.truncf %517 : vector<8x16xf32> to vector<8x16xbf16>
    %519 = vector.extract_strided_slice %491 {offsets = [8, 0], sizes = [8, 16], strides = [1, 1]} : vector<16x16xf32> to vector<8x16xf32>
    %520 = arith.truncf %519 : vector<8x16xf32> to vector<8x16xbf16>
    %521 = vector.extract_strided_slice %492 {offsets = [8, 0], sizes = [8, 16], strides = [1, 1]} : vector<16x16xf32> to vector<8x16xf32>
    %522 = arith.truncf %521 : vector<8x16xf32> to vector<8x16xbf16>
    "tpu.trace_start"() <{level = 10 : i32, message = "qd,kd->qk"}> : () -> ()
    %cst_181 = arith.constant dense<0.000000e+00> : vector<8x8xf32>
    %523 = tpu.matmul %518, %520, %cst_181 {dimension_numbers = #tpu.dot_dimension_numbers<[1], [1], [0], [0], [0, 0, 1, 0], [], []>} : vector<8x16xbf16>, vector<8x16xbf16>, vector<8x8xf32> -> vector<8x8xf32>
    "tpu.trace_stop"() : () -> ()
    %cst_182 = arith.constant 2.500000e-01 : f32
    %524 = vector.broadcast %cst_182 : f32 to vector<8x8xf32>
    %525 = arith.mulf %523, %524 : vector<8x8xf32>
    %526 = vector.extract_strided_slice %27 {offsets = [1, 0], sizes = [1, 8], strides = [1, 1]} : vector<2x8xf32> to vector<1x8xf32>
    %527 = vector.broadcast %526 : vector<1x8xf32> to vector<8x8xf32>
    %528 = arith.addf %525, %527 : vector<8x8xf32>
    %cst_183 = arith.constant dense<0xFF800000> : vector<8xf32>
    %529 = vector.multi_reduction <maximumf>, %528, %cst_183 [1] : vector<8x8xf32> to vector<8xf32>
    %530 = vector.shape_cast %529 : vector<8xf32> to vector<8x1xf32>
    %531 = vector.broadcast %530 : vector<8x1xf32> to vector<8x8xf32>
    %532 = arith.subf %528, %531 : vector<8x8xf32>
    %533 = math.exp %532 : vector<8x8xf32>
    %cst_184 = arith.constant dense<0.000000e+00> : vector<8xf32>
    %534 = vector.multi_reduction <add>, %533, %cst_184 [1] : vector<8x8xf32> to vector<8xf32>
    %535 = vector.shape_cast %534 : vector<8xf32> to vector<8x1xf32>
    %536 = arith.truncf %533 : vector<8x8xf32> to vector<8x8xbf16>
    %cst_185 = arith.constant dense<0.000000e+00> : vector<8x16xf32>
    %537 = tpu.matmul %536, %522, %cst_185 {dimension_numbers = #tpu.dot_dimension_numbers<[1], [0], [0], [1], [0, 0, 1, 1], [], []>} : vector<8x8xbf16>, vector<8x16xbf16>, vector<8x16xf32> -> vector<8x16xf32>
    %538 = tpu.reciprocal %535 {approx = true} : vector<8x1xf32> -> vector<8x1xf32>
    %539 = vector.broadcast %538 : vector<8x1xf32> to vector<8x16xf32>
    %540 = arith.mulf %537, %539 : vector<8x16xf32>
    %541 = tpu.concatenate %465, %516 in 1 : vector<8x16xf32>, vector<8x16xf32> -> vector<8x32xf32>
    %542 = tpu.concatenate %489, %540 in 1 : vector<8x16xf32>, vector<8x16xf32> -> vector<8x32xf32>
    %543 = tpu.concatenate %541, %542 in 0 : vector<8x32xf32>, vector<8x32xf32> -> vector<16x32xf32>
    %544 = arith.truncf %543 : vector<16x32xf32> to vector<16x32xbf16>
    %c2_186 = arith.constant 2 : index
    %c0_187 = arith.constant 0 : index
    %c0_188 = arith.constant 0 : index
    %545 = vector.load %arg6[%c2_186, %c0_187, %c0_188] : memref<3x32x32xbf16, #tpu.memory_space<vmem>>, vector<1x32x32xbf16>
    %546 = vector.shape_cast %545 : vector<1x32x32xbf16> to vector<32x32xbf16>
    %cst_189 = arith.constant dense<0.000000e+00> : vector<16x32xf32>
    %547 = tpu.matmul %544, %546, %cst_189 {dimension_numbers = #tpu.dot_dimension_numbers<[1], [0], [0], [1], [0, 0, 1, 1], [], []>} : vector<16x32xbf16>, vector<32x32xbf16>, vector<16x32xf32> -> vector<16x32xf32>
    %c2_190 = arith.constant 2 : index
    %c0_191 = arith.constant 0 : index
    %c0_192 = arith.constant 0 : index
    %548 = vector.load %arg7[%c2_190, %c0_191, %c0_192] : memref<3x1x32xf32, #tpu.memory_space<vmem>>, vector<1x1x32xf32>
    %549 = vector.shape_cast %548 : vector<1x1x32xf32> to vector<1x32xf32>
    %550 = vector.broadcast %549 : vector<1x32xf32> to vector<16x32xf32>
    %551 = arith.addf %547, %550 : vector<16x32xf32>
    %552 = arith.addf %551, %427 : vector<16x32xf32>
    %c2_193 = arith.constant 2 : index
    %c0_194 = arith.constant 0 : index
    %c0_195 = arith.constant 0 : index
    %553 = vector.load %arg8[%c2_193, %c0_194, %c0_195] : memref<3x1x32xf32, #tpu.memory_space<vmem>>, vector<1x1x32xf32>
    %554 = vector.shape_cast %553 : vector<1x1x32xf32> to vector<1x32xf32>
    %c2_196 = arith.constant 2 : index
    %c0_197 = arith.constant 0 : index
    %c0_198 = arith.constant 0 : index
    %555 = vector.load %arg9[%c2_196, %c0_197, %c0_198] : memref<3x1x32xf32, #tpu.memory_space<vmem>>, vector<1x1x32xf32>
    %556 = vector.shape_cast %555 : vector<1x1x32xf32> to vector<1x32xf32>
    %cst_199 = arith.constant dense<0.000000e+00> : vector<16xf32>
    %557 = vector.multi_reduction <add>, %552, %cst_199 [1] : vector<16x32xf32> to vector<16xf32>
    %558 = vector.shape_cast %557 : vector<16xf32> to vector<16x1xf32>
    %cst_200 = arith.constant 3.200000e+01 : f32
    %559 = vector.broadcast %cst_200 : f32 to vector<16x1xf32>
    %560 = arith.divf %558, %559 : vector<16x1xf32>
    %561 = vector.broadcast %560 : vector<16x1xf32> to vector<16x32xf32>
    %562 = arith.subf %552, %561 : vector<16x32xf32>
    %563 = arith.mulf %562, %562 : vector<16x32xf32>
    %cst_201 = arith.constant dense<0.000000e+00> : vector<16xf32>
    %564 = vector.multi_reduction <add>, %563, %cst_201 [1] : vector<16x32xf32> to vector<16xf32>
    %565 = vector.shape_cast %564 : vector<16xf32> to vector<16x1xf32>
    %cst_202 = arith.constant 3.200000e+01 : f32
    %566 = vector.broadcast %cst_202 : f32 to vector<16x1xf32>
    %567 = arith.divf %565, %566 : vector<16x1xf32>
    %cst_203 = arith.constant 9.99999996E-13 : f32
    %568 = vector.broadcast %cst_203 : f32 to vector<16x1xf32>
    %569 = arith.addf %567, %568 : vector<16x1xf32>
    %570 = math.rsqrt %569 : vector<16x1xf32>
    %571 = vector.broadcast %570 : vector<16x1xf32> to vector<16x32xf32>
    %572 = arith.mulf %562, %571 : vector<16x32xf32>
    %573 = vector.broadcast %554 : vector<1x32xf32> to vector<16x32xf32>
    %574 = arith.mulf %572, %573 : vector<16x32xf32>
    %575 = vector.broadcast %556 : vector<1x32xf32> to vector<16x32xf32>
    %576 = arith.addf %574, %575 : vector<16x32xf32>
    %577 = arith.truncf %576 : vector<16x32xf32> to vector<16x32xbf16>
    %c2_204 = arith.constant 2 : index
    %c0_205 = arith.constant 0 : index
    %c0_206 = arith.constant 0 : index
    %578 = vector.load %arg12[%c2_204, %c0_205, %c0_206] : memref<3x32x64xbf16, #tpu.memory_space<vmem>>, vector<1x32x64xbf16>
    %579 = vector.shape_cast %578 : vector<1x32x64xbf16> to vector<32x64xbf16>
    %cst_207 = arith.constant dense<0.000000e+00> : vector<16x64xf32>
    %580 = tpu.matmul %577, %579, %cst_207 {dimension_numbers = #tpu.dot_dimension_numbers<[1], [0], [0], [1], [0, 0, 1, 1], [], []>} : vector<16x32xbf16>, vector<32x64xbf16>, vector<16x64xf32> -> vector<16x64xf32>
    %c2_208 = arith.constant 2 : index
    %c0_209 = arith.constant 0 : index
    %c0_210 = arith.constant 0 : index
    %581 = vector.load %arg13[%c2_208, %c0_209, %c0_210] : memref<3x1x64xf32, #tpu.memory_space<vmem>>, vector<1x1x64xf32>
    %582 = vector.shape_cast %581 : vector<1x1x64xf32> to vector<1x64xf32>
    %583 = vector.broadcast %582 : vector<1x64xf32> to vector<16x64xf32>
    %584 = arith.addf %580, %583 : vector<16x64xf32>
    %cst_211 = arith.constant 5.000000e-01 : f32
    %585 = vector.broadcast %cst_211 : f32 to vector<16x64xf32>
    %586 = arith.mulf %585, %584 : vector<16x64xf32>
    %cst_212 = arith.constant 4.471500e-02 : f32
    %587 = vector.broadcast %cst_212 : f32 to vector<16x64xf32>
    %588 = arith.mulf %587, %584 : vector<16x64xf32>
    %589 = arith.mulf %588, %584 : vector<16x64xf32>
    %590 = arith.mulf %589, %584 : vector<16x64xf32>
    %591 = arith.addf %584, %590 : vector<16x64xf32>
    %cst_213 = arith.constant 0.797884583 : f32
    %592 = vector.broadcast %cst_213 : f32 to vector<16x64xf32>
    %593 = arith.mulf %592, %591 : vector<16x64xf32>
    %594 = math.tanh %593 : vector<16x64xf32>
    %cst_214 = arith.constant 1.000000e+00 : f32
    %595 = vector.broadcast %cst_214 : f32 to vector<16x64xf32>
    %596 = arith.addf %595, %594 : vector<16x64xf32>
    %597 = arith.mulf %586, %596 : vector<16x64xf32>
    %598 = arith.truncf %597 : vector<16x64xf32> to vector<16x64xbf16>
    %c2_215 = arith.constant 2 : index
    %c0_216 = arith.constant 0 : index
    %c0_217 = arith.constant 0 : index
    %599 = vector.load %arg14[%c2_215, %c0_216, %c0_217] : memref<3x64x32xbf16, #tpu.memory_space<vmem>>, vector<1x64x32xbf16>
    %600 = vector.shape_cast %599 : vector<1x64x32xbf16> to vector<64x32xbf16>
    %cst_218 = arith.constant dense<0.000000e+00> : vector<16x32xf32>
    %601 = tpu.matmul %598, %600, %cst_218 {dimension_numbers = #tpu.dot_dimension_numbers<[1], [0], [0], [1], [0, 0, 1, 1], [], []>} : vector<16x64xbf16>, vector<64x32xbf16>, vector<16x32xf32> -> vector<16x32xf32>
    %c2_219 = arith.constant 2 : index
    %c0_220 = arith.constant 0 : index
    %c0_221 = arith.constant 0 : index
    %602 = vector.load %arg15[%c2_219, %c0_220, %c0_221] : memref<3x1x32xf32, #tpu.memory_space<vmem>>, vector<1x1x32xf32>
    %603 = vector.shape_cast %602 : vector<1x1x32xf32> to vector<1x32xf32>
    %604 = vector.broadcast %603 : vector<1x32xf32> to vector<16x32xf32>
    %605 = arith.addf %601, %604 : vector<16x32xf32>
    %606 = arith.addf %605, %576 : vector<16x32xf32>
    %c2_222 = arith.constant 2 : index
    %c0_223 = arith.constant 0 : index
    %c0_224 = arith.constant 0 : index
    %607 = vector.load %arg10[%c2_222, %c0_223, %c0_224] : memref<3x1x32xf32, #tpu.memory_space<vmem>>, vector<1x1x32xf32>
    %608 = vector.shape_cast %607 : vector<1x1x32xf32> to vector<1x32xf32>
    %c2_225 = arith.constant 2 : index
    %c0_226 = arith.constant 0 : index
    %c0_227 = arith.constant 0 : index
    %609 = vector.load %arg11[%c2_225, %c0_226, %c0_227] : memref<3x1x32xf32, #tpu.memory_space<vmem>>, vector<1x1x32xf32>
    %610 = vector.shape_cast %609 : vector<1x1x32xf32> to vector<1x32xf32>
    %cst_228 = arith.constant dense<0.000000e+00> : vector<16xf32>
    %611 = vector.multi_reduction <add>, %606, %cst_228 [1] : vector<16x32xf32> to vector<16xf32>
    %612 = vector.shape_cast %611 : vector<16xf32> to vector<16x1xf32>
    %cst_229 = arith.constant 3.200000e+01 : f32
    %613 = vector.broadcast %cst_229 : f32 to vector<16x1xf32>
    %614 = arith.divf %612, %613 : vector<16x1xf32>
    %615 = vector.broadcast %614 : vector<16x1xf32> to vector<16x32xf32>
    %616 = arith.subf %606, %615 : vector<16x32xf32>
    %617 = arith.mulf %616, %616 : vector<16x32xf32>
    %cst_230 = arith.constant dense<0.000000e+00> : vector<16xf32>
    %618 = vector.multi_reduction <add>, %617, %cst_230 [1] : vector<16x32xf32> to vector<16xf32>
    %619 = vector.shape_cast %618 : vector<16xf32> to vector<16x1xf32>
    %cst_231 = arith.constant 3.200000e+01 : f32
    %620 = vector.broadcast %cst_231 : f32 to vector<16x1xf32>
    %621 = arith.divf %619, %620 : vector<16x1xf32>
    %cst_232 = arith.constant 9.99999996E-13 : f32
    %622 = vector.broadcast %cst_232 : f32 to vector<16x1xf32>
    %623 = arith.addf %621, %622 : vector<16x1xf32>
    %624 = math.rsqrt %623 : vector<16x1xf32>
    %625 = vector.broadcast %624 : vector<16x1xf32> to vector<16x32xf32>
    %626 = arith.mulf %616, %625 : vector<16x32xf32>
    %627 = vector.broadcast %608 : vector<1x32xf32> to vector<16x32xf32>
    %628 = arith.mulf %626, %627 : vector<16x32xf32>
    %629 = vector.broadcast %610 : vector<1x32xf32> to vector<16x32xf32>
    %630 = arith.addf %628, %629 : vector<16x32xf32>
    %631 = vector.extract_strided_slice %630 {offsets = [0, 0], sizes = [1, 32], strides = [1, 1]} : vector<16x32xf32> to vector<1x32xf32>
    %632 = vector.extract_strided_slice %630 {offsets = [8, 0], sizes = [1, 32], strides = [1, 1]} : vector<16x32xf32> to vector<1x32xf32>
    %633 = tpu.concatenate %631, %632 in 0 : vector<1x32xf32>, vector<1x32xf32> -> vector<2x32xf32>
    %634 = tpu.concatenate %430, %633 in 1 : vector<2x32xf32>, vector<2x32xf32> -> vector<2x64xf32>
    %635 = arith.truncf %634 : vector<2x64xf32> to vector<2x64xbf16>
    %c0_233 = arith.constant 0 : index
    %c0_234 = arith.constant 0 : index
    %636 = vector.load %arg16[%c0_233, %c0_234] : memref<64x3xbf16, #tpu.memory_space<vmem>>, vector<64x3xbf16>
    %cst_235 = arith.constant dense<0.000000e+00> : vector<2x3xf32>
    %637 = tpu.matmul %635, %636, %cst_235 {dimension_numbers = #tpu.dot_dimension_numbers<[1], [0], [0], [1], [0, 0, 1, 1], [], []>} : vector<2x64xbf16>, vector<64x3xbf16>, vector<2x3xf32> -> vector<2x3xf32>
    %c0_236 = arith.constant 0 : index
    %c0_237 = arith.constant 0 : index
    %638 = vector.load %arg17[%c0_236, %c0_237] : memref<1x3xf32, #tpu.memory_space<vmem>>, vector<1x3xf32>
    %639 = vector.broadcast %638 : vector<1x3xf32> to vector<2x3xf32>
    %640 = arith.addf %637, %639 : vector<2x3xf32>
    %c0_238 = arith.constant 0 : index
    %c0_239 = arith.constant 0 : index
    %641 = vector.load %arg18[%c0_238, %c0_239] : memref<2x3xf32, #tpu.memory_space<vmem>>, vector<2x3xf32>
    tpu.vector_store %arg18[%c0_238, %c0_239], %640 {strides = array<i32>} : memref<2x3xf32, #tpu.memory_space<vmem>>, vector<2x3xf32>,
    return
  }
}

</mosaic_0001>

<bundles_post_ra>
// kernel: abuse_detect_net_forward.1
= control target key start
LH: loop header
LB: loop body
LE: loop exit
PB: predicated region body
PF: predicated region fallthrough
CT: control target
= control target key end

     0   :  { %s4189_s0 = inlined_call_operand.vmem [shape: f32[16,32], index: 0, kind: input, shape index: {}]   ;;  %s4190_s1 = inlined_call_operand.vmem [shape: f32[2,8], index: 1, kind: input, shape index: {}]   ;;  %s4191_s2 = inlined_call_operand.vmem [shape: f32[1,32], index: 2, kind: input, shape index: {}]   ;;  %s4192_s3 = inlined_call_operand.vmem [shape: f32[1,32], index: 3, kind: input, shape index: {}]   ;;  %s4193_s4 = inlined_call_operand.vmem [shape: bf16[3,32,96], index: 4, kind: input, shape index: {}]   ;;  %s4194_s5 = inlined_call_operand.vmem [shape: f32[3,1,96], index: 5, kind: input, shape index: {}]   ;;  %s4195_s6 = inlined_call_operand.vmem [shape: bf16[3,32,32], index: 6, kind: input, shape index: {}]   ;;  %s4196_s7 = inlined_call_operand.vmem [shape: f32[3,1,32], index: 7, kind: input, shape index: {}]   ;;  %s4197_s8 = inlined_call_operand.vmem [shape: f32[3,1,32], index: 8, kind: input, shape index: {}]   ;;  %s4198_s9 = inlined_call_operand.vmem [shape: f32[3,1,32], index: 9, kind: input, shape index: {}]   ;;  %s4199_s10 = inlined_call_operand.vmem [shape: f32[3,1,32], index: 10, kind: input, shape index: {}]   ;;  %s4200_s11 = inlined_call_operand.vmem [shape: f32[3,1,32], index: 11, kind: input, shape index: {}]   ;;  %s4201_s12 = inlined_call_operand.vmem [shape: bf16[3,32,64], index: 12, kind: input, shape index: {}]   ;;  %s4202_s13 = inlined_call_operand.vmem [shape: f32[3,1,64], index: 13, kind: input, shape index: {}]   ;;  %s4203_s14 = inlined_call_operand.vmem [shape: bf16[3,64,32], index: 14, kind: input, shape index: {}]   ;;  %s4204_s15 = inlined_call_operand.vmem [shape: f32[3,1,32], index: 15, kind: input, shape index: {}]   ;;  %s4205_s16 = inlined_call_operand.vmem [shape: bf16[64,3], index: 16, kind: input, shape index: {}]   ;;  %s4206_s17 = inlined_call_operand.vmem [shape: f32[1,3], index: 17, kind: input, shape index: {}]   ;;  %s4207_s18 = inlined_call_operand.hbm [shape: f32[2,3], index: 18, kind: output, shape index: {}]  }
   0x1   :  { %4209 = sst [smem:[#allocation5_spill]] %s4189_s0 }
   0x2   :  { %4210 = sst [smem:[#allocation6_spill]] %s4190_s1 }
   0x3   :  { %4211 = sst [smem:[#allocation7_spill]] %s4191_s2 }
   0x4   :  { %s4212_s29 = sld [smem:[#allocation5_spill]]  ;;  %vm65_vm0 = vcmask 261120  }
   0xa   :  { %v61_v0 = vld [vmem:[%s4212_s29] sm:$0xff]  ;;  %v62_v1 = vld [vmem:[%s4212_s29 + $0x8] sm:$0xff] }
   0xb   :  { %v66_v2 = vsel %vm65_vm0, %v61_v0, 0.0  ;;  %v69_v3 = vsel %vm65_vm0, %v62_v1, 0.0 }
   0xc   :  { %67 = vadd.xlane.f32.xlu0 %v66_v2 }
  0x10   :  { %70 = vadd.xlane.f32.xlu0 %v69_v3 }
  0x11   :  { %23 = vsyncpa [#allocation3], 0  ;;  %v3367_v14 = vld [vmem:[%s4193_s4] sm:$0xff]   ;;  %v3513_v15 = vmov 0.0   ;;  %v3368_v16 = vld [vmem:[%s4193_s4 + $0x8] sm:$0xff]   ;;  %vm3514_vm1 = vmmov 0   ;;  %v232_v53 = vlaneseq }
  0x12   :  { %3078 = vmatprep.subr.bf16.mxu0 %v3513_v15  ;;  %3086 = vmatprep.subr.bf16.mxu1 %v3513_v15  ;;  %s4213_s23 = sld [smem:[#allocation7_spill]]  ;;  %v2830_v29 = vld [vmem:[%s4192_s3] ss:$0 sm:$0xff]  ;;  %s3515_s3 = smov 96   ;;  %vm184_vm2 = vcmask 130048   ;;  %vm237_vm3 = vcmask 64512  }
  0x13   :  { %3079 = vmatpush3.bf16.msra.mxu0 %v3367_v14  ;;  %3082 = vmatprep.mubr.msk.bf16.mxu0 %vm3514_vm1, %v3513_v15  ;;  %v2831_v34 = vld [vmem:[%s4194_s5] ss:$0 sm:$0xff]  ;;  %s3516_s28 = smov 80   ;;  %s3517_s29 = smov 112   ;;  %v233_v56 = vshrl.u32 %v232_v53, 7  ;;  %vm253_vm4 = vcmask 1043456  }
  0x14   :  { %3080 = vmatprep.subr.bf16.mxu0 %v3513_v15  ;;  %3088 = vmatprep.mubr.msk.bf16.mxu1 %vm3514_vm1, %v3513_v15  ;;  %s4214_s19 = sld [smem:[#allocation6_spill]]  ;;  %s3518_s1 = smov 64   ;;  %vm889_vm5 = vcmask 523264   ;;  %vm1851_vm6 = vcmask 1040384   ;;  %vm2813_vm7 = vcmask 17408  }
  0x15   :  { %v234_v58 = vsub.s32 0, %v233_v56  ;;  %v352_v2 = vsub.s32 1, %v233_v56  ;;  %s3519_s20 = smov 48   ;;  %s3520_s24 = smov 16  }
  0x17   :  { %3081 = vmatpush3.bf16.msra.mxu0 %v3368_v16 }
  0x18   :  { %3092 = vmatprep.subr.bf16.mxu0 %v3513_v15  ;;  %v2829_v25 = vld [vmem:[%s4213_s23] ss:$0 sm:$0xff] }
  0x1a   :  { %v109_v54 = vld [vmem:[%s4214_s19] sm:$0x3] }
  0x1b   :  { %v110_v55 = vsub.f32 1.0, %v109_v54 }
  0x1d   :  { %v111_v57 = vmul.f32 -10000.0, %v110_v55 }
  0x1f   :  { %v3701_v59 = vrot.slane %v111_v57, %v234_v58 }
  0x99   :  { %v68_v4 = vpop.xlane.xlu0 %67 }
  0x9a   :  { %v73_v5 = vmul.f32 0.03125, %v68_v4  ;;  %v3705_v4 = vrot.slane %v111_v57, %v352_v2 }
  0x9c   :  { %v75_v6 = vsub.f32 %v61_v0, %v73_v5 }
  0x9d   :  { %v71_v7 = vpop.xlane.xlu0 %70 }
  0x9e   :  { %v74_v8 = vmul.f32 0.03125, %v71_v7  ;;  %v77_v9 = vmul.f32 %v75_v6, %v75_v6 }
  0xa0   :  { %v76_v10 = vsub.f32 %v62_v1, %v74_v8  ;;  %v79_v11 = vsel %vm65_vm0, %v77_v9, 0.0 }
  0xa1   :  { %80 = vadd.xlane.f32.xlu1 %v79_v11 }
  0xa2   :  { %v78_v12 = vmul.f32 %v76_v10, %v76_v10 }
  0xa4   :  { %v82_v13 = vsel %vm65_vm0, %v78_v12, 0.0 }
  0xa5   :  { %83 = vadd.xlane.f32.xlu1 %v82_v13 }
 0x12e   :  { %v81_v17 = vpop.xlane.xlu1 %80 }
 0x12f   :  { %v85_v18 = vmul.f32 0.03125, %v81_v17 }
 0x131   :  { %v87_v19 = vadd.f32 1e-12, %v85_v18 }
 0x132   :  { %v84_v20 = vpop.xlane.xlu1 %83 }
 0x133   :  { %3401 = vrsqrt.f32 %v87_v19  ;;  %v86_v21 = vmul.f32 0.03125, %v84_v20 }
 0x135   :  { %v88_v22 = vadd.f32 1e-12, %v86_v21 }
 0x137   :  { %3403 = vrsqrt.f32 %v88_v22 }
 0x13d   :  { %v3402_v23 = vpop.eup %3401 }
 0x13e   :  { %v91_v24 = vmul.f32 %v3402_v23, %v75_v6 }
 0x140   :  { %v99_v28 = vmul.f32 %v2829_v25, %v91_v24 }
 0x141   :  { %v3404_v26 = vpop.eup %3403 }
 0x142   :  { %v92_v27 = vmul.f32 %v3404_v26, %v76_v10  ;;  %v3648_v31 = vadd.f32 %v2830_v29, %v99_v28 }
 0x144   :  { %v100_v30 = vmul.f32 %v2829_v25, %v92_v27 }
 0x146   :  { %v3650_v32 = vadd.f32 %v2830_v29, %v100_v30 }
 0x148   :  { %v112_v33 = vpack.c.bf16 %v3650_v32, %v3648_v31 }
 0x14a   :  { %3083 = vmatmul.mubr.msk.bf16.vlgmr.msra.gmra.mrb[0].mxu0 %vm65_vm0, %v112_v33 }
 0x14b   :  { %3094 = vmatprep.mubr.msk.bf16.mxu0 %vm3514_vm1, %v3513_v15 }
 0x21d   :  { %v173_v35 = vpop.f32.mrb[0].mxu0 }
 0x21e   :  { %v174_v36 = vadd.f32 %v2831_v34, %v173_v35  ;;  %v3084_v37 = vpop.f32.mrb[1].mxu0 }
 0x21f   :  { %v176_v38 = vpop.f32.mrb[2].mxu0 }
 0x220   :  { %v3660_v39 = vpack.c.bf16 %v174_v36, %v174_v36  ;;  %v177_v40 = vadd.f32 %v2831_v34, %v176_v38  ;;  %v3085_v41 = vpop.f32.mrb[3].mxu0 }
 0x222   :  { %v3662_v42 = vpack.c.bf16 %v177_v40, %v177_v40  ;;  %182 = vrot.lane.b32.xlu0 %v3660_v39, %s3515_s3 }
 0x224   :  { %301 = vrot.lane.b32.xlu1 %v3662_v42, %s3515_s3 }
 0x226   :  { %529 = vrot.lane.b32.xlu0 %v3662_v42, %s3516_s28 }
 0x228   :  { %417 = vrot.lane.b32.xlu1 %v3660_v39, %s3516_s28 }
 0x22c   :  { %415 = vrot.lane.b32.xlu1 %v3660_v39, %s3517_s29 }
 0x230   :  { %527 = vrot.lane.b32.xlu1 %v3662_v42, %s3517_s29 }
 0x294   :  { %v183_v43 = vpop.permute.xlu0 %182 }
 0x295   :  { %v189_v44 = vsel %vm184_vm2, %v183_v43, 0 }
 0x296   :  { %3087 = vmatpush3.bf16.xpose.msra.mxu1 %v189_v44  ;;  %v302_v45 = vpop.permute.xlu1 %301 }
 0x297   :  { %3098 = vmatprep.subr.bf16.mxu1 %v3513_v15  ;;  %v307_v46 = vsel %vm184_vm2, %v302_v45, 0 }
 0x298   :  { %v530_v49 = vpop.permute.xlu0 %529 }
 0x299   :  { %v535_v51 = vsel %vm184_vm2, %v530_v49, 0 }
 0x29a   :  { %v418_v47 = vpop.permute.xlu1 %417 }
 0x29b   :  { %v423_v48 = vsel %vm184_vm2, %v418_v47, 0 }
 0x29d   :  { %3089 = vmatmul.mubr.msk.bf16.vlgmr.msra.gmra.mrb[0].mxu1 %vm184_vm2, %v3660_v39 }
 0x29e   :  { %3099 = vmatpush3.bf16.xpose.msra.mxu1 %v307_v46  ;;  %3100 = vmatprep.mubr.msk.bf16.mxu1 %vm3514_vm1, %v3513_v15  ;;  %v416_v50 = vpop.permute.xlu1 %415 }
 0x29f   :  { %3110 = vmatprep.subr.bf16.mxu1 %v3513_v15 }
 0x2a2   :  { %v528_v52 = vpop.permute.xlu1 %527 }
 0x2a5   :  { %3101 = vmatmul.mubr.msk.bf16.vlgmr.msra.gmra.mrb[4].mxu1 %vm184_vm2, %v3662_v42 }
 0x2a6   :  { %3111 = vmatpush3.bf16.xpose.msra.mxu1 %v423_v48  ;;  %3112 = vmatprep.mubr.msk.bf16.mxu1 %vm3514_vm1, %v3513_v15 }
 0x2a7   :  { %3122 = vmatprep.subr.bf16.mxu1 %v3513_v15 }
 0x2ad   :  { %3113 = vmatmul.mubr.msk.bf16.vlgmr.msra.gmra.mrb[8].mxu1 %vm184_vm2, %v416_v50 }
 0x2ae   :  { %3123 = vmatpush3.bf16.xpose.msra.mxu1 %v535_v51  ;;  %3124 = vmatprep.mubr.msk.bf16.mxu1 %vm3514_vm1, %v3513_v15 }
 0x2af   :  { %3134 = vmatprep.subr.bf16.mxu1 %v3513_v15 }
 0x2b5   :  { %3125 = vmatmul.mubr.msk.bf16.vlgmr.msra.gmra.mrb[12].mxu1 %vm184_vm2, %v528_v52 }
 0x2b6   :  { %3138 = vmatprep.mubr.msk.bf16.mxu1 %vm3514_vm1, %v3513_v15 }
 0x370   :  { %v225_v60 = vpop.f32.mrb[0].mxu1 }
 0x371   :  { %v231_v61 = vmul.f32 0.25, %v225_v60  ;;  %v3090_v62 = vpop.f32.mrb[1].mxu1 }
 0x372   :  { %v228_v63 = vpop.f32.mrb[2].mxu1  ;;  %v3369_v62 = vld [vmem:[%s4195_s6] sm:$0xff]  }
 0x373   :  { %v3091_v0 = vpop.f32.mrb[3].mxu1  ;;  %v236_v1 = vadd.f32 %v3701_v59, %v231_v61  ;;  %3135 = vmatpush3.bf16.msra.mxu1 %v3369_v62 }
 0x374   :  { %3136 = vmatprep.subr.bf16.mxu1 %v3513_v15 }
 0x375   :  { %v238_v3 = vsel %vm237_vm3, %v236_v1, -inf }
 0x376   :  { %239 = vmax.xlane.f32.xlu0 %v238_v3 }
 0x378   :  { %v343_v5 = vpop.f32.mrb[4].mxu1 }
 0x379   :  { %v349_v6 = vmul.f32 0.25, %v343_v5  ;;  %v3102_v7 = vpop.f32.mrb[5].mxu1 }
 0x37a   :  { %v346_v8 = vpop.f32.mrb[6].mxu1 }
 0x37b   :  { %v3103_v9 = vpop.f32.mrb[7].mxu1  ;;  %v354_v10 = vadd.f32 %v3705_v4, %v349_v6 }
 0x37d   :  { %v355_v11 = vsel %vm237_vm3, %v354_v10, -inf }
 0x37e   :  { %356 = vmax.xlane.f32.xlu1 %v355_v11 }
 0x380   :  { %v459_v12 = vpop.f32.mrb[8].mxu1 }
 0x381   :  { %v465_v13 = vmul.f32 0.25, %v459_v12  ;;  %v3114_v14 = vpop.f32.mrb[9].mxu1  ;;  %v3370_v12 = vld [vmem:[%s4195_s6 + $0x8] sm:$0xff]  }
 0x382   :  { %v462_v16 = vpop.f32.mrb[10].mxu1  ;;  %3137 = vmatpush3.bf16.msra.mxu1 %v3370_v12 }
 0x383   :  { %v3115_v17 = vpop.f32.mrb[11].mxu1  ;;  %v466_v18 = vadd.f32 %v465_v13, %v3701_v59  ;;  %3150 = vmatprep.subr.bf16.mxu1 %v3513_v15 }
 0x385   :  { %v467_v19 = vsel %vm237_vm3, %v466_v18, -inf }
 0x386   :  { %468 = vmax.xlane.f32.xlu0 %v467_v19 }
 0x388   :  { %v571_v20 = vpop.f32.mrb[12].mxu1 }
 0x389   :  { %v577_v21 = vmul.f32 0.25, %v571_v20  ;;  %v3126_v22 = vpop.f32.mrb[13].mxu1 }
 0x38a   :  { %v574_v23 = vpop.f32.mrb[14].mxu1 }
 0x38b   :  { %v3127_v24 = vpop.f32.mrb[15].mxu1  ;;  %v578_v25 = vadd.f32 %v577_v21, %v3705_v4 }
 0x38d   :  { %v579_v26 = vsel %vm237_vm3, %v578_v25, -inf }
 0x38e   :  { %580 = vmax.xlane.f32.xlu0 %v579_v26 }
 0x38f   :  { %365 = vrot.lane.b32.xlu1 %v3662_v42, %s3518_s1 }
 0x393   :  { %477 = vrot.lane.b32.xlu1 %v3660_v39, %s3519_s20 }
 0x397   :  { %589 = vrot.lane.b32.xlu1 %v3662_v42, %s3519_s20 }
 0x3a4   :  { %248 = vrot.lane.b32.xlu0 %v3660_v39, %s3518_s1 }
 0x403   :  { %v240_v27 = vpop.xlane.xlu0 %239 }
 0x404   :  { %v241_v28 = vsub.f32 %v236_v1, %v240_v27 }
 0x406   :  { %v242_v29 = vmul.f32 1.442695, %v241_v28 }
 0x408   :  { %3405 = vpow2.f32 %v242_v29 }
 0x40b   :  { %v357_v30 = vpop.xlane.xlu1 %356 }
 0x40c   :  { %v358_v35 = vsub.f32 %v354_v10, %v357_v30 }
 0x40e   :  { %v359_v37 = vmul.f32 1.442695, %v358_v35 }
 0x40f   :  { %v366_v44 = vpop.permute.xlu1 %365 }
 0x410   :  { %v371_v48 = vsel %vm253_vm4, %v366_v44, 0 }
 0x412   :  { %v3406_v43 = vpop.eup %3405 }
 0x413   :  { %v469_v33 = vpop.xlane.xlu0 %468  ;;  %v247_v46 = vpack.c.bf16 %v3406_v43, %v3406_v43  ;;  %v244_v49 = vsel %vm237_vm3, %v3406_v43, 0.0  ;;  %v478_v52 = vpop.permute.xlu1 %477 }
 0x414   :  { %v470_v34 = vsub.f32 %v466_v18, %v469_v33  ;;  %v483_v56 = vsel %vm253_vm4, %v478_v52, 0 }
 0x416   :  { %v471_v36 = vmul.f32 1.442695, %v470_v34 }
 0x417   :  { %v590_v57 = vpop.permute.xlu1 %589 }
 0x418   :  { %3407 = vpow2.f32 %v471_v36  ;;  %v595_v60 = vsel %vm253_vm4, %v590_v57, 0 }
 0x419   :  { %3409 = vpow2.f32 %v359_v37 }
 0x41b   :  { %v581_v38 = vpop.xlane.xlu0 %580 }
 0x41c   :  { %v582_v40 = vsub.f32 %v578_v25, %v581_v38 }
 0x41e   :  { %v583_v41 = vmul.f32 1.442695, %v582_v40  ;;  %v2843_v40 = vld [vmem:[%s4196_s7] ss:$0 sm:$0xff] }
 0x41f   :  { %v249_v42 = vpop.permute.xlu0 %248 }
 0x420   :  { %3411 = vpow2.f32 %v583_v41  ;;  %v255_v39 = vsel %vm253_vm4, %v249_v42, 0 }
 0x421   :  { %3093 = vmatpush3.bf16.msra.mxu0 %v255_v39 }
 0x422   :  { %v3408_v45 = vpop.eup %3407  ;;  %3104 = vmatprep.subr.bf16.mxu0 %v3513_v15 }
 0x423   :  { %v473_v47 = vsel %vm237_vm3, %v3408_v45, 0.0  ;;  %v3410_v50 = vpop.eup %3409  ;;  %v476_v58 = vpack.c.bf16 %v3408_v45, %v3408_v45 }
 0x424   :  { %474 = vadd.xlane.f32.xlu0 %v473_v47  ;;  %3095 = vmatmul.mubr.msk.bf16.vlgmr.msra.gmra.mrb[4].mxu0 %vm237_vm3, %v247_v46  ;;  %v361_v54 = vsel %vm237_vm3, %v3410_v50, 0.0  ;;  %v364_v55 = vpack.c.bf16 %v3410_v50, %v3410_v50 }
 0x425   :  { %3105 = vmatpush3.bf16.msra.mxu0 %v371_v48  ;;  %3106 = vmatprep.mubr.msk.bf16.mxu0 %vm3514_vm1, %v3513_v15 }
 0x426   :  { %3116 = vmatprep.subr.bf16.mxu0 %v3513_v15 }
 0x428   :  { %245 = vadd.xlane.f32.xlu0 %v244_v49 }
 0x42a   :  { %v3412_v51 = vpop.eup %3411 }
 0x42b   :  { %v585_v53 = vsel %vm237_vm3, %v3412_v51, 0.0  ;;  %v588_v61 = vpack.c.bf16 %v3412_v51, %v3412_v51 }
 0x42c   :  { %586 = vadd.xlane.f32.xlu1 %v585_v53  ;;  %362 = vadd.xlane.f32.xlu0 %v361_v54 }
 0x42d   :  { %3107 = vmatmul.mubr.msk.bf16.vlgmr.msra.gmra.mrb[8].mxu0 %vm237_vm3, %v364_v55 }
 0x42e   :  { %3117 = vmatpush3.bf16.msra.mxu0 %v483_v56  ;;  %3118 = vmatprep.mubr.msk.bf16.mxu0 %vm3514_vm1, %v3513_v15 }
 0x42f   :  { %3128 = vmatprep.subr.bf16.mxu0 %v3513_v15 }
 0x435   :  { %3119 = vmatmul.mubr.msk.bf16.vlgmr.msra.gmra.mrb[12].mxu0 %vm237_vm3, %v476_v58 }
 0x436   :  { %3129 = vmatpush3.bf16.msra.mxu0 %v595_v60  ;;  %3130 = vmatprep.mubr.msk.bf16.mxu0 %vm3514_vm1, %v3513_v15  ;;  %v3372_v60 = vld [vmem:[%s4201_s12 + $0x8] sm:$0xff]  }
 0x437   :  { %3142 = vmatprep.subr.bf16.mxu0 %v3513_v15 }
 0x43d   :  { %3131 = vmatmul.mubr.msk.bf16.vlgmr.msra.gmra.mrb[16].mxu0 %vm237_vm3, %v588_v61 }
 0x43e   :  { %3146 = vmatprep.mubr.msk.bf16.mxu0 %vm3514_vm1, %v3513_v15 }
 0x4b1   :  { %v475_v6 = vpop.xlane.xlu0 %474 }
 0x4b2   :  { %3413 = vrcp.f32 %v475_v6  ;;  %v2847_v6 = vld [vmem:[%s4197_s8] ss:$0 sm:$0xff] }
 0x4b5   :  { %v246_v25 = vpop.xlane.xlu0 %245 }
 0x4b9   :  { %v587_v8 = vpop.xlane.xlu1 %586  ;;  %v363_v26 = vpop.xlane.xlu0 %362 }
 0x4ba   :  { %3415 = vrcp.f32 %v587_v8 }
 0x4bb   :  { %3417 = vrcp.f32 %v246_v25 }
 0x4bc   :  { %v3414_v16 = vpop.eup %3413  ;;  %3419 = vrcp.f32 %v363_v26 }
 0x4c4   :  { %v3416_v17 = vpop.eup %3415 }
 0x4c5   :  { %v3418_v27 = vpop.eup %3417 }
 0x4c6   :  { %v3420_v28 = vpop.eup %3419 }
 0x4f7   :  { %v291_v63 = vpop.f32.mrb[4].mxu0 }
 0x4f8   :  { %v3096_v0 = vpop.f32.mrb[5].mxu0  ;;  %v298_v30 = vmul.f32 %v3418_v27, %v291_v63 }
 0x4f9   :  { %v294_v1 = vpop.f32.mrb[6].mxu0 }
 0x4fa   :  { %v3097_v2 = vpop.f32.mrb[7].mxu0 }
 0x500   :  { %v407_v3 = vpop.f32.mrb[8].mxu0 }
 0x501   :  { %v3108_v5 = vpop.f32.mrb[9].mxu0  ;;  %v414_v33 = vmul.f32 %v3420_v28, %v407_v3 }
 0x502   :  { %v410_v7 = vpop.f32.mrb[10].mxu0 }
 0x503   :  { %v3109_v9 = vpop.f32.mrb[11].mxu0 }
 0x508   :  { %v519_v10 = vpop.f32.mrb[12].mxu0 }
 0x509   :  { %v3120_v11 = vpop.f32.mrb[13].mxu0  ;;  %v526_v19 = vmul.f32 %v3414_v16, %v519_v10  ;;  %v2848_v10 = vld [vmem:[%s4198_s9] ss:$0 sm:$0xff] }
 0x50a   :  { %v522_v13 = vpop.f32.mrb[14].mxu0  ;;  %v3373_v16 = vld [vmem:[%s4203_s14] sm:$0xff]  }
 0x50b   :  { %v3121_v14 = vpop.f32.mrb[15].mxu0 }
 0x510   :  { %v631_v18 = vpop.f32.mrb[16].mxu0 }
 0x511   :  { %v638_v20 = vmul.f32 %v3416_v17, %v631_v18  ;;  %v3132_v21 = vpop.f32.mrb[17].mxu0  ;;  %v3374_v17 = vld [vmem:[%s4203_s14 + $0x8] sm:$0xff]   ;;  %v3375_v18 = vld [vmem:[%s4203_s14 + $0x10] sm:$0xff]  }
 0x512   :  { %v634_v22 = vpop.f32.mrb[18].mxu0 }
 0x513   :  { %v3352_v23 = vpack.i.bf16 %v638_v20, %v526_v19  ;;  %v3133_v24 = vpop.f32.mrb[19].mxu0  ;;  %v3376_v19 = vld [vmem:[%s4203_s14 + $0x18] sm:$0xff]   ;;  %v2849_v20 = vld [vmem:[%s4202_s13] ss:$0 sm:$0xff] }
 0x515   :  { %3353 = vrot.lane.b32.xlu0 %v3352_v23, %s3520_s24 }
 0x587   :  { %v3354_v29 = vpop.permute.xlu0 %3353 }
 0x588   :  { %v3356_v34 = vunpack.i.h.bf16 %v3354_v29  ;;  %v3355_v35 = vunpack.i.l.bf16 %v3354_v29 }
 0x58a   :  { %v648_v36 = vsel %vm184_vm2, %v414_v33, %v3356_v34  ;;  %v643_v37 = vsel %vm184_vm2, %v298_v30, %v3355_v35 }
 0x58b   :  { %v649_v38 = vpack.c.bf16 %v648_v36, %v643_v37 }
 0x58d   :  { %3139 = vmatmul.mubr.msk.bf16.vlgmr.msra.gmra.mrb[16].mxu1 %vm65_vm0, %v649_v38 }
 0x58e   :  { %3158 = vmatprep.mubr.msk.bf16.mxu1 %vm3514_vm1, %v3513_v15  ;;  %3151 = vmatpush3.bf16.msra.mxu1 %v3373_v16  ;;  %v2859_v16 = vld [vmem:[%s4199_s10] ss:$0 sm:$0xff] }
 0x58f   :  { %3152 = vmatprep.subr.bf16.mxu1 %v3513_v15 }
 0x592   :  { %3153 = vmatpush3.bf16.msra.mxu1 %v3374_v17 }
 0x593   :  { %3154 = vmatprep.subr.bf16.mxu1 %v3513_v15 }
 0x596   :  { %3155 = vmatpush3.bf16.msra.mxu1 %v3375_v18 }
 0x597   :  { %3156 = vmatprep.subr.bf16.mxu1 %v3513_v15 }
 0x59a   :  { %3157 = vmatpush3.bf16.msra.mxu1 %v3376_v19 }
 0x59b   :  { %3176 = vmatprep.subr.bf16.mxu1 %v3513_v15 }
 0x660   :  { %v710_v41 = vpop.f32.mrb[16].mxu1 }
 0x661   :  { %v711_v43 = vadd.f32 %v2843_v40, %v710_v41  ;;  %v3140_v42 = vpop.f32.mrb[17].mxu1 }
 0x662   :  { %v713_v39 = vpop.f32.mrb[18].mxu1 }
 0x663   :  { %v714_v44 = vadd.f32 %v2843_v40, %v713_v39  ;;  %v3141_v45 = vpop.f32.mrb[19].mxu1  ;;  %v717_v46 = vadd.f32 %v711_v43, %v3648_v31 }
 0x665   :  { %v721_v47 = vsel %vm65_vm0, %v717_v46, 0.0  ;;  %v718_v48 = vadd.f32 %v714_v44, %v3650_v32  ;;  %v3371_v32 = vld [vmem:[%s4201_s12] sm:$0xff]  }
 0x666   :  { %722 = vadd.xlane.f32.xlu1 %v721_v47  ;;  %3143 = vmatpush3.bf16.msra.mxu0 %v3371_v32 }
 0x667   :  { %v724_v49 = vsel %vm65_vm0, %v718_v48, 0.0  ;;  %3144 = vmatprep.subr.bf16.mxu0 %v3513_v15 }
 0x66a   :  { %725 = vadd.xlane.f32.xlu1 %v724_v49  ;;  %3145 = vmatpush3.bf16.msra.mxu0 %v3372_v60 }
 0x66b   :  { %3162 = vmatprep.subr.bf16.mxu0 %v3513_v15 }
 0x6f3   :  { %v723_v50 = vpop.xlane.xlu1 %722 }
 0x6f4   :  { %v727_v51 = vmul.f32 0.03125, %v723_v50 }
 0x6f6   :  { %v729_v52 = vsub.f32 %v717_v46, %v727_v51 }
 0x6f7   :  { %v726_v53 = vpop.xlane.xlu1 %725 }
 0x6f8   :  { %v728_v54 = vmul.f32 0.03125, %v726_v53  ;;  %v731_v55 = vmul.f32 %v729_v52, %v729_v52 }
 0x6fa   :  { %v730_v56 = vsub.f32 %v718_v48, %v728_v54  ;;  %v733_v57 = vsel %vm65_vm0, %v731_v55, 0.0  ;;  %v2853_v48 = vld [vmem:[%s4204_s15] ss:$0 sm:$0xff] }
 0x6fb   :  { %734 = vadd.xlane.f32.xlu1 %v733_v57 }
 0x6fc   :  { %v732_v58 = vmul.f32 %v730_v56, %v730_v56 }
 0x6fe   :  { %v736_v31 = vsel %vm65_vm0, %v732_v58, 0.0 }
 0x6ff   :  { %737 = vadd.xlane.f32.xlu1 %v736_v31 }
 0x788   :  { %v735_v61 = vpop.xlane.xlu1 %734 }
 0x789   :  { %v739_v62 = vmul.f32 0.03125, %v735_v61 }
 0x78b   :  { %v741_v63 = vadd.f32 1e-12, %v739_v62 }
 0x78c   :  { %v738_v0 = vpop.xlane.xlu1 %737 }
 0x78d   :  { %3421 = vrsqrt.f32 %v741_v63  ;;  %v740_v1 = vmul.f32 0.03125, %v738_v0 }
 0x78f   :  { %v742_v2 = vadd.f32 1e-12, %v740_v1 }
 0x791   :  { %3423 = vrsqrt.f32 %v742_v2 }
 0x797   :  { %v3422_v3 = vpop.eup %3421 }
 0x798   :  { %v745_v5 = vmul.f32 %v3422_v3, %v729_v52 }
 0x79a   :  { %v753_v8 = vmul.f32 %v2847_v6, %v745_v5  ;;  %v3377_v5 = vld [vmem:[%s4193_s4 + $0x10] sm:$0xff]  }
 0x79b   :  { %v3424_v7 = vpop.eup %3423 }
 0x79c   :  { %v746_v9 = vmul.f32 %v3424_v7, %v730_v56  ;;  %v761_v12 = vadd.f32 %v2848_v10, %v753_v8 }
 0x79e   :  { %v754_v11 = vmul.f32 %v2847_v6, %v746_v9  ;;  %v3378_v6 = vld [vmem:[%s4193_s4 + $0x18] sm:$0xff]  }
 0x7a0   :  { %v762_v13 = vadd.f32 %v2848_v10, %v754_v11 }
 0x7a2   :  { %v763_v14 = vpack.c.bf16 %v762_v13, %v761_v12 }
 0x7a4   :  { %3147 = vmatmul.mubr.msk.bf16.vlgmr.msra.gmra.mrb[20].mxu0 %vm65_vm0, %v763_v14 }
 0x7a5   :  { %3166 = vmatprep.mubr.msk.bf16.mxu0 %vm3514_vm1, %v3513_v15  ;;  %3163 = vmatpush3.bf16.msra.mxu0 %v3377_v5 }
 0x7a6   :  { %3164 = vmatprep.subr.bf16.mxu0 %v3513_v15 }
 0x7a9   :  { %3165 = vmatpush3.bf16.msra.mxu0 %v3378_v6 }
 0x7aa   :  { %3170 = vmatprep.subr.bf16.mxu0 %v3513_v15 }
 0x877   :  { %v824_v21 = vpop.f32.mrb[20].mxu0 }
 0x878   :  { %v825_v22 = vadd.f32 %v2849_v20, %v824_v21  ;;  %v3148_v23 = vpop.f32.mrb[21].mxu0 }
 0x879   :  { %v827_v24 = vpop.f32.mrb[22].mxu0 }
 0x87a   :  { %v833_v25 = vmul.f32 0.044715, %v825_v22  ;;  %v828_v26 = vadd.f32 %v2849_v20, %v827_v24  ;;  %v3149_v27 = vpop.f32.mrb[23].mxu0  ;;  %v831_v42 = vmul.f32 0.5, %v825_v22  ;;  %v2860_v20 = vld [vmem:[%s4200_s11] ss:$0 sm:$0xff] }
 0x87c   :  { %v835_v28 = vmul.f32 %v833_v25, %v825_v22  ;;  %v834_v29 = vmul.f32 0.044715, %v828_v26  ;;  %v832_v39 = vmul.f32 0.5, %v828_v26  ;;  %v2866_v25 = vld [vmem:[%s4194_s5 + $0x1] ss:$0 sm:$0xff] }
 0x87e   :  { %v837_v30 = vmul.f32 %v835_v28, %v825_v22  ;;  %v836_v33 = vmul.f32 %v834_v29, %v828_v26 }
 0x880   :  { %v839_v34 = vadd.f32 %v837_v30, %v825_v22  ;;  %v838_v35 = vmul.f32 %v836_v33, %v828_v26 }
 0x882   :  { %v841_v36 = vmul.f32 0.7978846, %v839_v34  ;;  %v840_v37 = vadd.f32 %v838_v35, %v828_v26 }
 0x884   :  { %3425 = vtanh.f32 %v841_v36  ;;  %v842_v38 = vmul.f32 0.7978846, %v840_v37 }
 0x886   :  { %3427 = vtanh.f32 %v842_v38 }
 0x88e   :  { %v3426_v40 = vpop.eup %3425 }
 0x88f   :  { %v845_v41 = vadd.f32 1.0, %v3426_v40 }
 0x890   :  { %v3428_v43 = vpop.eup %3427 }
 0x891   :  { %v846_v44 = vadd.f32 1.0, %v3428_v43  ;;  %v847_v45 = vmul.f32 %v845_v41, %v831_v42 }
 0x893   :  { %v848_v46 = vmul.f32 %v846_v44, %v832_v39 }
 0x895   :  { %v849_v47 = vpack.c.bf16 %v848_v46, %v847_v45 }
 0x897   :  { %3159 = vmatmul.mubr.msk.bf16.vlgmr.msra.gmra.mrb[20].mxu1 %vm889_vm5, %v849_v47 }
 0x898   :  { %3178 = vmatprep.mubr.msk.bf16.mxu1 %vm3514_vm1, %v3513_v15 }
 0x96a   :  { %v927_v49 = vpop.f32.mrb[20].mxu1 }
 0x96b   :  { %v928_v50 = vadd.f32 %v2853_v48, %v927_v49  ;;  %v3160_v51 = vpop.f32.mrb[21].mxu1 }
 0x96c   :  { %v930_v52 = vpop.f32.mrb[22].mxu1 }
 0x96d   :  { %v931_v53 = vadd.f32 %v2853_v48, %v930_v52  ;;  %v3161_v54 = vpop.f32.mrb[23].mxu1  ;;  %v934_v55 = vadd.f32 %v928_v50, %v761_v12 }
 0x96f   :  { %v938_v56 = vsel %vm65_vm0, %v934_v55, 0.0  ;;  %v935_v57 = vadd.f32 %v931_v53, %v762_v13 }
 0x970   :  { %939 = vadd.xlane.f32.xlu1 %v938_v56 }
 0x971   :  { %v941_v58 = vsel %vm65_vm0, %v935_v57, 0.0 }
 0x974   :  { %942 = vadd.xlane.f32.xlu1 %v941_v58 }
 0x9fd   :  { %v940_v31 = vpop.xlane.xlu1 %939 }
 0x9fe   :  { %v944_v32 = vmul.f32 0.03125, %v940_v31 }
 0xa00   :  { %v946_v60 = vsub.f32 %v934_v55, %v944_v32 }
 0xa01   :  { %v943_v61 = vpop.xlane.xlu1 %942 }
 0xa02   :  { %v945_v62 = vmul.f32 0.03125, %v943_v61  ;;  %v948_v63 = vmul.f32 %v946_v60, %v946_v60 }
 0xa04   :  { %v947_v0 = vsub.f32 %v935_v57, %v945_v62  ;;  %v950_v1 = vsel %vm65_vm0, %v948_v63, 0.0 }
 0xa05   :  { %951 = vadd.xlane.f32.xlu0 %v950_v1 }
 0xa06   :  { %v949_v2 = vmul.f32 %v947_v0, %v947_v0 }
 0xa08   :  { %v953_v3 = vsel %vm65_vm0, %v949_v2, 0.0 }
 0xa09   :  { %954 = vadd.xlane.f32.xlu1 %v953_v3 }
 0xa92   :  { %v952_v7 = vpop.xlane.xlu0 %951 }
 0xa93   :  { %v956_v8 = vmul.f32 0.03125, %v952_v7 }
 0xa95   :  { %v958_v9 = vadd.f32 1e-12, %v956_v8 }
 0xa96   :  { %v955_v10 = vpop.xlane.xlu1 %954 }
 0xa97   :  { %3429 = vrsqrt.f32 %v958_v9  ;;  %v957_v11 = vmul.f32 0.03125, %v955_v10 }
 0xa99   :  { %v959_v12 = vadd.f32 1e-12, %v957_v11 }
 0xa9b   :  { %3431 = vrsqrt.f32 %v959_v12 }
 0xaa1   :  { %v3430_v13 = vpop.eup %3429 }
 0xaa2   :  { %v962_v14 = vmul.f32 %v3430_v13, %v946_v60 }
 0xaa4   :  { %v970_v18 = vmul.f32 %v2859_v16, %v962_v14 }
 0xaa5   :  { %v3432_v17 = vpop.eup %3431 }
 0xaa6   :  { %v963_v19 = vmul.f32 %v3432_v17, %v947_v0  ;;  %v3828_v22 = vadd.f32 %v2860_v20, %v970_v18 }
 0xaa8   :  { %v971_v21 = vmul.f32 %v2859_v16, %v963_v19 }
 0xaaa   :  { %v3830_v23 = vadd.f32 %v2860_v20, %v971_v21 }
 0xaac   :  { %v980_v24 = vpack.c.bf16 %v3830_v23, %v3828_v22 }
 0xaae   :  { %3167 = vmatmul.mubr.msk.bf16.vlgmr.msra.gmra.mrb[24].mxu0 %vm65_vm0, %v980_v24 }
 0xaaf   :  { %3172 = vmatprep.mubr.msk.bf16.mxu0 %vm3514_vm1, %v3513_v15 }
 0xb81   :  { %v1043_v26 = vpop.f32.mrb[24].mxu0 }
 0xb82   :  { %v1044_v27 = vadd.f32 %v2866_v25, %v1043_v26  ;;  %v3168_v28 = vpop.f32.mrb[25].mxu0 }
 0xb83   :  { %v1046_v29 = vpop.f32.mrb[26].mxu0 }
 0xb84   :  { %v1050_v30 = vpack.c.bf16 %v1044_v27, %v1044_v27  ;;  %v1047_v33 = vadd.f32 %v2866_v25, %v1046_v29  ;;  %v3169_v34 = vpop.f32.mrb[27].mxu0 }
 0xb86   :  { %1274 = vrot.lane.b32.xlu0 %v1050_v30, %s3517_s29  ;;  %1052 = vrot.lane.b32.xlu1 %v1050_v30, %s3515_s3  ;;  %v3842_v35 = vpack.c.bf16 %v1047_v33, %v1047_v33 }
 0xb8a   :  { %1164 = vrot.lane.b32.xlu1 %v3842_v35, %s3515_s3 }
 0xb8e   :  { %1276 = vrot.lane.b32.xlu1 %v1050_v30, %s3516_s28 }
 0xb92   :  { %1388 = vrot.lane.b32.xlu1 %v3842_v35, %s3516_s28 }
 0xb96   :  { %1386 = vrot.lane.b32.xlu1 %v3842_v35, %s3517_s29 }
 0xb9a   :  { %1112 = vrot.lane.b32.xlu1 %v1050_v30, %s3518_s1 }
 0xbf8   :  { %v1053_v36 = vpop.permute.xlu1 %1052  ;;  %v1275_v46 = vpop.permute.xlu0 %1274 }
 0xbf9   :  { %v1058_v37 = vsel %vm184_vm2, %v1053_v36, 0 }
 0xbfa   :  { %3171 = vmatpush3.bf16.xpose.msra.mxu0 %v1058_v37 }
 0xbfb   :  { %3182 = vmatprep.subr.bf16.mxu0 %v3513_v15 }
 0xbfc   :  { %v1165_v38 = vpop.permute.xlu1 %1164 }
 0xbfd   :  { %v1170_v41 = vsel %vm184_vm2, %v1165_v38, 0 }
 0xc00   :  { %v1277_v40 = vpop.permute.xlu1 %1276 }
 0xc01   :  { %3173 = vmatmul.mubr.msk.bf16.vlgmr.msra.gmra.mrb[28].mxu0 %vm184_vm2, %v1050_v30  ;;  %v1282_v39 = vsel %vm184_vm2, %v1277_v40, 0 }
 0xc02   :  { %3183 = vmatpush3.bf16.xpose.msra.mxu0 %v1170_v41  ;;  %3184 = vmatprep.mubr.msk.bf16.mxu0 %vm3514_vm1, %v3513_v15 }
 0xc03   :  { %3194 = vmatprep.subr.bf16.mxu0 %v3513_v15 }
 0xc04   :  { %v1389_v43 = vpop.permute.xlu1 %1388 }
 0xc05   :  { %v1394_v47 = vsel %vm184_vm2, %v1389_v43, 0 }
 0xc08   :  { %v1387_v42 = vpop.permute.xlu1 %1386 }
 0xc09   :  { %3185 = vmatmul.mubr.msk.bf16.vlgmr.msra.gmra.mrb[32].mxu0 %vm184_vm2, %v3842_v35 }
 0xc0a   :  { %3195 = vmatpush3.bf16.xpose.msra.mxu0 %v1282_v39  ;;  %3196 = vmatprep.mubr.msk.bf16.mxu0 %vm3514_vm1, %v3513_v15 }
 0xc0b   :  { %3206 = vmatprep.subr.bf16.mxu0 %v3513_v15 }
 0xc0c   :  { %v1113_v44 = vpop.permute.xlu1 %1112 }
 0xc0d   :  { %v1118_v45 = vsel %vm253_vm4, %v1113_v44, 0 }
 0xc0e   :  { %3177 = vmatpush3.bf16.msra.mxu1 %v1118_v45 }
 0xc0f   :  { %3188 = vmatprep.subr.bf16.mxu1 %v3513_v15 }
 0xc11   :  { %3197 = vmatmul.mubr.msk.bf16.vlgmr.msra.gmra.mrb[36].mxu0 %vm184_vm2, %v1275_v46 }
 0xc12   :  { %3207 = vmatpush3.bf16.xpose.msra.mxu0 %v1394_v47  ;;  %3208 = vmatprep.mubr.msk.bf16.mxu0 %vm3514_vm1, %v3513_v15  ;;  %v3379_v47 = vld [vmem:[%s4195_s6 + $0x10] sm:$0xff]  }
 0xc13   :  { %3218 = vmatprep.subr.bf16.mxu0 %v3513_v15 }
 0xc19   :  { %3209 = vmatmul.mubr.msk.bf16.vlgmr.msra.gmra.mrb[40].mxu0 %vm184_vm2, %v1387_v42 }
 0xc1a   :  { %3222 = vmatprep.mubr.msk.bf16.mxu0 %vm3514_vm1, %v3513_v15  ;;  %3219 = vmatpush3.bf16.msra.mxu0 %v3379_v47 }
 0xc1b   :  { %3220 = vmatprep.subr.bf16.mxu0 %v3513_v15 }
 0xcd4   :  { %v1094_v48 = vpop.f32.mrb[28].mxu0 }
 0xcd5   :  { %v1100_v49 = vmul.f32 0.25, %v1094_v48  ;;  %v3174_v50 = vpop.f32.mrb[29].mxu0 }
 0xcd6   :  { %v1097_v51 = vpop.f32.mrb[30].mxu0 }
 0xcd7   :  { %v3175_v52 = vpop.f32.mrb[31].mxu0  ;;  %v1101_v53 = vadd.f32 %v1100_v49, %v3701_v59 }
 0xcd9   :  { %v1102_v54 = vsel %vm237_vm3, %v1101_v53, -inf }
 0xcda   :  { %1103 = vmax.xlane.f32.xlu1 %v1102_v54 }
 0xcdc   :  { %v1206_v55 = vpop.f32.mrb[32].mxu0 }
 0xcdd   :  { %v1212_v56 = vmul.f32 0.25, %v1206_v55  ;;  %v3186_v57 = vpop.f32.mrb[33].mxu0 }
 0xcde   :  { %v1209_v58 = vpop.f32.mrb[34].mxu0 }
 0xcdf   :  { %v3187_v31 = vpop.f32.mrb[35].mxu0  ;;  %v1213_v32 = vadd.f32 %v1212_v56, %v3705_v4 }
 0xce1   :  { %v1214_v60 = vsel %vm237_vm3, %v1213_v32, -inf }
 0xce2   :  { %1215 = vmax.xlane.f32.xlu0 %v1214_v60 }
 0xce4   :  { %v1318_v61 = vpop.f32.mrb[36].mxu0 }
 0xce5   :  { %v3198_v62 = vpop.f32.mrb[37].mxu0  ;;  %v1324_v6 = vmul.f32 0.25, %v1318_v61 }
 0xce6   :  { %v1321_v63 = vpop.f32.mrb[38].mxu0 }
 0xce7   :  { %v3199_v0 = vpop.f32.mrb[39].mxu0  ;;  %v1325_v8 = vadd.f32 %v1324_v6, %v3701_v59 }
 0xce9   :  { %v1326_v9 = vsel %vm237_vm3, %v1325_v8, -inf }
 0xceb   :  { %1336 = vrot.lane.b32.xlu1 %v1050_v30, %s3519_s20 }
 0xcec   :  { %v1430_v1 = vpop.f32.mrb[40].mxu0 }
 0xced   :  { %v3210_v2 = vpop.f32.mrb[41].mxu0  ;;  %v1436_v7 = vmul.f32 0.25, %v1430_v1 }
 0xcee   :  { %v1433_v3 = vpop.f32.mrb[42].mxu0 }
 0xcef   :  { %v3211_v5 = vpop.f32.mrb[43].mxu0  ;;  %v1437_v10 = vadd.f32 %v1436_v7, %v3705_v4 }
 0xcf1   :  { %v1438_v11 = vsel %vm237_vm3, %v1437_v10, -inf }
 0xcf8   :  { %1224 = vrot.lane.b32.xlu0 %v3842_v35, %s3518_s1 }
 0xd0f   :  { %1327 = vmax.xlane.f32.xlu1 %v1326_v9 }
 0xd13   :  { %1439 = vmax.xlane.f32.xlu1 %v1438_v11 }
 0xd24   :  { %1448 = vrot.lane.b32.xlu1 %v3842_v35, %s3519_s20 }
 0xd67   :  { %v1104_v12 = vpop.xlane.xlu1 %1103 }
 0xd68   :  { %v1105_v13 = vsub.f32 %v1101_v53, %v1104_v12 }
 0xd6a   :  { %v1106_v14 = vmul.f32 1.442695, %v1105_v13 }
 0xd6b   :  { %v1337_v26 = vpop.permute.xlu1 %1336 }
 0xd6c   :  { %3433 = vpow2.f32 %v1106_v14  ;;  %v1342_v28 = vsel %vm253_vm4, %v1337_v26, 0 }
 0xd6f   :  { %v1216_v16 = vpop.xlane.xlu0 %1215 }
 0xd70   :  { %v1217_v17 = vsub.f32 %v1213_v32, %v1216_v16  ;;  %v3380_v32 = vld [vmem:[%s4195_s6 + $0x18] sm:$0xff]  }
 0xd71   :  { %3221 = vmatpush3.bf16.msra.mxu0 %v3380_v32 }
 0xd72   :  { %v1218_v18 = vmul.f32 1.442695, %v1217_v17  ;;  %3234 = vmatprep.subr.bf16.mxu0 %v3513_v15 }
 0xd73   :  { %v1225_v20 = vpop.permute.xlu0 %1224 }
 0xd74   :  { %3435 = vpow2.f32 %v1218_v18  ;;  %v1230_v24 = vsel %vm253_vm4, %v1225_v20, 0 }
 0xd76   :  { %v3434_v19 = vpop.eup %3433 }
 0xd77   :  { %v1111_v21 = vpack.c.bf16 %v3434_v19, %v3434_v19  ;;  %v1108_v39 = vsel %vm237_vm3, %v3434_v19, 0.0 }
 0xd79   :  { %3179 = vmatmul.mubr.msk.bf16.vlgmr.msra.gmra.mrb[24].mxu1 %vm237_vm3, %v1111_v21  ;;  %v2883_v21 = vld [vmem:[%s4196_s7 + $0x1] ss:$0 sm:$0xff] }
 0xd7a   :  { %3189 = vmatpush3.bf16.msra.mxu1 %v1230_v24  ;;  %3190 = vmatprep.mubr.msk.bf16.mxu1 %vm3514_vm1, %v3513_v15 }
 0xd7b   :  { %3200 = vmatprep.subr.bf16.mxu1 %v3513_v15 }
 0xd7e   :  { %v3436_v25 = vpop.eup %3435 }
 0xd7f   :  { %v1223_v27 = vpack.c.bf16 %v3436_v25, %v3436_v25  ;;  %v1220_v45 = vsel %vm237_vm3, %v3436_v25, 0.0 }
 0xd81   :  { %3191 = vmatmul.mubr.msk.bf16.vlgmr.msra.gmra.mrb[28].mxu1 %vm237_vm3, %v1223_v27 }
 0xd82   :  { %3201 = vmatpush3.bf16.msra.mxu1 %v1342_v28  ;;  %3202 = vmatprep.mubr.msk.bf16.mxu1 %vm3514_vm1, %v3513_v15 }
 0xd83   :  { %3212 = vmatprep.subr.bf16.mxu1 %v3513_v15 }
 0xd9c   :  { %v1328_v29 = vpop.xlane.xlu1 %1327 }
 0xd9d   :  { %v1329_v30 = vsub.f32 %v1325_v8, %v1328_v29 }
 0xd9f   :  { %v1330_v33 = vmul.f32 1.442695, %v1329_v30 }
 0xda0   :  { %v1440_v34 = vpop.xlane.xlu1 %1439 }
 0xda1   :  { %3437 = vpow2.f32 %v1330_v33  ;;  %v1441_v35 = vsub.f32 %v1437_v10, %v1440_v34 }
 0xda3   :  { %v1442_v36 = vmul.f32 1.442695, %v1441_v35 }
 0xda4   :  { %v1449_v38 = vpop.permute.xlu1 %1448 }
 0xda5   :  { %3439 = vpow2.f32 %v1442_v36  ;;  %v1454_v43 = vsel %vm253_vm4, %v1449_v38, 0 }
 0xdab   :  { %v3438_v37 = vpop.eup %3437 }
 0xdac   :  { %v1332_v40 = vsel %vm237_vm3, %v3438_v37, 0.0  ;;  %v1335_v41 = vpack.c.bf16 %v3438_v37, %v3438_v37 }
 0xdad   :  { %1333 = vadd.xlane.f32.xlu0 %v1332_v40 }
 0xdae   :  { %3203 = vmatmul.mubr.msk.bf16.vlgmr.msra.gmra.mrb[32].mxu1 %vm237_vm3, %v1335_v41 }
 0xdaf   :  { %v3440_v42 = vpop.eup %3439  ;;  %3213 = vmatpush3.bf16.msra.mxu1 %v1454_v43  ;;  %3214 = vmatprep.mubr.msk.bf16.mxu1 %vm3514_vm1, %v3513_v15 }
 0xdb0   :  { %v1444_v44 = vsel %vm237_vm3, %v3440_v42, 0.0  ;;  %3226 = vmatprep.subr.bf16.mxu1 %v3513_v15  ;;  %v1447_v46 = vpack.c.bf16 %v3440_v42, %v3440_v42 }
 0xdb1   :  { %1109 = vadd.xlane.f32.xlu0 %v1108_v39  ;;  %1445 = vadd.xlane.f32.xlu1 %v1444_v44 }
 0xdb5   :  { %1221 = vadd.xlane.f32.xlu0 %v1220_v45  ;;  %v3382_v45 = vld [vmem:[%s4201_s12 + $0x18] sm:$0xff]  }
 0xdb6   :  { %3215 = vmatmul.mubr.msk.bf16.vlgmr.msra.gmra.mrb[36].mxu1 %vm237_vm3, %v1447_v46 }
 0xdb7   :  { %3230 = vmatprep.mubr.msk.bf16.mxu1 %vm3514_vm1, %v3513_v15 }
 0xe3a   :  { %v1334_v56 = vpop.xlane.xlu0 %1333 }
 0xe3b   :  { %3441 = vrcp.f32 %v1334_v56 }
 0xe3e   :  { %v1446_v57 = vpop.xlane.xlu1 %1445  ;;  %v1110_v8 = vpop.xlane.xlu0 %1109 }
 0xe3f   :  { %3443 = vrcp.f32 %v1446_v57 }
 0xe40   :  { %3445 = vrcp.f32 %v1110_v8 }
 0xe42   :  { %v1222_v9 = vpop.xlane.xlu0 %1221 }
 0xe43   :  { %3447 = vrcp.f32 %v1222_v9 }
 0xe45   :  { %v3442_v62 = vpop.eup %3441 }
 0xe49   :  { %v3444_v63 = vpop.eup %3443 }
 0xe4a   :  { %v3446_v10 = vpop.eup %3445 }
 0xe4c   :  { %v1154_v48 = vpop.f32.mrb[24].mxu1 }
 0xe4d   :  { %v3180_v49 = vpop.f32.mrb[25].mxu1  ;;  %v3448_v11 = vpop.eup %3447  ;;  %v1161_v13 = vmul.f32 %v3446_v10, %v1154_v48 }
 0xe4e   :  { %v1157_v50 = vpop.f32.mrb[26].mxu1 }
 0xe4f   :  { %v3181_v51 = vpop.f32.mrb[27].mxu1 }
 0xe54   :  { %v1266_v52 = vpop.f32.mrb[28].mxu1 }
 0xe55   :  { %v3192_v53 = vpop.f32.mrb[29].mxu1  ;;  %v1273_v14 = vmul.f32 %v3448_v11, %v1266_v52 }
 0xe56   :  { %v1269_v54 = vpop.f32.mrb[30].mxu1 }
 0xe57   :  { %v3193_v55 = vpop.f32.mrb[31].mxu1  ;;  %v2889_v54 = vld [vmem:[%s4197_s8 + $0x1] ss:$0 sm:$0xff] }
 0xe81   :  { %v1378_v58 = vpop.f32.mrb[32].mxu1 }
 0xe82   :  { %v3204_v31 = vpop.f32.mrb[33].mxu1  ;;  %v1385_v1 = vmul.f32 %v3442_v62, %v1378_v58  ;;  %v2890_v58 = vld [vmem:[%s4198_s9 + $0x1] ss:$0 sm:$0xff] }
 0xe83   :  { %v1381_v60 = vpop.f32.mrb[34].mxu1  ;;  %v3383_v62 = vld [vmem:[%s4203_s14 + $0x20] sm:$0xff]  }
 0xe84   :  { %v3205_v61 = vpop.f32.mrb[35].mxu1 }
 0xe89   :  { %v1490_v0 = vpop.f32.mrb[36].mxu1 }
 0xe8a   :  { %v1497_v2 = vmul.f32 %v3444_v63, %v1490_v0  ;;  %v3216_v3 = vpop.f32.mrb[37].mxu1  ;;  %v3384_v63 = vld [vmem:[%s4203_s14 + $0x28] sm:$0xff]   ;;  %v3385_v0 = vld [vmem:[%s4203_s14 + $0x30] sm:$0xff]  }
 0xe8b   :  { %v1493_v5 = vpop.f32.mrb[38].mxu1 }
 0xe8c   :  { %v3357_v6 = vpack.i.bf16 %v1497_v2, %v1385_v1  ;;  %v3217_v7 = vpop.f32.mrb[39].mxu1  ;;  %v3386_v1 = vld [vmem:[%s4203_s14 + $0x38] sm:$0xff]   ;;  %v2896_v2 = vld [vmem:[%s4202_s13 + $0x1] ss:$0 sm:$0xff] }
 0xe8e   :  { %3358 = vrot.lane.b32.xlu1 %v3357_v6, %s3520_s24 }
 0xf00   :  { %v3359_v12 = vpop.permute.xlu1 %3358 }
 0xf01   :  { %v3361_v16 = vunpack.i.h.bf16 %v3359_v12  ;;  %v3360_v17 = vunpack.i.l.bf16 %v3359_v12 }
 0xf03   :  { %v1507_v18 = vsel %vm184_vm2, %v1273_v14, %v3361_v16  ;;  %v1502_v19 = vsel %vm184_vm2, %v1161_v13, %v3360_v17 }
 0xf04   :  { %v1508_v20 = vpack.c.bf16 %v1507_v18, %v1502_v19 }
 0xf06   :  { %3223 = vmatmul.mubr.msk.bf16.vlgmr.msra.gmra.mrb[44].mxu0 %vm65_vm0, %v1508_v20 }
 0xf07   :  { %3242 = vmatprep.mubr.msk.bf16.mxu0 %vm3514_vm1, %v3513_v15  ;;  %3235 = vmatpush3.bf16.msra.mxu0 %v3383_v62  ;;  %v2917_v62 = vld [vmem:[%s4199_s10 + $0x1] ss:$0 sm:$0xff] }
 0xf08   :  { %3236 = vmatprep.subr.bf16.mxu0 %v3513_v15 }
 0xf0b   :  { %3237 = vmatpush3.bf16.msra.mxu0 %v3384_v63 }
 0xf0c   :  { %3238 = vmatprep.subr.bf16.mxu0 %v3513_v15 }
 0xf0f   :  { %3239 = vmatpush3.bf16.msra.mxu0 %v3385_v0 }
 0xf10   :  { %3240 = vmatprep.subr.bf16.mxu0 %v3513_v15 }
 0xf13   :  { %3241 = vmatpush3.bf16.msra.mxu0 %v3386_v1 }
 0xf14   :  { %3260 = vmatprep.subr.bf16.mxu0 %v3513_v15 }
 0xfd9   :  { %v1571_v24 = vpop.f32.mrb[44].mxu0 }
 0xfda   :  { %v1572_v25 = vadd.f32 %v2883_v21, %v1571_v24  ;;  %v3224_v26 = vpop.f32.mrb[45].mxu0 }
 0xfdb   :  { %v1574_v27 = vpop.f32.mrb[46].mxu0 }
 0xfdc   :  { %v1575_v28 = vadd.f32 %v2883_v21, %v1574_v27  ;;  %v3225_v29 = vpop.f32.mrb[47].mxu0  ;;  %v1578_v30 = vadd.f32 %v1572_v25, %v3828_v22 }
 0xfde   :  { %v1584_v33 = vsel %vm65_vm0, %v1578_v30, 0.0  ;;  %v1579_v34 = vadd.f32 %v1575_v28, %v3830_v23  ;;  %v3381_v23 = vld [vmem:[%s4201_s12 + $0x10] sm:$0xff]  }
 0xfdf   :  { %1585 = vadd.xlane.f32.xlu0 %v1584_v33  ;;  %3227 = vmatpush3.bf16.msra.mxu1 %v3381_v23 }
 0xfe0   :  { %v1587_v35 = vsel %vm65_vm0, %v1579_v34, 0.0  ;;  %3228 = vmatprep.subr.bf16.mxu1 %v3513_v15 }
 0xfe3   :  { %1588 = vadd.xlane.f32.xlu0 %v1587_v35  ;;  %3229 = vmatpush3.bf16.msra.mxu1 %v3382_v45 }
 0xfe4   :  { %3246 = vmatprep.subr.bf16.mxu1 %v3513_v15 }
0x106c   :  { %v1586_v36 = vpop.xlane.xlu0 %1585 }
0x106d   :  { %v1590_v37 = vmul.f32 0.03125, %v1586_v36 }
0x106f   :  { %v1592_v38 = vsub.f32 %v1578_v30, %v1590_v37 }
0x1070   :  { %v1589_v40 = vpop.xlane.xlu0 %1588 }
0x1071   :  { %v1591_v41 = vmul.f32 0.03125, %v1589_v40  ;;  %v1594_v43 = vmul.f32 %v1592_v38, %v1592_v38 }
0x1073   :  { %v1593_v42 = vsub.f32 %v1579_v34, %v1591_v41  ;;  %v1596_v39 = vsel %vm65_vm0, %v1594_v43, 0.0  ;;  %v2909_v34 = vld [vmem:[%s4204_s15 + $0x1] ss:$0 sm:$0xff] }
0x1074   :  { %1597 = vadd.xlane.f32.xlu0 %v1596_v39 }
0x1075   :  { %v1595_v44 = vmul.f32 %v1593_v42, %v1593_v42 }
0x1077   :  { %v1599_v22 = vsel %vm65_vm0, %v1595_v44, 0.0 }
0x1078   :  { %1600 = vadd.xlane.f32.xlu0 %v1599_v22 }
0x1101   :  { %v1598_v46 = vpop.xlane.xlu0 %1597 }
0x1102   :  { %v1602_v47 = vmul.f32 0.03125, %v1598_v46 }
0x1104   :  { %v1604_v48 = vadd.f32 1e-12, %v1602_v47 }
0x1105   :  { %v1601_v49 = vpop.xlane.xlu0 %1600 }
0x1106   :  { %3449 = vrsqrt.f32 %v1604_v48  ;;  %v1603_v50 = vmul.f32 0.03125, %v1601_v49 }
0x1108   :  { %v1605_v51 = vadd.f32 1e-12, %v1603_v50 }
0x110a   :  { %3451 = vrsqrt.f32 %v1605_v51 }
0x1110   :  { %v3450_v52 = vpop.eup %3449 }
0x1111   :  { %v1608_v53 = vmul.f32 %v3450_v52, %v1592_v38 }
0x1113   :  { %v1616_v56 = vmul.f32 %v2889_v54, %v1608_v53  ;;  %v3387_v53 = vld [vmem:[%s4193_s4 + $0x20] sm:$0xff]  }
0x1114   :  { %v3452_v55 = vpop.eup %3451 }
0x1115   :  { %v1609_v57 = vmul.f32 %v3452_v55, %v1593_v42  ;;  %v1624_v32 = vadd.f32 %v2890_v58, %v1616_v56 }
0x1117   :  { %v1617_v31 = vmul.f32 %v2889_v54, %v1609_v57  ;;  %v3388_v54 = vld [vmem:[%s4193_s4 + $0x28] sm:$0xff]  }
0x1119   :  { %v1625_v60 = vadd.f32 %v2890_v58, %v1617_v31 }
0x111b   :  { %v1626_v61 = vpack.c.bf16 %v1625_v60, %v1624_v32 }
0x111d   :  { %3231 = vmatmul.mubr.msk.bf16.vlgmr.msra.gmra.mrb[40].mxu1 %vm65_vm0, %v1626_v61 }
0x111e   :  { %3250 = vmatprep.mubr.msk.bf16.mxu1 %vm3514_vm1, %v3513_v15  ;;  %3247 = vmatpush3.bf16.msra.mxu1 %v3387_v53 }
0x111f   :  { %3248 = vmatprep.subr.bf16.mxu1 %v3513_v15 }
0x1122   :  { %3249 = vmatpush3.bf16.msra.mxu1 %v3388_v54 }
0x1123   :  { %3254 = vmatprep.subr.bf16.mxu1 %v3513_v15 }
0x11f0   :  { %v1689_v3 = vpop.f32.mrb[40].mxu1 }
0x11f1   :  { %v1690_v5 = vadd.f32 %v2896_v2, %v1689_v3  ;;  %v3232_v6 = vpop.f32.mrb[41].mxu1 }
0x11f2   :  { %v1692_v7 = vpop.f32.mrb[42].mxu1 }
0x11f3   :  { %v1698_v8 = vmul.f32 0.044715, %v1690_v5  ;;  %v1693_v9 = vadd.f32 %v2896_v2, %v1692_v7  ;;  %v3233_v10 = vpop.f32.mrb[43].mxu1  ;;  %v1696_v26 = vmul.f32 0.5, %v1690_v5  ;;  %v2918_v2 = vld [vmem:[%s4200_s11 + $0x1] ss:$0 sm:$0xff] }
0x11f5   :  { %v1700_v11 = vmul.f32 %v1698_v8, %v1690_v5  ;;  %v1699_v12 = vmul.f32 0.044715, %v1693_v9  ;;  %v1697_v27 = vmul.f32 0.5, %v1693_v9  ;;  %v2924_v8 = vld [vmem:[%s4194_s5 + $0x2] ss:$0 sm:$0xff] }
0x11f7   :  { %v1702_v13 = vmul.f32 %v1700_v11, %v1690_v5  ;;  %v1701_v14 = vmul.f32 %v1699_v12, %v1693_v9 }
0x11f9   :  { %v1704_v16 = vadd.f32 %v1702_v13, %v1690_v5  ;;  %v1703_v17 = vmul.f32 %v1701_v14, %v1693_v9 }
0x11fb   :  { %v1706_v18 = vmul.f32 0.7978846, %v1704_v16  ;;  %v1705_v19 = vadd.f32 %v1703_v17, %v1693_v9 }
0x11fd   :  { %3453 = vtanh.f32 %v1706_v18  ;;  %v1707_v20 = vmul.f32 0.7978846, %v1705_v19 }
0x11ff   :  { %3455 = vtanh.f32 %v1707_v20 }
0x1207   :  { %v3454_v21 = vpop.eup %3453 }
0x1208   :  { %v1710_v24 = vadd.f32 1.0, %v3454_v21 }
0x1209   :  { %v3456_v25 = vpop.eup %3455 }
0x120a   :  { %v1711_v28 = vadd.f32 1.0, %v3456_v25  ;;  %v1712_v29 = vmul.f32 %v1710_v24, %v1696_v26 }
0x120c   :  { %v1713_v30 = vmul.f32 %v1711_v28, %v1697_v27 }
0x120e   :  { %v1714_v33 = vpack.c.bf16 %v1713_v30, %v1712_v29 }
0x1210   :  { %3243 = vmatmul.mubr.msk.bf16.vlgmr.msra.gmra.mrb[48].mxu0 %vm889_vm5, %v1714_v33 }
0x1211   :  { %3262 = vmatprep.mubr.msk.bf16.mxu0 %vm3514_vm1, %v3513_v15 }
0x12e3   :  { %v1793_v35 = vpop.f32.mrb[48].mxu0 }
0x12e4   :  { %v1794_v36 = vadd.f32 %v2909_v34, %v1793_v35  ;;  %v3244_v37 = vpop.f32.mrb[49].mxu0 }
0x12e5   :  { %v1796_v38 = vpop.f32.mrb[50].mxu0 }
0x12e6   :  { %v1797_v40 = vadd.f32 %v2909_v34, %v1796_v38  ;;  %v3245_v41 = vpop.f32.mrb[51].mxu0  ;;  %v1800_v43 = vadd.f32 %v1794_v36, %v1624_v32 }
0x12e8   :  { %v1806_v42 = vsel %vm65_vm0, %v1800_v43, 0.0  ;;  %v1801_v39 = vadd.f32 %v1797_v40, %v1625_v60 }
0x12e9   :  { %1807 = vadd.xlane.f32.xlu0 %v1806_v42 }
0x12ea   :  { %v1809_v44 = vsel %vm65_vm0, %v1801_v39, 0.0 }
0x12eb   :  { %1810 = vadd.xlane.f32.xlu1 %v1809_v44 }
0x1376   :  { %v1808_v22 = vpop.xlane.xlu0 %1807 }
0x1377   :  { %v1812_v23 = vmul.f32 0.03125, %v1808_v22 }
0x1378   :  { %v1811_v45 = vpop.xlane.xlu1 %1810 }
0x1379   :  { %v1814_v46 = vsub.f32 %v1800_v43, %v1812_v23  ;;  %v1813_v47 = vmul.f32 0.03125, %v1811_v45 }
0x137b   :  { %v1815_v48 = vsub.f32 %v1801_v39, %v1813_v47  ;;  %v1816_v49 = vmul.f32 %v1814_v46, %v1814_v46 }
0x137d   :  { %v1818_v50 = vsel %vm65_vm0, %v1816_v49, 0.0  ;;  %v1817_v51 = vmul.f32 %v1815_v48, %v1815_v48 }
0x137e   :  { %1819 = vadd.xlane.f32.xlu0 %v1818_v50 }
0x137f   :  { %v1821_v52 = vsel %vm65_vm0, %v1817_v51, 0.0 }
0x1382   :  { %1822 = vadd.xlane.f32.xlu0 %v1821_v52 }
0x140b   :  { %v1820_v55 = vpop.xlane.xlu0 %1819 }
0x140c   :  { %v1824_v56 = vmul.f32 0.03125, %v1820_v55 }
0x140e   :  { %v1826_v57 = vadd.f32 1e-12, %v1824_v56 }
0x140f   :  { %v1823_v58 = vpop.xlane.xlu0 %1822 }
0x1410   :  { %3457 = vrsqrt.f32 %v1826_v57  ;;  %v1825_v31 = vmul.f32 0.03125, %v1823_v58 }
0x1412   :  { %v1827_v32 = vadd.f32 1e-12, %v1825_v31 }
0x1414   :  { %3459 = vrsqrt.f32 %v1827_v32 }
0x141a   :  { %v3458_v60 = vpop.eup %3457 }
0x141b   :  { %v1830_v61 = vmul.f32 %v3458_v60, %v1814_v46 }
0x141d   :  { %v1838_v0 = vmul.f32 %v2917_v62, %v1830_v61 }
0x141e   :  { %v3460_v63 = vpop.eup %3459 }
0x141f   :  { %v1831_v1 = vmul.f32 %v3460_v63, %v1815_v48  ;;  %v3993_v5 = vadd.f32 %v2918_v2, %v1838_v0 }
0x1421   :  { %v1839_v3 = vmul.f32 %v2917_v62, %v1831_v1 }
0x1423   :  { %v3995_v6 = vadd.f32 %v2918_v2, %v1839_v3 }
0x1425   :  { %v1853_v7 = vpack.c.bf16 %v3995_v6, %v3993_v5 }
0x1427   :  { %3251 = vmatmul.mubr.msk.bf16.vlgmr.msra.gmra.mrb[44].mxu1 %vm65_vm0, %v1853_v7 }
0x1428   :  { %3256 = vmatprep.mubr.msk.bf16.mxu1 %vm3514_vm1, %v3513_v15 }
0x14fa   :  { %v1916_v9 = vpop.f32.mrb[44].mxu1 }
0x14fb   :  { %v1917_v10 = vadd.f32 %v2924_v8, %v1916_v9  ;;  %v3252_v11 = vpop.f32.mrb[45].mxu1 }
0x14fc   :  { %v1919_v12 = vpop.f32.mrb[46].mxu1 }
0x14fd   :  { %v4005_v13 = vpack.c.bf16 %v1917_v10, %v1917_v10  ;;  %v1920_v14 = vadd.f32 %v2924_v8, %v1919_v12  ;;  %v3253_v16 = vpop.f32.mrb[47].mxu1 }
0x14ff   :  { %2149 = vrot.lane.b32.xlu1 %v4005_v13, %s3516_s28  ;;  %1925 = vrot.lane.b32.xlu0 %v4005_v13, %s3515_s3  ;;  %v4011_v17 = vpack.c.bf16 %v1920_v14, %v1920_v14 }
0x1503   :  { %2037 = vrot.lane.b32.xlu0 %v4011_v17, %s3515_s3 }
0x1507   :  { %2147 = vrot.lane.b32.xlu0 %v4005_v13, %s3517_s29 }
0x150b   :  { %2261 = vrot.lane.b32.xlu0 %v4011_v17, %s3516_s28 }
0x150f   :  { %2259 = vrot.lane.b32.xlu0 %v4011_v17, %s3517_s29 }
0x1571   :  { %v1926_v18 = vpop.permute.xlu0 %1925  ;;  %v2150_v24 = vpop.permute.xlu1 %2149 }
0x1572   :  { %v1931_v19 = vsel %vm184_vm2, %v1926_v18, 0  ;;  %v2155_v26 = vsel %vm184_vm2, %v2150_v24, 0 }
0x1573   :  { %3255 = vmatpush3.bf16.xpose.msra.mxu1 %v1931_v19 }
0x1574   :  { %3266 = vmatprep.subr.bf16.mxu1 %v3513_v15 }
0x1575   :  { %v2038_v20 = vpop.permute.xlu0 %2037 }
0x1576   :  { %v2043_v21 = vsel %vm184_vm2, %v2038_v20, 0 }
0x1579   :  { %v2148_v25 = vpop.permute.xlu0 %2147 }
0x157a   :  { %3257 = vmatmul.mubr.msk.bf16.vlgmr.msra.gmra.mrb[48].mxu1 %vm184_vm2, %v4005_v13 }
0x157b   :  { %3267 = vmatpush3.bf16.xpose.msra.mxu1 %v2043_v21  ;;  %3268 = vmatprep.mubr.msk.bf16.mxu1 %vm3514_vm1, %v3513_v15 }
0x157c   :  { %3278 = vmatprep.subr.bf16.mxu1 %v3513_v15 }
0x157d   :  { %v2262_v27 = vpop.permute.xlu0 %2261 }
0x157e   :  { %v2267_v28 = vsel %vm184_vm2, %v2262_v27, 0 }
0x1581   :  { %v2260_v29 = vpop.permute.xlu0 %2259 }
0x1582   :  { %3269 = vmatmul.mubr.msk.bf16.vlgmr.msra.gmra.mrb[52].mxu1 %vm184_vm2, %v4011_v17 }
0x1583   :  { %3279 = vmatpush3.bf16.xpose.msra.mxu1 %v2155_v26  ;;  %3280 = vmatprep.mubr.msk.bf16.mxu1 %vm3514_vm1, %v3513_v15 }
0x1584   :  { %3290 = vmatprep.subr.bf16.mxu1 %v3513_v15 }
0x158a   :  { %3281 = vmatmul.mubr.msk.bf16.vlgmr.msra.gmra.mrb[56].mxu1 %vm184_vm2, %v2148_v25 }
0x158b   :  { %3291 = vmatpush3.bf16.xpose.msra.mxu1 %v2267_v28  ;;  %3292 = vmatprep.mubr.msk.bf16.mxu1 %vm3514_vm1, %v3513_v15 }
0x158c   :  { %3302 = vmatprep.subr.bf16.mxu1 %v3513_v15 }
0x1592   :  { %3293 = vmatmul.mubr.msk.bf16.vlgmr.msra.gmra.mrb[60].mxu1 %vm184_vm2, %v2260_v29  ;;  %v3389_v29 = vld [vmem:[%s4195_s6 + $0x20] sm:$0xff]  }
0x1593   :  { %3306 = vmatprep.mubr.msk.bf16.mxu1 %vm3514_vm1, %v3513_v15  ;;  %3303 = vmatpush3.bf16.msra.mxu1 %v3389_v29 }
0x1594   :  { %3304 = vmatprep.subr.bf16.mxu1 %v3513_v15 }
0x164d   :  { %v1967_v30 = vpop.f32.mrb[48].mxu1 }
0x164e   :  { %v1973_v33 = vmul.f32 0.25, %v1967_v30  ;;  %v3258_v34 = vpop.f32.mrb[49].mxu1 }
0x164f   :  { %v1970_v35 = vpop.f32.mrb[50].mxu1 }
0x1650   :  { %v3259_v36 = vpop.f32.mrb[51].mxu1  ;;  %v1974_v37 = vadd.f32 %v1973_v33, %v3701_v59 }
0x1652   :  { %v1975_v38 = vsel %vm237_vm3, %v1974_v37, -inf }
0x1653   :  { %1976 = vmax.xlane.f32.xlu0 %v1975_v38 }
0x1655   :  { %v2079_v40 = vpop.f32.mrb[52].mxu1 }
0x1656   :  { %v2085_v41 = vmul.f32 0.25, %v2079_v40  ;;  %v3270_v43 = vpop.f32.mrb[53].mxu1 }
0x1657   :  { %v2082_v42 = vpop.f32.mrb[54].mxu1 }
0x1658   :  { %v3271_v39 = vpop.f32.mrb[55].mxu1  ;;  %v2086_v44 = vadd.f32 %v2085_v41, %v3705_v4 }
0x165a   :  { %v2087_v22 = vsel %vm237_vm3, %v2086_v44, -inf }
0x165b   :  { %2088 = vmax.xlane.f32.xlu1 %v2087_v22 }
0x165d   :  { %v2191_v23 = vpop.f32.mrb[56].mxu1 }
0x165e   :  { %v2197_v45 = vmul.f32 0.25, %v2191_v23  ;;  %v3282_v46 = vpop.f32.mrb[57].mxu1 }
0x165f   :  { %v2194_v47 = vpop.f32.mrb[58].mxu1 }
0x1660   :  { %v3283_v48 = vpop.f32.mrb[59].mxu1  ;;  %v2198_v49 = vadd.f32 %v2197_v45, %v3701_v59 }
0x1662   :  { %v2199_v50 = vsel %vm237_vm3, %v2198_v49, -inf }
0x1663   :  { %2200 = vmax.xlane.f32.xlu0 %v2199_v50 }
0x1665   :  { %v2303_v51 = vpop.f32.mrb[60].mxu1 }
0x1666   :  { %v2309_v52 = vmul.f32 0.25, %v2303_v51  ;;  %v3294_v53 = vpop.f32.mrb[61].mxu1 }
0x1667   :  { %v2306_v54 = vpop.f32.mrb[62].mxu1 }
0x1668   :  { %v3295_v55 = vpop.f32.mrb[63].mxu1  ;;  %v2310_v56 = vadd.f32 %v2309_v52, %v3705_v4 }
0x166a   :  { %v2311_v57 = vsel %vm237_vm3, %v2310_v56, -inf }
0x166b   :  { %2312 = vmax.xlane.f32.xlu0 %v2311_v57 }
0x166c   :  { %2097 = vrot.lane.b32.xlu1 %v4011_v17, %s3518_s1 }
0x1670   :  { %2209 = vrot.lane.b32.xlu1 %v4005_v13, %s3519_s20 }
0x1674   :  { %2321 = vrot.lane.b32.xlu1 %v4011_v17, %s3519_s20 }
0x1681   :  { %1985 = vrot.lane.b32.xlu0 %v4005_v13, %s3518_s1 }
0x16e0   :  { %v1977_v59 = vpop.xlane.xlu0 %1976 }
0x16e1   :  { %v1978_v58 = vsub.f32 %v1974_v37, %v1977_v59 }
0x16e3   :  { %v1979_v31 = vmul.f32 1.442695, %v1978_v58 }
0x16e5   :  { %3461 = vpow2.f32 %v1979_v31 }
0x16e8   :  { %v2089_v32 = vpop.xlane.xlu1 %2088 }
0x16e9   :  { %v2090_v61 = vsub.f32 %v2086_v44, %v2089_v32  ;;  %v3390_v44 = vld [vmem:[%s4195_s6 + $0x28] sm:$0xff]  }
0x16ea   :  { %3305 = vmatpush3.bf16.msra.mxu1 %v3390_v44 }
0x16eb   :  { %v2091_v63 = vmul.f32 1.442695, %v2090_v61  ;;  %3318 = vmatprep.subr.bf16.mxu1 %v3513_v15 }
0x16ec   :  { %v2098_v9 = vpop.permute.xlu1 %2097 }
0x16ed   :  { %v2103_v13 = vsel %vm253_vm4, %v2098_v9, 0 }
0x16ef   :  { %v3462_v3 = vpop.eup %3461 }
0x16f0   :  { %v2201_v4 = vpop.xlane.xlu0 %2200  ;;  %v1984_v11 = vpack.c.bf16 %v3462_v3, %v3462_v3  ;;  %v1981_v14 = vsel %vm237_vm3, %v3462_v3, 0.0  ;;  %v2210_v18 = vpop.permute.xlu1 %2209 }
0x16f1   :  { %v2202_v60 = vsub.f32 %v2198_v49, %v2201_v4  ;;  %v2215_v24 = vsel %vm253_vm4, %v2210_v18, 0 }
0x16f3   :  { %v2203_v62 = vmul.f32 1.442695, %v2202_v60 }
0x16f4   :  { %v2322_v25 = vpop.permute.xlu1 %2321 }
0x16f5   :  { %3463 = vpow2.f32 %v2203_v62  ;;  %v2327_v27 = vsel %vm253_vm4, %v2322_v25, 0 }
0x16f6   :  { %3465 = vpow2.f32 %v2091_v63  ;;  %v2941_v63 = vld [vmem:[%s4196_s7 + $0x2] ss:$0 sm:$0xff] }
0x16f8   :  { %v2313_v0 = vpop.xlane.xlu0 %2312 }
0x16f9   :  { %v2314_v1 = vsub.f32 %v2310_v56, %v2313_v0 }
0x16fb   :  { %v2315_v2 = vmul.f32 1.442695, %v2314_v1 }
0x16fc   :  { %v1986_v7 = vpop.permute.xlu0 %1985 }
0x16fd   :  { %3467 = vpow2.f32 %v2315_v2  ;;  %v1991_v8 = vsel %vm253_vm4, %v1986_v7, 0 }
0x16fe   :  { %3261 = vmatpush3.bf16.msra.mxu0 %v1991_v8 }
0x16ff   :  { %v3464_v10 = vpop.eup %3463  ;;  %3272 = vmatprep.subr.bf16.mxu0 %v3513_v15 }
0x1700   :  { %v2205_v12 = vsel %vm237_vm3, %v3464_v10, 0.0  ;;  %v3466_v16 = vpop.eup %3465  ;;  %v2208_v26 = vpack.c.bf16 %v3464_v10, %v3464_v10 }
0x1701   :  { %2206 = vadd.xlane.f32.xlu0 %v2205_v12  ;;  %3263 = vmatmul.mubr.msk.bf16.vlgmr.msra.gmra.mrb[52].mxu0 %vm237_vm3, %v1984_v11  ;;  %v2093_v19 = vsel %vm237_vm3, %v3466_v16, 0.0  ;;  %v2096_v21 = vpack.c.bf16 %v3466_v16, %v3466_v16 }
0x1702   :  { %3273 = vmatpush3.bf16.msra.mxu0 %v2103_v13  ;;  %3274 = vmatprep.mubr.msk.bf16.mxu0 %vm3514_vm1, %v3513_v15 }
0x1703   :  { %3284 = vmatprep.subr.bf16.mxu0 %v3513_v15 }
0x1705   :  { %1982 = vadd.xlane.f32.xlu0 %v1981_v14 }
0x1707   :  { %v3468_v17 = vpop.eup %3467 }
0x1708   :  { %v2317_v20 = vsel %vm237_vm3, %v3468_v17, 0.0  ;;  %v2320_v28 = vpack.c.bf16 %v3468_v17, %v3468_v17 }
0x1709   :  { %2094 = vadd.xlane.f32.xlu0 %v2093_v19  ;;  %2318 = vadd.xlane.f32.xlu1 %v2317_v20 }
0x170a   :  { %3275 = vmatmul.mubr.msk.bf16.vlgmr.msra.gmra.mrb[56].mxu0 %vm237_vm3, %v2096_v21 }
0x170b   :  { %3285 = vmatpush3.bf16.msra.mxu0 %v2215_v24  ;;  %3286 = vmatprep.mubr.msk.bf16.mxu0 %vm3514_vm1, %v3513_v15 }
0x170c   :  { %3296 = vmatprep.subr.bf16.mxu0 %v3513_v15 }
0x1712   :  { %3287 = vmatmul.mubr.msk.bf16.vlgmr.msra.gmra.mrb[60].mxu0 %vm237_vm3, %v2208_v26  ;;  %v3391_v26 = vld [vmem:[%s4201_s12 + $0x20] sm:$0xff]  }
0x1713   :  { %3297 = vmatpush3.bf16.msra.mxu0 %v2327_v27  ;;  %3298 = vmatprep.mubr.msk.bf16.mxu0 %vm3514_vm1, %v3513_v15  ;;  %v3392_v27 = vld [vmem:[%s4201_s12 + $0x28] sm:$0xff]   ;;  %s3522_s12 = smov [#allocation2]  }
0x1714   :  { %3310 = vmatprep.subr.bf16.mxu0 %v3513_v15  ;;  %s2821_s25 = sshll.u32 %s3522_s12, 4  ;;  %s2822_s25 = int_to_ptr.vmem [resolvable:$true] %s2821_s25 }
0x1715   :  { %s3489_s26 = scalar_lea.vmem %s2822_s25, 32  ;;  %p3494_p1 = scmp.lt.s32.totalorder %s2822_s25, %s2822_s25 }
0x1716   :  { %p3490_p0 = scmp.ne.s32.totalorder %s2822_s25, %s3489_s26  ;;  %p3495_p2 = scmp.lt.s32.totalorder %s3489_s26, %s3489_s26 }
0x1718   :  { %p3496_p3 = por %p3495_p2, %p3494_p1 }
0x171a   :  { %3299 = vmatmul.mubr.msk.bf16.vlgmr.msra.gmra.mrb[64].mxu0 %vm237_vm3, %v2320_v28  ;;  %p3497_p4 = pnand %p3496_p3, %p3490_p0 }
0x171b   :  { %3314 = vmatprep.mubr.msk.bf16.mxu0 %vm3514_vm1, %v3513_v15  ;;  %3311 = vmatpush3.bf16.msra.mxu0 %v3391_v26 }
0x171c   :  { %3312 = vmatprep.subr.bf16.mxu0 %v3513_v15 }
0x171f   :  { %3313 = vmatpush3.bf16.msra.mxu0 %v3392_v27 }
0x1720   :  { %3330 = vmatprep.subr.bf16.mxu0 %v3513_v15 }
0x178e   :  { %v2207_v38 = vpop.xlane.xlu0 %2206 }
0x178f   :  { %3469 = vrcp.f32 %v2207_v38  ;;  %v2947_v38 = vld [vmem:[%s4197_s8 + $0x2] ss:$0 sm:$0xff] }
0x1792   :  { %v1983_v54 = vpop.xlane.xlu0 %1982 }
0x1796   :  { %v2319_v41 = vpop.xlane.xlu1 %2318  ;;  %v2095_v55 = vpop.xlane.xlu0 %2094 }
0x1797   :  { %3471 = vrcp.f32 %v2319_v41 }
0x1798   :  { %3473 = vrcp.f32 %v1983_v54 }
0x1799   :  { %v3470_v45 = vpop.eup %3469  ;;  %3475 = vrcp.f32 %v2095_v55 }
0x17a1   :  { %v3472_v46 = vpop.eup %3471 }
0x17a2   :  { %v3474_v56 = vpop.eup %3473 }
0x17a3   :  { %v3476_v57 = vpop.eup %3475 }
0x17d4   :  { %v2027_v30 = vpop.f32.mrb[52].mxu0 }
0x17d5   :  { %v3264_v33 = vpop.f32.mrb[53].mxu0  ;;  %v2034_v58 = vmul.f32 %v3474_v56, %v2027_v30 }
0x17d6   :  { %v2030_v34 = vpop.f32.mrb[54].mxu0 }
0x17d7   :  { %v3265_v35 = vpop.f32.mrb[55].mxu0 }
0x17dd   :  { %v2139_v36 = vpop.f32.mrb[56].mxu0 }
0x17de   :  { %v3276_v37 = vpop.f32.mrb[57].mxu0  ;;  %v2146_v31 = vmul.f32 %v3476_v57, %v2139_v36 }
0x17df   :  { %v2142_v40 = vpop.f32.mrb[58].mxu0 }
0x17e0   :  { %v3277_v43 = vpop.f32.mrb[59].mxu0 }
0x17e5   :  { %v2251_v42 = vpop.f32.mrb[60].mxu0 }
0x17e6   :  { %v3288_v39 = vpop.f32.mrb[61].mxu0  ;;  %v2258_v48 = vmul.f32 %v3470_v45, %v2251_v42  ;;  %v2948_v42 = vld [vmem:[%s4198_s9 + $0x2] ss:$0 sm:$0xff] }
0x17e7   :  { %v2254_v22 = vpop.f32.mrb[62].mxu0  ;;  %v3393_v45 = vld [vmem:[%s4203_s14 + $0x40] sm:$0xff]  }
0x17e8   :  { %v3289_v23 = vpop.f32.mrb[63].mxu0 }
0x17ed   :  { %v2363_v47 = vpop.f32.mrb[64].mxu0 }
0x17ee   :  { %v2370_v49 = vmul.f32 %v3472_v46, %v2363_v47  ;;  %v3300_v50 = vpop.f32.mrb[65].mxu0  ;;  %v3394_v46 = vld [vmem:[%s4203_s14 + $0x48] sm:$0xff]   ;;  %v3395_v47 = vld [vmem:[%s4203_s14 + $0x50] sm:$0xff]  }
0x17ef   :  { %v2366_v51 = vpop.f32.mrb[66].mxu0 }
0x17f0   :  { %v3362_v52 = vpack.i.bf16 %v2370_v49, %v2258_v48  ;;  %v3301_v53 = vpop.f32.mrb[67].mxu0  ;;  %v3396_v48 = vld [vmem:[%s4203_s14 + $0x58] sm:$0xff]   ;;  %v2954_v49 = vld [vmem:[%s4202_s13 + $0x2] ss:$0 sm:$0xff] }
0x17f2   :  { %3363 = vrot.lane.b32.xlu0 %v3362_v52, %s3520_s24 }
0x1864   :  { %v3364_v59 = vpop.permute.xlu0 %3363 }
0x1865   :  { %v3366_v32 = vunpack.i.h.bf16 %v3364_v59  ;;  %v3365_v4 = vunpack.i.l.bf16 %v3364_v59 }
0x1867   :  { %v2380_v60 = vsel %vm184_vm2, %v2146_v31, %v3366_v32  ;;  %v2375_v61 = vsel %vm184_vm2, %v2034_v58, %v3365_v4 }
0x1868   :  { %v2381_v62 = vpack.c.bf16 %v2380_v60, %v2375_v61 }
0x186a   :  { %3307 = vmatmul.mubr.msk.bf16.vlgmr.msra.gmra.mrb[64].mxu1 %vm65_vm0, %v2381_v62 }
0x186b   :  { %3326 = vmatprep.mubr.msk.bf16.mxu1 %vm3514_vm1, %v3513_v15  ;;  %3319 = vmatpush3.bf16.msra.mxu1 %v3393_v45 }
0x186c   :  { %3320 = vmatprep.subr.bf16.mxu1 %v3513_v15 }
0x186f   :  { %3321 = vmatpush3.bf16.msra.mxu1 %v3394_v46  ;;  %v2975_v46 = vld [vmem:[%s4199_s10 + $0x2] ss:$0 sm:$0xff] }
0x1870   :  { %3322 = vmatprep.subr.bf16.mxu1 %v3513_v15 }
0x1873   :  { %3323 = vmatpush3.bf16.msra.mxu1 %v3395_v47 }
0x1874   :  { %3324 = vmatprep.subr.bf16.mxu1 %v3513_v15 }
0x1877   :  { %3325 = vmatpush3.bf16.msra.mxu1 %v3396_v48 }
0x193d   :  { %v2444_v0 = vpop.f32.mrb[64].mxu1 }
0x193e   :  { %v2445_v1 = vadd.f32 %v2941_v63, %v2444_v0  ;;  %v3308_v2 = vpop.f32.mrb[65].mxu1 }
0x193f   :  { %v2447_v3 = vpop.f32.mrb[66].mxu1 }
0x1940   :  { %v2448_v7 = vadd.f32 %v2941_v63, %v2447_v3  ;;  %v3309_v8 = vpop.f32.mrb[67].mxu1  ;;  %v2451_v9 = vadd.f32 %v2445_v1, %v3993_v5 }
0x1942   :  { %v2457_v10 = vsel %vm65_vm0, %v2451_v9, 0.0  ;;  %v2452_v11 = vadd.f32 %v2448_v7, %v3995_v6 }
0x1943   :  { %2458 = vadd.xlane.f32.xlu1 %v2457_v10 }
0x1944   :  { %v2460_v12 = vsel %vm65_vm0, %v2452_v11, 0.0 }
0x1947   :  { %2461 = vadd.xlane.f32.xlu1 %v2460_v12 }
0x19d0   :  { %v2459_v13 = vpop.xlane.xlu1 %2458 }
0x19d1   :  { %v2463_v14 = vmul.f32 0.03125, %v2459_v13 }
0x19d3   :  { %v2465_v16 = vsub.f32 %v2451_v9, %v2463_v14 }
0x19d4   :  { %v2462_v17 = vpop.xlane.xlu1 %2461 }
0x19d5   :  { %v2464_v18 = vmul.f32 0.03125, %v2462_v17  ;;  %v2467_v19 = vmul.f32 %v2465_v16, %v2465_v16 }
0x19d7   :  { %v2466_v20 = vsub.f32 %v2452_v11, %v2464_v18  ;;  %v2469_v21 = vsel %vm65_vm0, %v2467_v19, 0.0  ;;  %v2967_v11 = vld [vmem:[%s4204_s15 + $0x2] ss:$0 sm:$0xff] }
0x19d8   :  { %2470 = vadd.xlane.f32.xlu1 %v2469_v21 }
0x19d9   :  { %v2468_v24 = vmul.f32 %v2466_v20, %v2466_v20 }
0x19db   :  { %v2472_v25 = vsel %vm65_vm0, %v2468_v24, 0.0 }
0x19dc   :  { %2473 = vadd.xlane.f32.xlu1 %v2472_v25 }
0x1a65   :  { %v2471_v28 = vpop.xlane.xlu1 %2470 }
0x1a66   :  { %v2475_v29 = vmul.f32 0.03125, %v2471_v28 }
0x1a68   :  { %v2477_v30 = vadd.f32 1e-12, %v2475_v29 }
0x1a69   :  { %v2474_v33 = vpop.xlane.xlu1 %2473 }
0x1a6a   :  { %3477 = vrsqrt.f32 %v2477_v30  ;;  %v2476_v34 = vmul.f32 0.03125, %v2474_v33 }
0x1a6c   :  { %v2478_v35 = vadd.f32 1e-12, %v2476_v34 }
0x1a6e   :  { %3479 = vrsqrt.f32 %v2478_v35 }
0x1a74   :  { %v3478_v36 = vpop.eup %3477 }
0x1a75   :  { %v2481_v37 = vmul.f32 %v3478_v36, %v2465_v16 }
0x1a77   :  { %v2489_v41 = vmul.f32 %v2947_v38, %v2481_v37  ;;  %v3397_v37 = vld [vmem:[%s4205_s16] sm:$0xff]  }
0x1a78   :  { %v3480_v40 = vpop.eup %3479 }
0x1a79   :  { %v2482_v43 = vmul.f32 %v3480_v40, %v2466_v20  ;;  %v2497_v44 = vadd.f32 %v2948_v42, %v2489_v41  ;;  %v3399_v40 = vld [vmem:[%s4205_s16 + $0x10] sm:$0xff]  }
0x1a7b   :  { %v2490_v39 = vmul.f32 %v2947_v38, %v2482_v43  ;;  %v3398_v38 = vld [vmem:[%s4205_s16 + $0x8] sm:$0xff]  }
0x1a7d   :  { %v2498_v22 = vadd.f32 %v2948_v42, %v2490_v39 }
0x1a7f   :  { %v2499_v23 = vpack.c.bf16 %v2498_v22, %v2497_v44 }
0x1a81   :  { %3315 = vmatmul.mubr.msk.bf16.vlgmr.msra.gmra.mrb[68].mxu0 %vm65_vm0, %v2499_v23  ;;  %v3400_v23 = vld [vmem:[%s4205_s16 + $0x18] sm:$0xff]   ;;  %s3521_s16 = smov 32  }
0x1a82   :  { %3338 = vmatprep.mubr.msk.bf16.mxu0 %vm3514_vm1, %v3513_v15  ;;  %3331 = vmatpush3.bf16.msra.mxu0 %v3397_v37 }
0x1a83   :  { %3332 = vmatprep.subr.bf16.mxu0 %v3513_v15 }
0x1a86   :  { %3333 = vmatpush3.bf16.msra.mxu0 %v3398_v38 }
0x1a87   :  { %3334 = vmatprep.subr.bf16.mxu0 %v3513_v15 }
0x1a8a   :  { %3335 = vmatpush3.bf16.msra.mxu0 %v3399_v40 }
0x1a8b   :  { %3336 = vmatprep.subr.bf16.mxu0 %v3513_v15  ;;  %v2976_v15 = vld [vmem:[%s4200_s11 + $0x2] ss:$0 sm:$0xff] }
0x1a8e   :  { %3337 = vmatpush3.bf16.msra.mxu0 %v3400_v23 }
0x1b54   :  { %v2562_v50 = vpop.f32.mrb[68].mxu0 }
0x1b55   :  { %v2563_v51 = vadd.f32 %v2954_v49, %v2562_v50  ;;  %v3316_v52 = vpop.f32.mrb[69].mxu0 }
0x1b56   :  { %v2565_v53 = vpop.f32.mrb[70].mxu0 }
0x1b57   :  { %v2571_v54 = vmul.f32 0.044715, %v2563_v51  ;;  %v2566_v55 = vadd.f32 %v2954_v49, %v2565_v53  ;;  %v3317_v56 = vpop.f32.mrb[71].mxu0  ;;  %v2569_v2 = vmul.f32 0.5, %v2563_v51 }
0x1b58   :  { %v1849_v56 = vrot.slane %v3995_v6, 7 }
0x1b59   :  { %v2573_v57 = vmul.f32 %v2571_v54, %v2563_v51  ;;  %v2572_v59 = vmul.f32 0.044715, %v2566_v55  ;;  %v2570_v3 = vmul.f32 0.5, %v2566_v55 }
0x1b5b   :  { %v2575_v58 = vmul.f32 %v2573_v57, %v2563_v51  ;;  %v2574_v31 = vmul.f32 %v2572_v59, %v2566_v55  ;;  %v1852_v57 = vsel %vm1851_vm6, %v3993_v5, %v1849_v56 }
0x1b5d   :  { %v2577_v32 = vadd.f32 %v2575_v58, %v2563_v51  ;;  %v2576_v4 = vmul.f32 %v2574_v31, %v2566_v55 }
0x1b5f   :  { %v2579_v60 = vmul.f32 0.7978846, %v2577_v32  ;;  %v2578_v61 = vadd.f32 %v2576_v4, %v2566_v55  ;;  %v2977_v32 = vld [vmem:[%s4206_s17] ss:$0 sm:$0xff] }
0x1b61   :  { %3481 = vtanh.f32 %v2579_v60  ;;  %v2580_v62 = vmul.f32 0.7978846, %v2578_v61 }
0x1b63   :  { %3483 = vtanh.f32 %v2580_v62 }
0x1b6b   :  { %v3482_v63 = vpop.eup %3481 }
0x1b6c   :  { %v2583_v0 = vadd.f32 1.0, %v3482_v63 }
0x1b6d   :  { %v3484_v1 = vpop.eup %3483 }
0x1b6e   :  { %v2584_v7 = vadd.f32 1.0, %v3484_v1  ;;  %v2585_v8 = vmul.f32 %v2583_v0, %v2569_v2 }
0x1b70   :  { %v2586_v9 = vmul.f32 %v2584_v7, %v2570_v3 }
0x1b72   :  { %v2587_v10 = vpack.c.bf16 %v2586_v9, %v2585_v8 }
0x1b74   :  { %3327 = vmatmul.mubr.msk.bf16.vlgmr.msra.gmra.mrb[68].mxu1 %vm889_vm5, %v2587_v10 }
0x1c47   :  { %v2666_v12 = vpop.f32.mrb[68].mxu1 }
0x1c48   :  { %v3328_v13 = vpop.f32.mrb[69].mxu1  ;;  %v2667_v16 = vadd.f32 %v2967_v11, %v2666_v12 }
0x1c49   :  { %v2669_v14 = vpop.f32.mrb[70].mxu1 }
0x1c4a   :  { %v2670_v17 = vadd.f32 %v2967_v11, %v2669_v14  ;;  %v3329_v18 = vpop.f32.mrb[71].mxu1  ;;  %v2673_v21 = vadd.f32 %v2667_v16, %v2497_v44 }
0x1c4c   :  { %v2674_v19 = vadd.f32 %v2670_v17, %v2498_v22  ;;  %v2679_v24 = vsel %vm65_vm0, %v2673_v21, 0.0 }
0x1c4e   :  { %v2682_v20 = vsel %vm65_vm0, %v2674_v19, 0.0 }
0x1c4f   :  { %2683 = vadd.xlane.f32.xlu1 %v2682_v20 }
0x1c53   :  { %2680 = vadd.xlane.f32.xlu1 %v2679_v24 }
0x1cdc   :  { %v2684_v25 = vpop.xlane.xlu1 %2683 }
0x1cdd   :  { %v2686_v26 = vmul.f32 0.03125, %v2684_v25 }
0x1cdf   :  { %v2688_v27 = vsub.f32 %v2674_v19, %v2686_v26 }
0x1ce0   :  { %v2681_v28 = vpop.xlane.xlu1 %2680 }
0x1ce1   :  { %v2685_v29 = vmul.f32 0.03125, %v2681_v28  ;;  %v2690_v30 = vmul.f32 %v2688_v27, %v2688_v27 }
0x1ce3   :  { %v2687_v33 = vsub.f32 %v2673_v21, %v2685_v29  ;;  %v2694_v34 = vsel %vm65_vm0, %v2690_v30, 0.0 }
0x1ce4   :  { %2695 = vadd.xlane.f32.xlu0 %v2694_v34 }
0x1ce5   :  { %v2689_v35 = vmul.f32 %v2687_v33, %v2687_v33 }
0x1ce7   :  { %v2691_v36 = vsel %vm65_vm0, %v2689_v35, 0.0 }
0x1ce8   :  { %2692 = vadd.xlane.f32.xlu1 %v2691_v36 }
0x1d71   :  { %v2696_v41 = vpop.xlane.xlu0 %2695 }
0x1d72   :  { %v2698_v43 = vmul.f32 0.03125, %v2696_v41 }
0x1d74   :  { %v2700_v42 = vadd.f32 1e-12, %v2698_v43 }
0x1d75   :  { %v2693_v39 = vpop.xlane.xlu1 %2692 }
0x1d76   :  { %3485 = vrsqrt.f32 %v2700_v42  ;;  %v2697_v44 = vmul.f32 0.03125, %v2693_v39 }
0x1d78   :  { %v2699_v22 = vadd.f32 1e-12, %v2697_v44 }
0x1d7a   :  { %3487 = vrsqrt.f32 %v2699_v22 }
0x1d80   :  { %v3486_v45 = vpop.eup %3485 }
0x1d81   :  { %v2704_v47 = vmul.f32 %v3486_v45, %v2688_v27 }
0x1d83   :  { %v2712_v48 = vmul.f32 %v2975_v46, %v2704_v47 }
0x1d84   :  { %v3488_v49 = vpop.eup %3487 }
0x1d85   :  { %v2703_v50 = vmul.f32 %v3488_v49, %v2687_v33  ;;  %v2720_v51 = vadd.f32 %v2976_v15, %v2712_v48 }
0x1d87   :  { %v2711_v52 = vmul.f32 %v2975_v46, %v2703_v50  ;;  %v2722_v54 = vrot.slane %v2720_v51, 7 }
0x1d89   :  { %v2719_v53 = vadd.f32 %v2976_v15, %v2711_v52 }
0x1d8b   :  { %v2724_v55 = vsel %vm1851_vm6, %v2719_v53, %v2722_v54 }
0x1d8c   :  { %2726 = vrot.lane.b32.xlu1 %v2724_v55, %s3521_s16 }
0x1dfe   :  { %v2727_v59 = vpop.permute.xlu1 %2726 }
0x1dff   :  { %v2729_v58 = vsel %vm65_vm0, %v1852_v57, %v2727_v59 }
0x1e00   :  { %v2730_v31 = vpack.c.bf16 %v2729_v58, %v2729_v58 }
0x1e02   :  { %3339 = vmatmul.mubr.msk.bf16.vlgmr.msra.gmra.mrb[72].mxu0 %vm889_vm5, %v2730_v31 }
0x1ed5   :  { %v2807_v4 = vpop.f32.mrb[72].mxu0 }
0x1ed6   :  { %v2808_v60 = vadd.f32 %v2977_v32, %v2807_v4  ;;  %v3340_v61 = vpop.f32.mrb[73].mxu0 }
0x1ed7   :  { %v2810_v6 = vpop.f32.mrb[74].mxu0 }
0x1ed8   :  { %v3341_v62 = vpop.f32.mrb[75].mxu0  ;;  %2814 = vst.msk [vmem:[#allocation2] sm:$0x3] %vm2813_vm7, %v2808_v60 }
0x1ed9   :  { %3500 = shalt.err (!%p3497_p4)
}
0x1eda   :  { %s3501_s17 = scalar_lea.hbm %s4207_s18, 32 }
0x1edb   :  { %p3502_p5 = scmp.ne.s32.totalorder %s4207_s18, %s3501_s17  ;;  %p3505_p6 = scmp.lt.u32.totalorder %s3501_s17, %s4207_s18 }
0x1edd   :  { %p3507_p7 = pnand %p3505_p6, %p3502_p5 }
0x1edf   :  { %3510 = shalt.err (!%p3507_p7)
}
0x1ee0   :  { %2824 = dma.vmem_to_hbm [thread:$0]  %s2822_s25, 32, %s4207_s18, [#allocation3]  }
0x1ee1   :  { %3511 = dma.done.wait [#allocation3], 32  }
0x1ee2   :  { %3512 = vsyncadd [#allocation3], 4294967264 }
0x1ee3   :  { %2828 = vsyncpa [#allocation3], 1 }

</bundles_post_ra>
